<compile_context>
chip_gen: v7x
topology: tpu7x:2x2x1
jax: 0.10.0
libtpu: 0.0.40
codegen_flags: <defaults>
</compile_context>

<pallas_src>
import numpy as np
import jax
import jax.numpy as jnp
from jax.experimental import pallas as pl
from jax.experimental.pallas import tpu as pltpu

# ---------------- configuration (small, deterministic) ----------------
WAVE_RES = (32, 32)        # wave_resolution
PATCH_SIZE = 8             # PSF patch size after area downsampling
IMG_SIZE = 16              # input image spatial size
BATCH = 2
CHANNELS = 3
SAMPLE_INTERVAL = 2e-6     # [m]
SENSOR_DISTANCE = 25e-3    # [m]
WAVE_LENGTHS = np.array([460e-9, 550e-9, 640e-9], dtype=np.float64)
REFRACTIVE_IDCS = np.array([1.4648, 1.4599, 1.4568], dtype=np.float64)

LANE = 128                 # padded lane width for the 3*32 / B*C*16 (=96) axes
LANE2 = 256                # padded lane width for the 3*48 (=144) axis

# ---- row offsets inside the packed constant slabs (shared builder/kernel) ----
# f32 slab "cf32" : (272, 256)
F_SCALE = 0      # rows 0:32   : [scale*I blocks | tiled aperture]
F_HR = 32        # rows 32:80  : Fresnel transfer, real (48, 256)
F_HI = 80        # rows 80:128 : Fresnel transfer, imag
F_LP = 128       # rows 128:144: bilinear@pool row factor (16, 32)
F_PRB = 144      # rows 144:272: [pool.T@bilinear.T blockdiag | channel blocksum]
CF32_ROWS = 272
# bf16 slab "cb512": (128, 512)  = [bd_frow_re | bd_frow_im]
# bf16 slab "cb256": (896, 256)
B_IFCOL = 0      # rows 0:256  : [bd_ifcol_re | bd_ifcol_im]      (256, 256)
B_FRREP = 256    # rows 256:384: [otf roll+rep re | im]           (128, 256)
B_F16BD = 384    # rows 384:512: [bd F16 re | im]                 (128, 256)
B_IF16BD = 512   # rows 512:640: [bd IF16 re | bd IF16 im]        (128, 256)
B_FCOL = 640     # rows 640:736: stacked [F48col re ; im]         (96, 32)
B_IFROW = 736    # rows 736:800: stacked [IF48row re ; im]        (64, 48)
B_FL = 800       # rows 800:832: stacked [F16@roll re ; im]       (32, 16)
B_F16 = 832      # rows 832:864: stacked [F16 re ; im]            (32, 16)
B_IF16 = 864     # rows 864:896: stacked [IF16 re ; im]           (32, 16)
CB256_ROWS = 896


# ---------------- constant builders (plain numpy, trace-time only) ----------------
def dft_matrix(n):
    k = np.arange(n)
    ang = -2.0 * np.pi * np.outer(k, k) / n
    return np.cos(ang), np.sin(ang)


def idft_matrix(n):
    k = np.arange(n)
    ang = 2.0 * np.pi * np.outer(k, k) / n
    return np.cos(ang) / n, np.sin(ang) / n


def bilinear_matrix(out_size, in_size):
    """Row factor reproducing F.interpolate(bilinear, align_corners=False)."""
    L = np.zeros((out_size, in_size), np.float64)
    scale = in_size / out_size
    for o in range(out_size):
        src = (o + 0.5) * scale - 0.5
        if src < 0.0:
            src = 0.0
        i0 = min(int(np.floor(src)), in_size - 1)
        i1 = min(i0 + 1, in_size - 1)
        w1 = src - i0
        L[o, i0] += 1.0 - w1
        L[o, i1] += w1
    return L


def block_diag(m, n):
    r, c = m.shape
    out = np.zeros((n * r, n * c), m.dtype)
    for k in range(n):
        out[k * r:(k + 1) * r, k * c:(k + 1) * c] = m
    return out


def pad_to(a, rows, cols):
    out = np.zeros((rows, cols), np.float64)
    out[:a.shape[0], :a.shape[1]] = a
    return out


def build_constants():
    Hw, Ww = WAVE_RES
    C, B, N = CHANNELS, BATCH, IMG_SIZE

    # get_coordinate: centered grid scaled by the sample interval
    xs = (np.arange(Ww) - Ww // 2) * SAMPLE_INTERVAL
    ys = (np.arange(Hw) - Hw // 2) * SAMPLE_INTERVAL
    xx, yy = np.meshgrid(xs, ys)
    aperture = (np.sqrt(xx ** 2 + yy ** 2) < xx.max()).astype(np.float64)

    # per-wavelength phase scale: wave_no * delta_N
    phi_scale = (2.0 * np.pi / WAVE_LENGTHS) * (REFRACTIVE_IDCS - 1.0)

    # deterministic parameter init: Fresnel-lens height map (zernike_volume=None branch)
    k1 = 2.0 * np.pi / WAVE_LENGTHS[1]
    fres = np.mod(-k1 * (xx ** 2 + yy ** 2) / (2.0 * SENSOR_DISTANCE), 2.0 * np.pi)
    hm_sqrt = np.sqrt(fres / k1 / (REFRACTIVE_IDCS[1] - 1.0))        # nn.Parameter

    # per-channel scale baked into a replication matmul:  phi = hm^2 @ rep3s
    rep3s = np.zeros((Hw, LANE))
    ap3 = np.zeros((Hw, LANE))
    for c in range(C):
        rep3s[:, c * Ww:(c + 1) * Ww] = phi_scale[c] * np.eye(Hw)
        ap3[:, c * Ww:(c + 1) * Ww] = aperture

    # Fresnel propagator transfer function on the zero-padded 48x48 grid
    Mpad = Hw // 4
    P = Hw + 2 * Mpad                                                # 48
    fy = (np.arange(P) - P // 2) / (SAMPLE_INTERVAL * P)
    fxx, fyy = np.meshgrid(fy, fy)
    fxx = np.fft.ifftshift(fxx)
    fyy = np.fft.ifftshift(fyy)
    sq = fxx ** 2 + fyy ** 2
    h_r = np.zeros((P, LANE2))
    h_i = np.zeros((P, LANE2))
    for c in range(C):
        ang = -np.pi * WAVE_LENGTHS[c] * SENSOR_DISTANCE * sq
        h_r[:, c * P:(c + 1) * P] = np.cos(ang)
        h_i[:, c * P:(c + 1) * P] = np.sin(ang)

    # rectangular DFT factors: zero-pad folded into the forward transform,
    # crop folded into the inverse transform.
    F48r, F48i = dft_matrix(P)
    IF48r, IF48i = idft_matrix(P)
    fcol_r, fcol_i = F48r[:, Mpad:Mpad + Hw], F48i[:, Mpad:Mpad + Hw]      # (48,32)
    frow_r, frow_i = F48r[Mpad:Mpad + Hw, :], F48i[Mpad:Mpad + Hw, :]      # (32,48)
    ifrow_r, ifrow_i = IF48r[Mpad:Mpad + Hw, :], IF48i[Mpad:Mpad + Hw, :]  # (32,48)
    ifcol_r, ifcol_i = IF48r[:, Mpad:Mpad + Hw], IF48i[:, Mpad:Mpad + Hw]  # (48,32)
    bd_frow_r = pad_to(block_diag(frow_r, C), LANE, LANE2)                 # (128,256)
    bd_frow_i = pad_to(block_diag(frow_i, C), LANE, LANE2)
    bd_ifcol_r = pad_to(block_diag(ifcol_r, C), LANE2, LANE)               # (256,128)
    bd_ifcol_i = pad_to(block_diag(ifcol_i, C), LANE2, LANE)

    # prefolded (area_downsampling -> bilinear resize) factors
    factor = Hw // PATCH_SIZE
    pool = np.zeros((PATCH_SIZE, Hw))
    for k in range(PATCH_SIZE):
        pool[k, k * factor:(k + 1) * factor] = 1.0 / factor
    lh = bilinear_matrix(N, PATCH_SIZE)
    lp = lh @ pool                                                         # (16,32)
    pr = pad_to(block_diag((lh @ pool).T, C), LANE, LANE)                  # (128,128)

    # per-channel block-sum matrix (pad columns see the total sum -> never /0)
    blkn = np.zeros((LANE, LANE))
    blkn[:C * N, :C * N] = np.kron(np.eye(C), np.ones((N, N)))
    blkn[:C * N, C * N:] = 1.0

    # image-size DFTs; the fftshift-style roll of the PSF and its replication
    # over the batch are folded into the constant factors.
    F16r, F16i = dft_matrix(N)
    IF16r, IF16i = idft_matrix(N)
    s = N // 2
    R = np.zeros((N, N))
    R[np.arange(N), (np.arange(N) + s) % N] = 1.0                          # roll rows by -s
    Rc = R.T                                                               # roll cols by -s
    fl_r, fl_i = F16r @ R, F16i @ R
    bdfr_rep_r = pad_to(np.concatenate([block_diag(Rc @ F16r, C)] * B, 1), LANE, LANE)
    bdfr_rep_i = pad_to(np.concatenate([block_diag(Rc @ F16i, C)] * B, 1), LANE, LANE)
    nbc = B * C
    bdf16_r = pad_to(block_diag(F16r, nbc), LANE, LANE)
    bdf16_i = pad_to(block_diag(F16i, nbc), LANE, LANE)
    bdif16_r = pad_to(block_diag(IF16r, nbc), LANE, LANE)
    bdif16_i = pad_to(block_diag(IF16i, nbc), LANE, LANE)

    # ---------------- pack into three slabs ----------------
    cf32 = np.zeros((CF32_ROWS, LANE2))
    cf32[F_SCALE:F_SCALE + 32, 0:LANE] = rep3s
    cf32[F_SCALE:F_SCALE + 32, LANE:LANE2] = ap3
    cf32[F_HR:F_HR + 48, :] = h_r
    cf32[F_HI:F_HI + 48, :] = h_i
    cf32[F_LP:F_LP + 16, 0:32] = lp
    cf32[F_PRB:F_PRB + 128, 0:LANE] = pr
    cf32[F_PRB:F_PRB + 128, LANE:LANE2] = blkn

    cb512 = np.zeros((LANE, 2 * LANE2))
    cb512[:, 0:LANE2] = bd_frow_r
    cb512[:, LANE2:2 * LANE2] = bd_frow_i

    cb256 = np.zeros((CB256_ROWS, LANE2))
    cb256[B_IFCOL:B_IFCOL + 256, 0:LANE] = bd_ifcol_r
    cb256[B_IFCOL:B_IFCOL + 256, LANE:LANE2] = bd_ifcol_i
    cb256[B_FRREP:B_FRREP + 128, 0:LANE] = bdfr_rep_r
    cb256[B_FRREP:B_FRREP + 128, LANE:LANE2] = bdfr_rep_i
    cb256[B_F16BD:B_F16BD + 128, 0:LANE] = bdf16_r
    cb256[B_F16BD:B_F16BD + 128, LANE:LANE2] = bdf16_i
    cb256[B_IF16BD:B_IF16BD + 128, 0:LANE] = bdif16_r
    cb256[B_IF16BD:B_IF16BD + 128, LANE:LANE2] = bdif16_i
    cb256[B_FCOL:B_FCOL + 48, 0:32] = fcol_r
    cb256[B_FCOL + 48:B_FCOL + 96, 0:32] = fcol_i
    cb256[B_IFROW:B_IFROW + 32, 0:48] = ifrow_r
    cb256[B_IFROW + 32:B_IFROW + 64, 0:48] = ifrow_i
    cb256[B_FL:B_FL + 16, 0:16] = fl_r
    cb256[B_FL + 16:B_FL + 32, 0:16] = fl_i
    cb256[B_F16:B_F16 + 16, 0:16] = F16r
    cb256[B_F16 + 16:B_F16 + 32, 0:16] = F16i
    cb256[B_IF16:B_IF16 + 16, 0:16] = IF16r
    cb256[B_IF16 + 16:B_IF16 + 32, 0:16] = IF16i

    return {
        "hm_sqrt": jnp.asarray(hm_sqrt, jnp.float32),
        "cf32": jnp.asarray(cf32, jnp.float32),
        "cb512": jnp.asarray(cb512, jnp.bfloat16),
        "cb256": jnp.asarray(cb256, jnp.bfloat16),
    }


# ---------------- the single fused Pallas kernel ----------------
def _bf(x):
    return x.astype(jnp.bfloat16)


def _dot(a, b):  # bf16 operands, f32 accumulation on the MXU
    return jnp.dot(a, b, preferred_element_type=jnp.float32)


def rgb_collimator_kernel(hm_ref, img_ref, cf32_ref, cb512_ref, cb256_ref,
                          out_img_ref, out_psf_ref):
    f32 = jnp.float32
    hi = jax.lax.Precision.HIGHEST

    # ---- static, tile-aligned views into the packed constant slabs ----
    rep3s = cf32_ref[F_SCALE:F_SCALE + 32, 0:LANE]          # scale_c * I32 blocks
    ap3 = cf32_ref[F_SCALE:F_SCALE + 32, LANE:LANE2]        # aperture tiled / padded
    h_r = cf32_ref[F_HR:F_HR + 48, :]                       # (48,256)
    h_i = cf32_ref[F_HI:F_HI + 48, :]
    lp = cf32_ref[F_LP:F_LP + 16, 0:32]                     # (16,32)
    pr = cf32_ref[F_PRB:F_PRB + 128, 0:LANE]                # (128,128)
    blkn = cf32_ref[F_PRB:F_PRB + 128, LANE:LANE2]          # (128,128)

    bdfrow_ri = cb512_ref[...]                               # (128,512) [re|im]
    bdifcol_ri = cb256_ref[B_IFCOL:B_IFCOL + 256, :]         # (256,256) [re|im]
    bdfrrep_ri = cb256_ref[B_FRREP:B_FRREP + 128, :]         # (128,256) [re|im]
    bdf16_ri = cb256_ref[B_F16BD:B_F16BD + 128, :]           # (128,256) [re|im]
    bdif16_r = cb256_ref[B_IF16BD:B_IF16BD + 128, 0:LANE]
    bdif16_i = cb256_ref[B_IF16BD:B_IF16BD + 128, LANE:LANE2]
    fcol_ri = cb256_ref[B_FCOL:B_FCOL + 96, 0:32]            # (96,32)  [re;im]
    ifrow_ri = cb256_ref[B_IFROW:B_IFROW + 64, 0:48]         # (64,48)  [re;im]
    fl_ri = cb256_ref[B_FL:B_FL + 32, 0:16]                  # (32,16)  [re;im]
    f16_ri = cb256_ref[B_F16:B_F16 + 32, 0:16]               # (32,16)  [re;im]
    if16_ri = cb256_ref[B_IF16:B_IF16 + 32, 0:16]            # (32,16)  [re;im]

    # ---- 1. phase profile (f32): phi[:, c*32+j] = wave_no_c*delta_N_c*hm[:,j] ----
    hm2 = jnp.square(hm_ref[...])                                        # (32,32)
    phi = jnp.dot(hm2, rep3s, preferred_element_type=f32, precision=hi)  # (32,128)
    fr = ap3 * jnp.cos(phi)                                              # aperture-masked
    fi = ap3 * jnp.sin(phi)                                              # field (pad lanes 0)

    # ---- 2. Fresnel propagation: IFFT2(FFT2(pad(field)) * H), pad/crop folded
    #         into rectangular DFT factors, channels batched along lanes (bf16 MXU).
    a1 = _dot(fcol_ri, _bf(fr))                                          # (96,128)
    b1 = _dot(fcol_ri, _bf(fi))
    tr = a1[0:48] - b1[48:96]
    ti = b1[0:48] + a1[48:96]                                            # (48,128)
    p1 = _dot(_bf(tr), bdfrow_ri)                                        # (48,512)
    q1 = _dot(_bf(ti), bdfrow_ri)
    yr = p1[:, 0:256] - q1[:, 256:512]
    yi = p1[:, 256:512] + q1[:, 0:256]                                   # (48,256)
    zr = yr * h_r - yi * h_i                                             # * transfer fn
    zi = yr * h_i + yi * h_r
    a2 = _dot(ifrow_ri, _bf(zr))                                         # (64,256)
    b2 = _dot(ifrow_ri, _bf(zi))
    ur = a2[0:32] - b2[32:64]
    ui = b2[0:32] + a2[32:64]                                            # (32,256)
    p2 = _dot(_bf(ur), bdifcol_ri)                                       # (32,256)
    q2 = _dot(_bf(ui), bdifcol_ri)
    wr = p2[:, 0:LANE] - q2[:, LANE:LANE2]
    wi = p2[:, LANE:LANE2] + q2[:, 0:LANE]                               # (32,128) sensor field

    # ---- 3. PSF = |field|^2, 4x4 area pool + bilinear resize (prefolded factors),
    #         exact per-channel normalization (f32).
    inten = wr * wr + wi * wi                                            # (32,128)
    t2 = jnp.dot(lp, inten, preferred_element_type=f32)                  # (16,128)
    resized = jnp.dot(t2, pr, preferred_element_type=f32)                # (16,128), pad cols 0
    colsum = jnp.dot(jnp.ones((16, 16), f32), resized,
                     preferred_element_type=f32, precision=hi)
    blksum = jnp.dot(colsum, blkn, preferred_element_type=f32, precision=hi)
    psf_norm = resized / (blksum + 1e-12)                                # per-channel sum == 1
    out_psf_ref[...] = psf_norm

    # ---- 4. OTF = FFT2(rolled psf) per channel, replicated over batch
    #         (roll + replication folded into the constants).
    a3 = _dot(fl_ri, _bf(psf_norm))                                      # (32,128)
    p3 = _dot(_bf(a3[0:16]), bdfrrep_ri)                                 # (16,256)
    q3 = _dot(_bf(a3[16:32]), bdfrrep_ri)
    otf_r = p3[:, 0:LANE] - q3[:, LANE:LANE2]
    otf_i = p3[:, LANE:LANE2] + q3[:, 0:LANE]                            # (16,128)

    # ---- 5. circular conv of all B*C images with the per-channel PSF (FFT multiply).
    a4 = _dot(f16_ri, _bf(img_ref[...]))                                 # (32,128)
    p4 = _dot(_bf(a4[0:16]), bdf16_ri)                                   # (16,256)
    q4 = _dot(_bf(a4[16:32]), bdf16_ri)
    xr = p4[:, 0:LANE] - q4[:, LANE:LANE2]
    xi = p4[:, LANE:LANE2] + q4[:, 0:LANE]
    zr2 = xr * otf_r - xi * otf_i
    zi2 = xr * otf_i + xi * otf_r
    a5 = _dot(if16_ri, _bf(zr2))                                         # (32,128)
    b5 = _dot(if16_ri, _bf(zi2))
    tr2 = a5[0:16] - b5[16:32]
    ti2 = b5[0:16] + a5[16:32]
    out = _dot(_bf(tr2), bdif16_r) - _dot(_bf(ti2), bdif16_i)            # Re(IFFT2)
    out_img_ref[...] = out


# ---------------- forward wrapper (layout plumbing only) ----------------
def rgb_collimator_forward(input_img, hm_sqrt, consts):
    B, C, H, W = input_img.shape
    # lane-concatenate the (b, c) images: (H, B*C*W), block index b*C + c, pad to 128 lanes
    img2 = jnp.transpose(input_img, (2, 0, 1, 3)).reshape(H, B * C * W)
    img2 = jnp.pad(img2, ((0, 0), (0, LANE - B * C * W)))

    vmem = pl.BlockSpec(memory_space=pltpu.MemorySpace.VMEM)
    cost = pl.CostEstimate(flops=33_000_000, transcendentals=2 * 32 * LANE,
                           bytes_accessed=1_000_000)

    out2, psf2 = pl.pallas_call(
        rgb_collimator_kernel,
        out_shape=(jax.ShapeDtypeStruct((H, LANE), jnp.float32),
                   jax.ShapeDtypeStruct((H, LANE), jnp.float32)),
        in_specs=[vmem] * 5,
        out_specs=(vmem, vmem),
        cost_estimate=cost,
    )(hm_sqrt, img2, consts["cf32"], consts["cb512"], consts["cb256"])

    out = out2[:, :B * C * W].reshape(H, B, C, W).transpose(1, 2, 0, 3)   # (B,C,H,W)
    psf_resized = psf2[:, :C * W].reshape(H, C, W).transpose(1, 0, 2)[None]  # (1,C,H,W)
    return out, psf_resized


if __name__ == "__main__":
    consts = build_constants()
    key = jax.random.PRNGKey(0)
    input_img = jax.random.uniform(
        key, (BATCH, CHANNELS, IMG_SIZE, IMG_SIZE), dtype=jnp.float32)

    fwd = jax.jit(lambda img, hm: rgb_collimator_forward(img, hm, consts))
    out, psf_resized = fwd(input_img, consts["hm_sqrt"])
    out = jax.block_until_ready(out)
    psf_resized = jax.block_until_ready(psf_resized)

    assert out.shape == (BATCH, CHANNELS, IMG_SIZE, IMG_SIZE)
    assert psf_resized.shape == (1, CHANNELS, IMG_SIZE, IMG_SIZE)
    assert bool(jnp.all(jnp.isfinite(out)))
    assert bool(jnp.all(jnp.isfinite(psf_resized)))
    # per-channel PSF normalization is exact (f32, HIGHEST-precision sums)
    sums = jnp.sum(psf_resized, axis=(-2, -1))
    assert bool(jnp.all(jnp.abs(sums - 1.0) < 1e-3))
    # circular conv with a unit-sum PSF preserves each image's mean (to bf16-MXU accuracy)
    mean_in = jnp.mean(input_img, axis=(-2, -1))
    mean_out = jnp.mean(out, axis=(-2, -1))
    assert bool(jnp.all(jnp.abs(mean_out - mean_in) < 5e-2))
    print("KERNEL_OK")
</pallas_src>

<mosaic_0001>
module attributes {stable_mosaic.version = 11 : i64} {
  func.func @rgb_collimator_kernel(%arg0: memref<32x32xf32, #tpu.memory_space<vmem>>, %arg1: memref<16x128xf32, #tpu.memory_space<vmem>>, %arg2: memref<272x256xf32, #tpu.memory_space<vmem>>, %arg3: memref<128x512xbf16, #tpu.memory_space<vmem>>, %arg4: memref<896x256xbf16, #tpu.memory_space<vmem>>, %arg5: memref<16x128xf32, #tpu.memory_space<vmem>>, %arg6: memref<16x128xf32, #tpu.memory_space<vmem>>) attributes {dimension_semantics = [], scalar_prefetch = 0 : i64, scratch_operands = 0 : i64, tpu.core_type = #tpu.core_type<tc>} {
    %c0 = arith.constant 0 : index
    %c0_0 = arith.constant 0 : index
    %0 = vector.load %arg2[%c0, %c0_0] : memref<272x256xf32, #tpu.memory_space<vmem>>, vector<32x128xf32>
    %c0_1 = arith.constant 0 : index
    %c128 = arith.constant 128 : index
    %1 = vector.load %arg2[%c0_1, %c128] : memref<272x256xf32, #tpu.memory_space<vmem>>, vector<32x128xf32>
    %c32 = arith.constant 32 : index
    %c0_2 = arith.constant 0 : index
    %2 = vector.load %arg2[%c32, %c0_2] : memref<272x256xf32, #tpu.memory_space<vmem>>, vector<48x256xf32>
    %c80 = arith.constant 80 : index
    %c0_3 = arith.constant 0 : index
    %3 = vector.load %arg2[%c80, %c0_3] : memref<272x256xf32, #tpu.memory_space<vmem>>, vector<48x256xf32>
    %c128_4 = arith.constant 128 : index
    %c0_5 = arith.constant 0 : index
    %4 = vector.load %arg2[%c128_4, %c0_5] : memref<272x256xf32, #tpu.memory_space<vmem>>, vector<16x32xf32>
    %c144 = arith.constant 144 : index
    %c0_6 = arith.constant 0 : index
    %5 = vector.load %arg2[%c144, %c0_6] : memref<272x256xf32, #tpu.memory_space<vmem>>, vector<128x128xf32>
    %c144_7 = arith.constant 144 : index
    %c128_8 = arith.constant 128 : index
    %6 = vector.load %arg2[%c144_7, %c128_8] : memref<272x256xf32, #tpu.memory_space<vmem>>, vector<128x128xf32>
    %c0_9 = arith.constant 0 : index
    %c0_10 = arith.constant 0 : index
    %7 = vector.load %arg3[%c0_9, %c0_10] : memref<128x512xbf16, #tpu.memory_space<vmem>>, vector<128x512xbf16>
    %c0_11 = arith.constant 0 : index
    %c0_12 = arith.constant 0 : index
    %8 = vector.load %arg4[%c0_11, %c0_12] : memref<896x256xbf16, #tpu.memory_space<vmem>>, vector<256x256xbf16>
    %c256 = arith.constant 256 : index
    %c0_13 = arith.constant 0 : index
    %9 = vector.load %arg4[%c256, %c0_13] : memref<896x256xbf16, #tpu.memory_space<vmem>>, vector<128x256xbf16>
    %c384 = arith.constant 384 : index
    %c0_14 = arith.constant 0 : index
    %10 = vector.load %arg4[%c384, %c0_14] : memref<896x256xbf16, #tpu.memory_space<vmem>>, vector<128x256xbf16>
    %c512 = arith.constant 512 : index
    %c0_15 = arith.constant 0 : index
    %11 = vector.load %arg4[%c512, %c0_15] : memref<896x256xbf16, #tpu.memory_space<vmem>>, vector<128x128xbf16>
    %c512_16 = arith.constant 512 : index
    %c128_17 = arith.constant 128 : index
    %12 = vector.load %arg4[%c512_16, %c128_17] : memref<896x256xbf16, #tpu.memory_space<vmem>>, vector<128x128xbf16>
    %c640 = arith.constant 640 : index
    %c0_18 = arith.constant 0 : index
    %13 = vector.load %arg4[%c640, %c0_18] : memref<896x256xbf16, #tpu.memory_space<vmem>>, vector<96x32xbf16>
    %c736 = arith.constant 736 : index
    %c0_19 = arith.constant 0 : index
    %14 = vector.load %arg4[%c736, %c0_19] : memref<896x256xbf16, #tpu.memory_space<vmem>>, vector<64x48xbf16>
    %c800 = arith.constant 800 : index
    %c0_20 = arith.constant 0 : index
    %15 = vector.load %arg4[%c800, %c0_20] : memref<896x256xbf16, #tpu.memory_space<vmem>>, vector<32x16xbf16>
    %c832 = arith.constant 832 : index
    %c0_21 = arith.constant 0 : index
    %16 = vector.load %arg4[%c832, %c0_21] : memref<896x256xbf16, #tpu.memory_space<vmem>>, vector<32x16xbf16>
    %c864 = arith.constant 864 : index
    %c0_22 = arith.constant 0 : index
    %17 = vector.load %arg4[%c864, %c0_22] : memref<896x256xbf16, #tpu.memory_space<vmem>>, vector<32x16xbf16>
    %c0_23 = arith.constant 0 : index
    %c0_24 = arith.constant 0 : index
    %18 = vector.load %arg0[%c0_23, %c0_24] : memref<32x32xf32, #tpu.memory_space<vmem>>, vector<32x32xf32>
    %19 = arith.mulf %18, %18 : vector<32x32xf32>
    %cst = arith.constant dense<0.000000e+00> : vector<32x128xf32>
    %20 = tpu.matmul %19, %0, %cst {dimension_numbers = #tpu.dot_dimension_numbers<[1], [0], [0], [1], [0, 0, 1, 1], [], []>, precision = #tpu.contract_precision<fp32>} : vector<32x32xf32>, vector<32x128xf32>, vector<32x128xf32> -> vector<32x128xf32>
    %21 = math.cos %20 : vector<32x128xf32>
    %22 = arith.mulf %1, %21 : vector<32x128xf32>
    %23 = math.sin %20 : vector<32x128xf32>
    %24 = arith.mulf %1, %23 : vector<32x128xf32>
    %25 = arith.truncf %22 : vector<32x128xf32> to vector<32x128xbf16>
    %cst_25 = arith.constant dense<0.000000e+00> : vector<96x128xf32>
    %26 = tpu.matmul %13, %25, %cst_25 {dimension_numbers = #tpu.dot_dimension_numbers<[1], [0], [0], [1], [0, 0, 1, 1], [], []>} : vector<96x32xbf16>, vector<32x128xbf16>, vector<96x128xf32> -> vector<96x128xf32>
    %27 = arith.truncf %24 : vector<32x128xf32> to vector<32x128xbf16>
    %cst_26 = arith.constant dense<0.000000e+00> : vector<96x128xf32>
    %28 = tpu.matmul %13, %27, %cst_26 {dimension_numbers = #tpu.dot_dimension_numbers<[1], [0], [0], [1], [0, 0, 1, 1], [], []>} : vector<96x32xbf16>, vector<32x128xbf16>, vector<96x128xf32> -> vector<96x128xf32>
    %29 = vector.extract_strided_slice %26 {offsets = [0, 0], sizes = [48, 128], strides = [1, 1]} : vector<96x128xf32> to vector<48x128xf32>
    %30 = vector.extract_strided_slice %28 {offsets = [48, 0], sizes = [48, 128], strides = [1, 1]} : vector<96x128xf32> to vector<48x128xf32>
    %31 = arith.subf %29, %30 : vector<48x128xf32>
    %32 = vector.extract_strided_slice %28 {offsets = [0, 0], sizes = [48, 128], strides = [1, 1]} : vector<96x128xf32> to vector<48x128xf32>
    %33 = vector.extract_strided_slice %26 {offsets = [48, 0], sizes = [48, 128], strides = [1, 1]} : vector<96x128xf32> to vector<48x128xf32>
    %34 = arith.addf %32, %33 : vector<48x128xf32>
    %35 = arith.truncf %31 : vector<48x128xf32> to vector<48x128xbf16>
    %cst_27 = arith.constant dense<0.000000e+00> : vector<48x512xf32>
    %36 = tpu.matmul %35, %7, %cst_27 {dimension_numbers = #tpu.dot_dimension_numbers<[1], [0], [0], [1], [0, 0, 1, 1], [], []>} : vector<48x128xbf16>, vector<128x512xbf16>, vector<48x512xf32> -> vector<48x512xf32>
    %37 = arith.truncf %34 : vector<48x128xf32> to vector<48x128xbf16>
    %cst_28 = arith.constant dense<0.000000e+00> : vector<48x512xf32>
    %38 = tpu.matmul %37, %7, %cst_28 {dimension_numbers = #tpu.dot_dimension_numbers<[1], [0], [0], [1], [0, 0, 1, 1], [], []>} : vector<48x128xbf16>, vector<128x512xbf16>, vector<48x512xf32> -> vector<48x512xf32>
    %39 = vector.extract_strided_slice %36 {offsets = [0, 0], sizes = [48, 256], strides = [1, 1]} : vector<48x512xf32> to vector<48x256xf32>
    %40 = vector.extract_strided_slice %38 {offsets = [0, 256], sizes = [48, 256], strides = [1, 1]} : vector<48x512xf32> to vector<48x256xf32>
    %41 = arith.subf %39, %40 : vector<48x256xf32>
    %42 = vector.extract_strided_slice %36 {offsets = [0, 256], sizes = [48, 256], strides = [1, 1]} : vector<48x512xf32> to vector<48x256xf32>
    %43 = vector.extract_strided_slice %38 {offsets = [0, 0], sizes = [48, 256], strides = [1, 1]} : vector<48x512xf32> to vector<48x256xf32>
    %44 = arith.addf %42, %43 : vector<48x256xf32>
    %45 = arith.mulf %41, %2 : vector<48x256xf32>
    %46 = arith.mulf %44, %3 : vector<48x256xf32>
    %47 = arith.subf %45, %46 : vector<48x256xf32>
    %48 = arith.mulf %41, %3 : vector<48x256xf32>
    %49 = arith.mulf %44, %2 : vector<48x256xf32>
    %50 = arith.addf %48, %49 : vector<48x256xf32>
    %51 = arith.truncf %47 : vector<48x256xf32> to vector<48x256xbf16>
    %cst_29 = arith.constant dense<0.000000e+00> : vector<64x256xf32>
    %52 = tpu.matmul %14, %51, %cst_29 {dimension_numbers = #tpu.dot_dimension_numbers<[1], [0], [0], [1], [0, 0, 1, 1], [], []>} : vector<64x48xbf16>, vector<48x256xbf16>, vector<64x256xf32> -> vector<64x256xf32>
    %53 = arith.truncf %50 : vector<48x256xf32> to vector<48x256xbf16>
    %cst_30 = arith.constant dense<0.000000e+00> : vector<64x256xf32>
    %54 = tpu.matmul %14, %53, %cst_30 {dimension_numbers = #tpu.dot_dimension_numbers<[1], [0], [0], [1], [0, 0, 1, 1], [], []>} : vector<64x48xbf16>, vector<48x256xbf16>, vector<64x256xf32> -> vector<64x256xf32>
    %55 = vector.extract_strided_slice %52 {offsets = [0, 0], sizes = [32, 256], strides = [1, 1]} : vector<64x256xf32> to vector<32x256xf32>
    %56 = vector.extract_strided_slice %54 {offsets = [32, 0], sizes = [32, 256], strides = [1, 1]} : vector<64x256xf32> to vector<32x256xf32>
    %57 = arith.subf %55, %56 : vector<32x256xf32>
    %58 = vector.extract_strided_slice %54 {offsets = [0, 0], sizes = [32, 256], strides = [1, 1]} : vector<64x256xf32> to vector<32x256xf32>
    %59 = vector.extract_strided_slice %52 {offsets = [32, 0], sizes = [32, 256], strides = [1, 1]} : vector<64x256xf32> to vector<32x256xf32>
    %60 = arith.addf %58, %59 : vector<32x256xf32>
    %61 = arith.truncf %57 : vector<32x256xf32> to vector<32x256xbf16>
    %cst_31 = arith.constant dense<0.000000e+00> : vector<32x256xf32>
    %62 = tpu.matmul %61, %8, %cst_31 {dimension_numbers = #tpu.dot_dimension_numbers<[1], [0], [0], [1], [0, 0, 1, 1], [], []>} : vector<32x256xbf16>, vector<256x256xbf16>, vector<32x256xf32> -> vector<32x256xf32>
    %63 = arith.truncf %60 : vector<32x256xf32> to vector<32x256xbf16>
    %cst_32 = arith.constant dense<0.000000e+00> : vector<32x256xf32>
    %64 = tpu.matmul %63, %8, %cst_32 {dimension_numbers = #tpu.dot_dimension_numbers<[1], [0], [0], [1], [0, 0, 1, 1], [], []>} : vector<32x256xbf16>, vector<256x256xbf16>, vector<32x256xf32> -> vector<32x256xf32>
    %65 = vector.extract_strided_slice %62 {offsets = [0, 0], sizes = [32, 128], strides = [1, 1]} : vector<32x256xf32> to vector<32x128xf32>
    %66 = vector.extract_strided_slice %64 {offsets = [0, 128], sizes = [32, 128], strides = [1, 1]} : vector<32x256xf32> to vector<32x128xf32>
    %67 = arith.subf %65, %66 : vector<32x128xf32>
    %68 = vector.extract_strided_slice %62 {offsets = [0, 128], sizes = [32, 128], strides = [1, 1]} : vector<32x256xf32> to vector<32x128xf32>
    %69 = vector.extract_strided_slice %64 {offsets = [0, 0], sizes = [32, 128], strides = [1, 1]} : vector<32x256xf32> to vector<32x128xf32>
    %70 = arith.addf %68, %69 : vector<32x128xf32>
    %71 = arith.mulf %67, %67 : vector<32x128xf32>
    %72 = arith.mulf %70, %70 : vector<32x128xf32>
    %73 = arith.addf %71, %72 : vector<32x128xf32>
    %cst_33 = arith.constant dense<0.000000e+00> : vector<16x128xf32>
    %74 = tpu.matmul %4, %73, %cst_33 {dimension_numbers = #tpu.dot_dimension_numbers<[1], [0], [0], [1], [0, 0, 1, 1], [], []>} : vector<16x32xf32>, vector<32x128xf32>, vector<16x128xf32> -> vector<16x128xf32>
    %cst_34 = arith.constant dense<0.000000e+00> : vector<16x128xf32>
    %75 = tpu.matmul %74, %5, %cst_34 {dimension_numbers = #tpu.dot_dimension_numbers<[1], [0], [0], [1], [0, 0, 1, 1], [], []>} : vector<16x128xf32>, vector<128x128xf32>, vector<16x128xf32> -> vector<16x128xf32>
    %cst_35 = arith.constant 1.000000e+00 : f32
    %76 = vector.broadcast %cst_35 : f32 to vector<16x16xf32>
    %cst_36 = arith.constant dense<0.000000e+00> : vector<16x128xf32>
    %77 = tpu.matmul %76, %75, %cst_36 {dimension_numbers = #tpu.dot_dimension_numbers<[1], [0], [0], [1], [0, 0, 1, 1], [], []>, precision = #tpu.contract_precision<fp32>} : vector<16x16xf32>, vector<16x128xf32>, vector<16x128xf32> -> vector<16x128xf32>
    %cst_37 = arith.constant dense<0.000000e+00> : vector<16x128xf32>
    %78 = tpu.matmul %77, %6, %cst_37 {dimension_numbers = #tpu.dot_dimension_numbers<[1], [0], [0], [1], [0, 0, 1, 1], [], []>, precision = #tpu.contract_precision<fp32>} : vector<16x128xf32>, vector<128x128xf32>, vector<16x128xf32> -> vector<16x128xf32>
    %cst_38 = arith.constant 9.99999996E-13 : f32
    %79 = vector.broadcast %cst_38 : f32 to vector<16x128xf32>
    %80 = arith.addf %78, %79 : vector<16x128xf32>
    %81 = arith.divf %75, %80 : vector<16x128xf32>
    %c0_39 = arith.constant 0 : index
    %c0_40 = arith.constant 0 : index
    %82 = vector.load %arg6[%c0_39, %c0_40] : memref<16x128xf32, #tpu.memory_space<vmem>>, vector<16x128xf32>
    tpu.vector_store %arg6[%c0_39, %c0_40], %81 {strides = array<i32>} : memref<16x128xf32, #tpu.memory_space<vmem>>, vector<16x128xf32>,
    %83 = arith.truncf %81 : vector<16x128xf32> to vector<16x128xbf16>
    %cst_41 = arith.constant dense<0.000000e+00> : vector<32x128xf32>
    %84 = tpu.matmul %15, %83, %cst_41 {dimension_numbers = #tpu.dot_dimension_numbers<[1], [0], [0], [1], [0, 0, 1, 1], [], []>} : vector<32x16xbf16>, vector<16x128xbf16>, vector<32x128xf32> -> vector<32x128xf32>
    %85 = vector.extract_strided_slice %84 {offsets = [0, 0], sizes = [16, 128], strides = [1, 1]} : vector<32x128xf32> to vector<16x128xf32>
    %86 = arith.truncf %85 : vector<16x128xf32> to vector<16x128xbf16>
    %cst_42 = arith.constant dense<0.000000e+00> : vector<16x256xf32>
    %87 = tpu.matmul %86, %9, %cst_42 {dimension_numbers = #tpu.dot_dimension_numbers<[1], [0], [0], [1], [0, 0, 1, 1], [], []>} : vector<16x128xbf16>, vector<128x256xbf16>, vector<16x256xf32> -> vector<16x256xf32>
    %88 = vector.extract_strided_slice %84 {offsets = [16, 0], sizes = [16, 128], strides = [1, 1]} : vector<32x128xf32> to vector<16x128xf32>
    %89 = arith.truncf %88 : vector<16x128xf32> to vector<16x128xbf16>
    %cst_43 = arith.constant dense<0.000000e+00> : vector<16x256xf32>
    %90 = tpu.matmul %89, %9, %cst_43 {dimension_numbers = #tpu.dot_dimension_numbers<[1], [0], [0], [1], [0, 0, 1, 1], [], []>} : vector<16x128xbf16>, vector<128x256xbf16>, vector<16x256xf32> -> vector<16x256xf32>
    %91 = vector.extract_strided_slice %87 {offsets = [0, 0], sizes = [16, 128], strides = [1, 1]} : vector<16x256xf32> to vector<16x128xf32>
    %92 = vector.extract_strided_slice %90 {offsets = [0, 128], sizes = [16, 128], strides = [1, 1]} : vector<16x256xf32> to vector<16x128xf32>
    %93 = arith.subf %91, %92 : vector<16x128xf32>
    %94 = vector.extract_strided_slice %87 {offsets = [0, 128], sizes = [16, 128], strides = [1, 1]} : vector<16x256xf32> to vector<16x128xf32>
    %95 = vector.extract_strided_slice %90 {offsets = [0, 0], sizes = [16, 128], strides = [1, 1]} : vector<16x256xf32> to vector<16x128xf32>
    %96 = arith.addf %94, %95 : vector<16x128xf32>
    %c0_44 = arith.constant 0 : index
    %c0_45 = arith.constant 0 : index
    %97 = vector.load %arg1[%c0_44, %c0_45] : memref<16x128xf32, #tpu.memory_space<vmem>>, vector<16x128xf32>
    %98 = arith.truncf %97 : vector<16x128xf32> to vector<16x128xbf16>
    %cst_46 = arith.constant dense<0.000000e+00> : vector<32x128xf32>
    %99 = tpu.matmul %16, %98, %cst_46 {dimension_numbers = #tpu.dot_dimension_numbers<[1], [0], [0], [1], [0, 0, 1, 1], [], []>} : vector<32x16xbf16>, vector<16x128xbf16>, vector<32x128xf32> -> vector<32x128xf32>
    %100 = vector.extract_strided_slice %99 {offsets = [0, 0], sizes = [16, 128], strides = [1, 1]} : vector<32x128xf32> to vector<16x128xf32>
    %101 = arith.truncf %100 : vector<16x128xf32> to vector<16x128xbf16>
    %cst_47 = arith.constant dense<0.000000e+00> : vector<16x256xf32>
    %102 = tpu.matmul %101, %10, %cst_47 {dimension_numbers = #tpu.dot_dimension_numbers<[1], [0], [0], [1], [0, 0, 1, 1], [], []>} : vector<16x128xbf16>, vector<128x256xbf16>, vector<16x256xf32> -> vector<16x256xf32>
    %103 = vector.extract_strided_slice %99 {offsets = [16, 0], sizes = [16, 128], strides = [1, 1]} : vector<32x128xf32> to vector<16x128xf32>
    %104 = arith.truncf %103 : vector<16x128xf32> to vector<16x128xbf16>
    %cst_48 = arith.constant dense<0.000000e+00> : vector<16x256xf32>
    %105 = tpu.matmul %104, %10, %cst_48 {dimension_numbers = #tpu.dot_dimension_numbers<[1], [0], [0], [1], [0, 0, 1, 1], [], []>} : vector<16x128xbf16>, vector<128x256xbf16>, vector<16x256xf32> -> vector<16x256xf32>
    %106 = vector.extract_strided_slice %102 {offsets = [0, 0], sizes = [16, 128], strides = [1, 1]} : vector<16x256xf32> to vector<16x128xf32>
    %107 = vector.extract_strided_slice %105 {offsets = [0, 128], sizes = [16, 128], strides = [1, 1]} : vector<16x256xf32> to vector<16x128xf32>
    %108 = arith.subf %106, %107 : vector<16x128xf32>
    %109 = vector.extract_strided_slice %102 {offsets = [0, 128], sizes = [16, 128], strides = [1, 1]} : vector<16x256xf32> to vector<16x128xf32>
    %110 = vector.extract_strided_slice %105 {offsets = [0, 0], sizes = [16, 128], strides = [1, 1]} : vector<16x256xf32> to vector<16x128xf32>
    %111 = arith.addf %109, %110 : vector<16x128xf32>
    %112 = arith.mulf %108, %93 : vector<16x128xf32>
    %113 = arith.mulf %111, %96 : vector<16x128xf32>
    %114 = arith.subf %112, %113 : vector<16x128xf32>
    %115 = arith.mulf %108, %96 : vector<16x128xf32>
    %116 = arith.mulf %111, %93 : vector<16x128xf32>
    %117 = arith.addf %115, %116 : vector<16x128xf32>
    %118 = arith.truncf %114 : vector<16x128xf32> to vector<16x128xbf16>
    %cst_49 = arith.constant dense<0.000000e+00> : vector<32x128xf32>
    %119 = tpu.matmul %17, %118, %cst_49 {dimension_numbers = #tpu.dot_dimension_numbers<[1], [0], [0], [1], [0, 0, 1, 1], [], []>} : vector<32x16xbf16>, vector<16x128xbf16>, vector<32x128xf32> -> vector<32x128xf32>
    %120 = arith.truncf %117 : vector<16x128xf32> to vector<16x128xbf16>
    %cst_50 = arith.constant dense<0.000000e+00> : vector<32x128xf32>
    %121 = tpu.matmul %17, %120, %cst_50 {dimension_numbers = #tpu.dot_dimension_numbers<[1], [0], [0], [1], [0, 0, 1, 1], [], []>} : vector<32x16xbf16>, vector<16x128xbf16>, vector<32x128xf32> -> vector<32x128xf32>
    %122 = vector.extract_strided_slice %119 {offsets = [0, 0], sizes = [16, 128], strides = [1, 1]} : vector<32x128xf32> to vector<16x128xf32>
    %123 = vector.extract_strided_slice %121 {offsets = [16, 0], sizes = [16, 128], strides = [1, 1]} : vector<32x128xf32> to vector<16x128xf32>
    %124 = arith.subf %122, %123 : vector<16x128xf32>
    %125 = vector.extract_strided_slice %121 {offsets = [0, 0], sizes = [16, 128], strides = [1, 1]} : vector<32x128xf32> to vector<16x128xf32>
    %126 = vector.extract_strided_slice %119 {offsets = [16, 0], sizes = [16, 128], strides = [1, 1]} : vector<32x128xf32> to vector<16x128xf32>
    %127 = arith.addf %125, %126 : vector<16x128xf32>
    %128 = arith.truncf %124 : vector<16x128xf32> to vector<16x128xbf16>
    %cst_51 = arith.constant dense<0.000000e+00> : vector<16x128xf32>
    %129 = tpu.matmul %128, %11, %cst_51 {dimension_numbers = #tpu.dot_dimension_numbers<[1], [0], [0], [1], [0, 0, 1, 1], [], []>} : vector<16x128xbf16>, vector<128x128xbf16>, vector<16x128xf32> -> vector<16x128xf32>
    %130 = arith.truncf %127 : vector<16x128xf32> to vector<16x128xbf16>
    %cst_52 = arith.constant dense<0.000000e+00> : vector<16x128xf32>
    %131 = tpu.matmul %130, %12, %cst_52 {dimension_numbers = #tpu.dot_dimension_numbers<[1], [0], [0], [1], [0, 0, 1, 1], [], []>} : vector<16x128xbf16>, vector<128x128xbf16>, vector<16x128xf32> -> vector<16x128xf32>
    %132 = arith.subf %129, %131 : vector<16x128xf32>
    %c0_53 = arith.constant 0 : index
    %c0_54 = arith.constant 0 : index
    %133 = vector.load %arg5[%c0_53, %c0_54] : memref<16x128xf32, #tpu.memory_space<vmem>>, vector<16x128xf32>
    tpu.vector_store %arg5[%c0_53, %c0_54], %132 {strides = array<i32>} : memref<16x128xf32, #tpu.memory_space<vmem>>, vector<16x128xf32>,
    return
  }
}

</mosaic_0001>

<bundles_post_ra>
// kernel: _lambda_.1
= control target key start
LH: loop header
LB: loop body
LE: loop exit
PB: predicated region body
PF: predicated region fallthrough
CT: control target
= control target key end

     0   :  { %vm257_vm0 = vcmask 261120   ;;  %s8370_s2 = inlined_call_operand.vmem [shape: f32[272,256], index: 2, kind: input, shape index: {}]   ;;  %s8371_s0 = inlined_call_operand.vmem [shape: f32[32,32], index: 0, kind: input, shape index: {}]   ;;  %s8372_s4 = inlined_call_operand.vmem [shape: bf16[896,256], index: 4, kind: input, shape index: {}]   ;;  %s8373_s3 = inlined_call_operand.vmem [shape: bf16[128,512], index: 3, kind: input, shape index: {}]   ;;  %s8374_s6 = inlined_call_operand.vmem [shape: f32[16,128], index: 6, kind: output, shape index: {1}]   ;;  %s8375_s1 = inlined_call_operand.vmem [shape: f32[16,128], index: 1, kind: input, shape index: {}]   ;;  %s8376_s5 = inlined_call_operand.vmem [shape: f32[16,128], index: 5, kind: output, shape index: {0}]  }
   0x1   :  { %v23_v0 = vld [vmem:[%s8370_s2] sm:$0xff]  ;;  %v24_v1 = vld [vmem:[%s8370_s2 + $0x10] sm:$0xff]  ;;  %v250_v8 = vld [vmem:[%s8371_s0 + $0x8] sm:$0xff] }
   0x2   :  { %v25_v2 = vld [vmem:[%s8370_s2 + $0x20] sm:$0xff]  ;;  %v271_v3 = vand.u32 4294901760, %v23_v0  ;;  %v274_v4 = vand.u32 4294901760, %v24_v1  ;;  %v26_v5 = vld [vmem:[%s8370_s2 + $0x30] sm:$0xff]  ;;  %v254_v11 = vmul.f32 %v250_v8, %v250_v8  ;;  %v252_v13 = vld [vmem:[%s8371_s0 + $0x18] sm:$0xff] }
   0x3   :  { %v277_v6 = vand.u32 4294901760, %v25_v2  ;;  %v249_v7 = vld [vmem:[%s8371_s0] sm:$0xff]  ;;  %v280_v9 = vand.u32 4294901760, %v26_v5  ;;  %v251_v12 = vld [vmem:[%s8371_s0 + $0x10] sm:$0xff]  ;;  %v256_v21 = vmul.f32 %v252_v13, %v252_v13 }
   0x4   :  { %v253_v10 = vmul.f32 %v249_v7, %v249_v7  ;;  %v6697_v14 = vpack.c.bf16 %v274_v4, %v271_v3  ;;  %v6699_v15 = vsub.f32 %v23_v0, %v271_v3  ;;  %v6701_v16 = vsub.f32 %v24_v1, %v274_v4 }
   0x5   :  { %v255_v17 = vmul.f32 %v251_v12, %v251_v12  ;;  %v6703_v18 = vpack.c.bf16 %v280_v9, %v277_v6  ;;  %v262_v20 = vsel %vm257_vm0, %v254_v11, 0  ;;  %v268_v27 = vsel %vm257_vm0, %v256_v21, 0 }
   0x6   :  { %v259_v19 = vsel %vm257_vm0, %v253_v10, 0  ;;  %6040 = vmatprep.subr.bf16.mxu0 %v6697_v14  ;;  %v6710_v23 = vand.u32 4294901760, %v262_v20  ;;  %v382_v24 = vand.u32 4294901760, %v6699_v15  ;;  %v389_v25 = vand.u32 4294901760, %v6701_v16 }
   0x7   :  { %v6708_v22 = vand.u32 4294901760, %v259_v19  ;;  %6042 = vmatpush3.bf16.msra.mxu0 %v6697_v14  ;;  %v265_v26 = vsel %vm257_vm0, %v255_v17, 0  ;;  %v6717_v28 = vsub.f32 %v25_v2, %v277_v6  ;;  %v6719_v29 = vsub.f32 %v26_v5, %v280_v9 }
   0x8   :  { %6044 = vmatprep.subr.bf16.mxu0 %v6703_v18  ;;  %v350_v31 = vsub.f32 %v262_v20, %v6710_v23  ;;  %v383_v32 = vsub.f32 %v6699_v15, %v382_v24  ;;  %v390_v33 = vsub.f32 %v6701_v16, %v389_v25  ;;  %v6728_v34 = vand.u32 4294901760, %v265_v26 }
   0x9   :  { %v340_v30 = vsub.f32 %v259_v19, %v6708_v22  ;;  %v6730_v35 = vand.u32 4294901760, %v268_v27  ;;  %v396_v36 = vand.u32 4294901760, %v6717_v28  ;;  %v403_v37 = vand.u32 4294901760, %v6719_v29 }
   0xa   :  { %v351_v39 = vand.u32 4294901760, %v350_v31  ;;  %v384_v40 = vand.u32 4294901760, %v383_v32  ;;  %v391_v41 = vand.u32 4294901760, %v390_v33  ;;  %v360_v42 = vsub.f32 %v265_v26, %v6728_v34 }
   0xb   :  { %v341_v38 = vand.u32 4294901760, %v340_v30  ;;  %6046 = vmatpush3.bf16.msra.mxu0 %v6703_v18  ;;  %v370_v43 = vsub.f32 %v268_v27, %v6730_v35  ;;  %v397_v44 = vsub.f32 %v6717_v28, %v396_v36  ;;  %v404_v45 = vsub.f32 %v6719_v29, %v403_v37 }
   0xc   :  { %v352_v47 = vsub.f32 %v350_v31, %v351_v39  ;;  %v6047_v48 = vpack.c.bf16 %v391_v41, %v384_v40  ;;  %v361_v49 = vand.u32 4294901760, %v360_v42  ;;  %v6055_v60 = vpack.c.bf16 %v6701_v16, %v6699_v15 }
   0xd   :  { %v342_v46 = vsub.f32 %v340_v30, %v341_v38  ;;  %v371_v50 = vand.u32 4294901760, %v370_v43  ;;  %v398_v51 = vand.u32 4294901760, %v397_v44  ;;  %v405_v52 = vand.u32 4294901760, %v404_v45 }
   0xe   :  { %v353_v54 = vand.u32 4294901760, %v352_v47  ;;  %6048 = vmatprep.subr.bf16.mxu0 %v6047_v48  ;;  %v362_v55 = vsub.f32 %v360_v42, %v361_v49  ;;  %v6059_v61 = vpack.c.bf16 %v6719_v29, %v6717_v28  ;;  %v6071_v62 = vpack.c.bf16 %v389_v25, %v382_v24 }
   0xf   :  { %v343_v53 = vand.u32 4294901760, %v342_v46  ;;  %v372_v56 = vsub.f32 %v370_v43, %v371_v50  ;;  %v6051_v57 = vpack.c.bf16 %v405_v52, %v398_v51  ;;  %v6075_v63 = vpack.c.bf16 %v403_v37, %v396_v36 }
  0x10   :  { %v363_v58 = vand.u32 4294901760, %v362_v55  ;;  %v6628_v33 = vmov 683565275   ;;  %v6629_v37 = vmov 2475754826  }
  0x11   :  { %5569 = vmatprep.mubr.f32.mxu0 %v343_v53  ;;  %v373_v59 = vand.u32 4294901760, %v372_v56  ;;  %v6631_v41 = vmov 2102212464   ;;  %v6431_v56 = vld [vmem:[%s8372_s4 + $0x280] ss:$8 sps:$4 sm:$0xff]  }
  0x12   :  { %5570 = vmatmul.mubr.f32.vlgmr.msra.gmra.mrb[0].mxu0 %v353_v54  ;;  %5649 = vmatprep.mubr.msk.bf16.mxu1 %vm257_vm0, %v6431_v56 }
  0x13   :  { %6050 = vmatpush3.bf16.msra.mxu0 %v6047_v48  ;;  %5572 = vmatprep.mubr.f32.mxu0 %v363_v58 }
  0x14   :  { %6052 = vmatprep.subr.bf16.mxu0 %v6051_v57 }
  0x16   :  { %5573 = vmatmul.mubr.f32.gmra.mrb[2].mxu0 %v373_v59 }
  0x17   :  { %6054 = vmatpush3.bf16.msra.mxu0 %v6051_v57  ;;  %5583 = vmatprep.mubr.f32.mxu0 %v6708_v22 }
  0x18   :  { %6056 = vmatprep.subr.bf16.mxu0 %v6055_v60 }
  0x1a   :  { %5584 = vmatmul.mubr.f32.vlgmr.msra.gmra.mrb[0].mxu0 %v6710_v23 }
  0x1b   :  { %6058 = vmatpush3.bf16.msra.mxu0 %v6055_v60  ;;  %5586 = vmatprep.mubr.f32.mxu0 %v6728_v34 }
  0x1c   :  { %6060 = vmatprep.subr.bf16.mxu0 %v6059_v61 }
  0x1e   :  { %5587 = vmatmul.mubr.f32.gmra.mrb[2].mxu0 %v6730_v35 }
  0x1f   :  { %6062 = vmatpush3.bf16.msra.mxu0 %v6059_v61  ;;  %5597 = vmatprep.mubr.f32.mxu0 %v340_v30 }
  0x20   :  { %6064 = vmatprep.subr.bf16.mxu0 %v6697_v14 }
  0x22   :  { %5598 = vmatmul.mubr.f32.vlgmr.msra.gmra.mrb[0].mxu0 %v350_v31 }
  0x23   :  { %6066 = vmatpush3.bf16.msra.mxu0 %v6697_v14  ;;  %5600 = vmatprep.mubr.f32.mxu0 %v360_v42 }
  0x24   :  { %6068 = vmatprep.subr.bf16.mxu0 %v6703_v18 }
  0x26   :  { %5601 = vmatmul.mubr.f32.gmra.mrb[2].mxu0 %v370_v43  ;;  %v6632_v43 = vmov 920167782  }
  0x27   :  { %6070 = vmatpush3.bf16.msra.mxu0 %v6703_v18  ;;  %5611 = vmatprep.mubr.f32.mxu0 %v341_v38 }
  0x28   :  { %6072 = vmatprep.subr.bf16.mxu0 %v6071_v62 }
  0x2a   :  { %5612 = vmatmul.mubr.f32.vlgmr.msra.gmra.mrb[0].mxu0 %v351_v39  ;;  %v6630_v39 = vmov 2131351028  }
  0x2b   :  { %6074 = vmatpush3.bf16.msra.mxu0 %v6071_v62  ;;  %5614 = vmatprep.mubr.f32.mxu0 %v361_v49 }
  0x2c   :  { %6076 = vmatprep.subr.bf16.mxu0 %v6075_v63 }
  0x2e   :  { %5615 = vmatmul.mubr.f32.gmra.mrb[2].mxu0 %v371_v50  ;;  %v6633_v50 = vmov 1326507024  }
  0x2f   :  { %6078 = vmatpush3.bf16.msra.mxu0 %v6075_v63  ;;  %5625 = vmatprep.mubr.f32.mxu0 %v6708_v22 }
  0x30   :  { %6080 = vmatprep.subr.bf16.mxu0 %v6697_v14 }
  0x32   :  { %5626 = vmatmul.mubr.f32.vlgmr.msra.gmra.mrb[0].mxu0 %v6710_v23 }
  0x33   :  { %6082 = vmatpush3.bf16.msra.mxu0 %v6697_v14  ;;  %5628 = vmatprep.mubr.f32.mxu0 %v6728_v34 }
  0x34   :  { %6084 = vmatprep.subr.bf16.mxu0 %v6703_v18 }
  0x36   :  { %5629 = vmatmul.mubr.f32.gmra.mrb[2].mxu0 %v6730_v35 }
  0x37   :  { %6086 = vmatpush3.bf16.msra.mxu0 %v6703_v18  ;;  %5639 = vmatprep.mubr.f32.mxu0 %v6708_v22 }
  0x3a   :  { %5640 = vmatmul.mubr.f32.vlgmr.msra.gmra.mrb[0].mxu0 %v6710_v23 }
  0x3b   :  { %5642 = vmatprep.mubr.f32.mxu0 %v6728_v34 }
  0x3e   :  { %5643 = vmatmul.mubr.f32.gmra.mrb[2].mxu0 %v6730_v35 }
 0x10d   :  { %v6765_v0 = vpop.f32.mrb[0].mxu0 }
 0x10e   :  { %v987_v1 = vand.u32 2147483647, %v6765_v0  ;;  %v990_v2 = vand.u32 2139095040, %v6765_v0  ;;  %v6769_v3 = vpop.f32.mrb[1].mxu0  ;;  %vm989_vm14 = vcmp.lt.s32.totalorder %v6765_v0, 0 }
 0x10f   :  { %v884_v4 = vand.u32 2147483647, %v6769_v3  ;;  %v887_v5 = vand.u32 2139095040, %v6769_v3 }
 0x110   :  { %v991_v6 = vshrl.u32 %v990_v2, 23  ;;  %v994_v7 = vand.u32 8388607, %v987_v1 }
 0x111   :  { %v888_v8 = vshrl.u32 %v887_v5, 23  ;;  %v891_v9 = vand.u32 8388607, %v884_v4  ;;  %v6777_v10 = vpop.f32.mrb[2].mxu0 }
 0x112   :  { %v5119_v11 = vadd.s32 4294967169, %v991_v6  ;;  %v6779_v12 = vpop.f32.mrb[3].mxu0  ;;  %v1196_v14 = vand.u32 2139095040, %v6777_v10  ;;  %v995_v15 = vor.u32 8388608, %v994_v7  ;;  %v1193_v19 = vand.u32 2147483647, %v6777_v10 }
 0x113   :  { %v5115_v13 = vadd.s32 4294967169, %v888_v8  ;;  %v892_v17 = vor.u32 8388608, %v891_v9  ;;  %v1090_v23 = vand.u32 2147483647, %v6779_v12  ;;  %v1093_v31 = vand.u32 2139095040, %v6779_v12 }
 0x114   :  { %v997_v16 = vadd.s32 1, %v5119_v11  ;;  %v1197_v20 = vshrl.u32 %v1196_v14, 23  ;;  %v6784_v26 = vshll.u32 %v995_v15, 8  ;;  %v6792_v30 = vand.u32 8388607, %v1193_v19 }
 0x115   :  { %v894_v18 = vadd.s32 1, %v5115_v13  ;;  %v6788_v29 = vshll.u32 %v892_v17, 8 }
 0x116   :  { %vm998_vm1 = vcmp.gt.s32.totalorder %v997_v16, 0  ;;  %v5127_v22 = vadd.s32 4294967169, %v1197_v20 }
 0x117   :  { %v999_v21 = vsel %vm998_vm1, %v997_v16, 0  ;;  %vm895_vm2 = vcmp.gt.s32.totalorder %v894_v18, 0 }
 0x118   :  { %v1000_v24 = vshrl.u32 %v999_v21, 5  ;;  %v1001_v25 = vand.u32 31, %v999_v21  ;;  %v896_v27 = vsel %vm895_vm2, %v894_v18, 0  ;;  %v6796_v36 = vadd.s32 1, %v5127_v22 }
 0x119   :  { %v6786_v28 = vshrl.u32 %v896_v27, 5  ;;  %v898_v35 = vand.u32 31, %v896_v27 }
 0x11a   :  { %v1002_v32 = vsub.s32 32, %v1001_v25  ;;  %v1004_v34 = vshll.u32 %v6628_v33, %v1001_v25  ;;  %v1007_v38 = vshll.u32 %v6629_v37, %v1001_v25  ;;  %v1010_v40 = vshll.u32 %v6630_v39, %v1001_v25 }
 0x11b   :  { %v1013_v42 = vshll.u32 %v6631_v41, %v1001_v25  ;;  %v1016_v44 = vshll.u32 %v6632_v43, %v1001_v25  ;;  %vm1019_vm3 = vcmp.lt.s32.totalorder %v1000_v24, 1  ;;  %vm1020_vm4 = vcmp.lt.s32.totalorder %v1000_v24, 2 }
 0x11c   :  { %v1005_v45 = vshrl.u32 %v6629_v37, %v1002_v32  ;;  %v1008_v46 = vshrl.u32 %v6630_v39, %v1002_v32  ;;  %v1011_v47 = vshrl.u32 %v6631_v41, %v1002_v32  ;;  %v1003_v48 = vshrl.u32 %v6628_v33, %v1002_v32 }
 0x11d   :  { %v1014_v49 = vshrl.u32 %v6632_v43, %v1002_v32  ;;  %v1017_v51 = vshrl.u32 %v6633_v50, %v1002_v32  ;;  %v899_v55 = vsub.s32 32, %v898_v35  ;;  %vm1021_vm5 = vcmp.lt.s32.totalorder %v1000_v24, 3 }
 0x11e   :  { %v1006_v52 = vor.u32 %v1005_v45, %v1004_v34  ;;  %v1009_v53 = vor.u32 %v1008_v46, %v1007_v38  ;;  %v1012_v54 = vor.u32 %v1011_v47, %v1010_v40  ;;  %vm1022_vm6 = vcmp.lt.s32.totalorder %v1000_v24, 4 }
 0x11f   :  { %v1015_v57 = vor.u32 %v1014_v49, %v1013_v42  ;;  %v1018_v58 = vor.u32 %v1017_v51, %v1016_v44  ;;  %v901_v6 = vshll.u32 %v6628_v33, %v898_v35  ;;  %v902_v9 = vshrl.u32 %v6629_v37, %v899_v55 }
 0x120   :  { %v1023_v59 = vsel %vm1019_vm3, %v1003_v48, %v1006_v52  ;;  %v1024_v60 = vsel %vm1022_vm6, %v1012_v54, 2102212464  ;;  %v1027_v61 = vsel %vm1019_vm3, %v1006_v52, %v1009_v53  ;;  %v1031_v62 = vsel %vm1019_vm3, %v1009_v53, %v1012_v54 }
 0x121   :  { %v1025_v63 = vsel %vm1021_vm5, %v1009_v53, %v1024_v60  ;;  %v1028_v2 = vsel %vm1022_vm6, %v1015_v57, 920167782  ;;  %v1032_v5 = vsel %vm1022_vm6, %v1018_v58, 1326507024  ;;  %v904_v11 = vshll.u32 %v6629_v37, %v898_v35 }
 0x122   :  { %v1029_v7 = vsel %vm1021_vm5, %v1012_v54, %v1028_v2  ;;  %v1033_v8 = vsel %vm1021_vm5, %v1015_v57, %v1032_v5  ;;  %v1026_v13 = vsel %vm1020_vm4, %v1023_v59, %v1025_v63  ;;  %v905_v16 = vshrl.u32 %v6630_v39, %v899_v55 }
 0x123   :  { %v1030_v14 = vsel %vm1020_vm4, %v1027_v61, %v1029_v7  ;;  %v1034_v15 = vsel %vm1020_vm4, %v1031_v62, %v1033_v8  ;;  %v903_v22 = vor.u32 %v902_v9, %v901_v6  ;;  %v907_v27 = vshll.u32 %v6630_v39, %v898_v35 }
 0x124   :  { %v6823_v17 = vmul.u32.u64.low %v6784_v26, %v1034_v15  ;;  %v6824_v18 = vmul.u32.u64.high %v6784_v26, %v1034_v15, %v6823_v17  ;;  %v6827_v20 = vmul.u32.u64.low %v6784_v26, %v1030_v14  ;;  %v6828_v21 = vmul.u32.u64.high %v6784_v26, %v1030_v14, %v6827_v20 }
 0x125   :  { %v906_v25 = vor.u32 %v905_v16, %v904_v11  ;;  %v908_v32 = vshrl.u32 %v6631_v41, %v899_v55  ;;  %v900_v24 = vshrl.u32 %v6628_v33, %v899_v55  ;;  %v910_v34 = vshll.u32 %v6631_v41, %v898_v35 }
 0x126   :  { %v911_v38 = vshrl.u32 %v6632_v43, %v899_v55  ;;  %v914_v40 = vshrl.u32 %v6633_v50, %v899_v55  ;;  %v1042_v42 = vmul.u32 %v6784_v26, %v1026_v13  ;;  %v913_v45 = vshll.u32 %v6632_v43, %v898_v35 }
 0x127   :  { %v909_v44 = vor.u32 %v908_v32, %v907_v27  ;;  %vm916_vm7 = vcmp.lt.s32.totalorder %v6786_v28, 1  ;;  %vm1044_vm8 = vc.u32 %v6824_v18, %v6827_v20  ;;  %v1045_v46 = vadd.s32 1, %v6828_v21 }
 0x128   :  { %v912_v47 = vor.u32 %v911_v38, %v910_v34  ;;  %vm917_vm9 = vcmp.lt.s32.totalorder %v6786_v28, 2  ;;  %v915_v48 = vor.u32 %v914_v40, %v913_v45  ;;  %vm918_vm10 = vcmp.lt.s32.totalorder %v6786_v28, 3 }
 0x129   :  { %vm919_vm11 = vcmp.lt.s32.totalorder %v6786_v28, 4  ;;  %v924_v49 = vsel %vm916_vm7, %v903_v22, %v906_v25  ;;  %v1046_v26 = vsel %vm1044_vm8, %v1045_v46, %v6828_v21  ;;  %v928_v52 = vsel %vm916_vm7, %v906_v25, %v909_v44 }
 0x12a   :  { %v921_v51 = vsel %vm919_vm11, %v909_v44, 2102212464  ;;  %v925_v35 = vsel %vm919_vm11, %v912_v47, 920167782  ;;  %v1047_v53 = vadd.s32 %v1046_v26, %v1042_v42  ;;  %v920_v54 = vsel %vm916_vm7, %v900_v24, %v903_v22 }
 0x12b   :  { %v926_v55 = vsel %vm918_vm10, %v909_v44, %v925_v35  ;;  %v929_v56 = vsel %vm919_vm11, %v915_v48, 1326507024  ;;  %v922_v57 = vsel %vm918_vm10, %v906_v25, %v921_v51  ;;  %vm1204_vm12 = vcmp.gt.s32.totalorder %v6796_v36, 0 }
 0x12c   :  { %v927_v58 = vsel %vm917_vm9, %v924_v49, %v926_v55  ;;  %v930_v59 = vsel %vm918_vm10, %v912_v47, %v929_v56  ;;  %v1048_v60 = vadd.s32 536870912, %v1047_v53  ;;  %v1201_v6 = vor.u32 8388608, %v6792_v30 }
 0x12d   :  { %v931_v61 = vsel %vm917_vm9, %v928_v52, %v930_v59  ;;  %v6853_v62 = vmul.u32.u64.low %v6788_v29, %v927_v58  ;;  %v6854_v63 = vmul.u32.u64.high %v6788_v29, %v927_v58, %v6853_v62  ;;  %v1205_v7 = vsel %vm1204_vm12, %v6796_v36, 0 }
 0x12e   :  { %v6858_v2 = vmul.u32.u64.low %v6788_v29, %v931_v61  ;;  %v6859_v5 = vmul.u32.u64.high %v6788_v29, %v931_v61, %v6858_v2  ;;  %v1049_v8 = vshrl.u32 %v1048_v60, 30  ;;  %v923_v9 = vsel %vm917_vm9, %v920_v54, %v922_v57 }
 0x12f   :  { %v1207_v11 = vand.u32 31, %v1205_v7  ;;  %v942_v14 = vadd.s32 1, %v6854_v63  ;;  %v1094_v16 = vshrl.u32 %v1093_v31, 23  ;;  %v939_v17 = vmul.u32 %v6788_v29, %v923_v9 }
 0x130   :  { %v1050_v13 = vshll.u32 %v1049_v8, 30  ;;  %vm941_vm13 = vc.u32 %v6859_v5, %v6853_v62  ;;  %v6871_v30 = vshll.u32 %v1201_v6, 8  ;;  %v6875_v36 = vand.u32 8388607, %v1090_v23 }
 0x131   :  { %v1208_v15 = vsub.s32 32, %v1207_v11  ;;  %v943_v21 = vsel %vm941_vm13, %v942_v14, %v6854_v63  ;;  %v1206_v25 = vshrl.u32 %v1205_v7, 5  ;;  %v1216_v32 = vshll.u32 %v6630_v39, %v1207_v11 }
 0x132   :  { %v6877_v28 = vsub.s32 %v1047_v53, %v1050_v13  ;;  %v944_v22 = vadd.s32 %v943_v21, %v939_v17  ;;  %v5123_v34 = vadd.s32 4294967169, %v1094_v16  ;;  %v1073_v38 = vsub.s32 4, %v1049_v8 }
 0x133   :  { %v1211_v27 = vshrl.u32 %v6629_v37, %v1208_v15  ;;  %v1214_v31 = vshrl.u32 %v6630_v39, %v1208_v15  ;;  %v1217_v24 = vshrl.u32 %v6631_v41, %v1208_v15  ;;  %v1210_v42 = vshll.u32 %v6628_v33, %v1207_v11 }
 0x134   :  { %v1053_v29 = vsub.s32 0, %v6877_v28  ;;  %v945_v40 = vadd.s32 536870912, %v944_v22  ;;  %v1213_v44 = vshll.u32 %v6629_v37, %v1207_v11  ;;  %v1219_v47 = vshll.u32 %v6631_v41, %v1207_v11 }
 0x135   :  { %v1218_v46 = vor.u32 %v1217_v24, %v1216_v32  ;;  %v1220_v48 = vshrl.u32 %v6632_v43, %v1208_v15  ;;  %v1212_v26 = vor.u32 %v1211_v27, %v1210_v42  ;;  %v1223_v35 = vshrl.u32 %v6633_v50, %v1208_v15 }
 0x136   :  { %v5120_v45 = vmin.u32 %v1053_v29, %v6877_v28  ;;  %v946_v49 = vshrl.u32 %v945_v40, 30  ;;  %v1215_v51 = vor.u32 %v1214_v31, %v1213_v44  ;;  %vm1225_vm15 = vcmp.lt.s32.totalorder %v1206_v25, 1 }
 0x137   :  { %v1221_v53 = vor.u32 %v1220_v48, %v1219_v47  ;;  %vm1226_vm1 = vcmp.lt.s32.totalorder %v1206_v25, 2  ;;  %v1222_v55 = vshll.u32 %v6632_v43, %v1207_v11  ;;  %vm1227_vm2 = vcmp.lt.s32.totalorder %v1206_v25, 3 }
 0x138   :  { %v1055_v52 = vclz %v5120_v45  ;;  %v947_v54 = vshll.u32 %v946_v49, 30  ;;  %vm1228_vm3 = vcmp.lt.s32.totalorder %v1206_v25, 4  ;;  %v1043_v56 = vadd.s32 %v6827_v20, %v6824_v18 }
 0x139   :  { %v1209_v58 = vshrl.u32 %v6628_v33, %v1208_v15  ;;  %v1230_v59 = vsel %vm1228_vm3, %v1218_v46, 2102212464  ;;  %vm6899_vm4 = vcmp.le.f32.partialorder %v987_v1, 0.7853982  ;;  %v1224_v63 = vor.u32 %v1223_v35, %v1222_v55 }
 0x13a   :  { %v5121_v57 = vadd.s32 4294967294, %v1055_v52  ;;  %v6903_v61 = vsub.s32 %v944_v22, %v947_v54  ;;  %v1233_v2 = vsel %vm1225_vm15, %v1212_v26, %v1215_v51  ;;  %v1234_v6 = vsel %vm1228_vm3, %v1221_v53, 920167782 }
 0x13b   :  { %v1229_v18 = vsel %vm1225_vm15, %v1209_v58, %v1212_v26  ;;  %v1231_v20 = vsel %vm1227_vm2, %v1215_v51, %v1230_v59  ;;  %v1235_v7 = vsel %vm1227_vm2, %v1218_v46, %v1234_v6  ;;  %v1074_v1 = vsel %vm989_vm14, %v1073_v38, %v1049_v8 }
 0x13c   :  { %vm5122_vm5 = vcmp.lt.s32.totalorder %v5121_v57, 0  ;;  %v950_v11 = vsub.s32 0, %v6903_v61  ;;  %v970_v13 = vsub.s32 4, %v946_v49  ;;  %v1236_v16 = vsel %vm1226_vm1, %v1233_v2, %v1235_v7 }
 0x13d   :  { %v1058_v9 = vsel %vm5122_vm5, 0, %v5121_v57  ;;  %v1237_v17 = vsel %vm1225_vm15, %v1215_v51, %v1218_v46  ;;  %v1232_v27 = vsel %vm1226_vm1, %v1229_v18, %v1231_v20  ;;  %v1238_v31 = vsel %vm1228_vm3, %v1224_v63, 1326507024 }
 0x13e   :  { %v1059_v14 = vsub.s32 32, %v1058_v9  ;;  %v1063_v15 = vsub.s32 4294967266, %v1058_v9  ;;  %v1060_v21 = vshll.u32 %v6877_v28, %v1058_v9  ;;  %v5116_v22 = vmin.u32 %v950_v11, %v6903_v61 }
 0x13f   :  { %vm6921_vm6 = vcmp.le.f32.partialorder %v884_v4, 0.7853982  ;;  %v1239_v24 = vsel %vm1227_vm2, %v1221_v53, %v1238_v31  ;;  %v1100_v38 = vadd.s32 1, %v5123_v34  ;;  %vm886_vm7 = vcmp.lt.s32.totalorder %v6769_v3, 0 }
 0x140   :  { %v1061_v29 = vshrl.u32 %v1043_v56, %v1059_v14  ;;  %v1064_v32 = vadd.s32 127, %v1063_v15  ;;  %v952_v40 = vclz %v5116_v22  ;;  %v1240_v28 = vsel %vm1226_vm1, %v1237_v17, %v1239_v24 }
 0x141   :  { %v6928_v42 = vmul.u32.u64.low %v6871_v30, %v1236_v16  ;;  %v6929_v44 = vmul.u32.u64.high %v6871_v30, %v1236_v16, %v6928_v42  ;;  %v6933_v47 = vmul.u32.u64.low %v6871_v30, %v1240_v28  ;;  %v6934_v48 = vmul.u32.u64.high %v6871_v30, %v1240_v28, %v6933_v47 }
 0x142   :  { %v1062_v45 = vor.u32 %v1061_v29, %v1060_v21  ;;  %v1065_v46 = vshll.u32 %v1064_v32, 23  ;;  %v5117_v4 = vadd.s32 4294967294, %v952_v40  ;;  %v1098_v26 = vor.u32 8388608, %v6875_v36 }
 0x143   :  { %vm1101_vm8 = vcmp.gt.s32.totalorder %v1100_v38, 0  ;;  %v6940_v25 = vsel %vm6899_vm4, 0, %v1074_v1  ;;  %v971_v51 = vsel %vm886_vm7, %v970_v13, %v946_v49  ;;  %v1248_v52 = vmul.u32 %v6871_v30, %v1232_v27 }
 0x144   :  { %v1066_v34 = vor.u32 4788187, %v1065_v46  ;;  %v1102_v35 = vsel %vm1101_vm8, %v1100_v38, 0  ;;  %vm5118_vm9 = vcmp.lt.s32.totalorder %v5117_v4, 0  ;;  %v1251_v53 = vadd.s32 1, %v6929_v44 }
 0x145   :  { %v1104_v54 = vand.u32 31, %v1102_v35  ;;  %v1069_v56 = vcvt.s32.f32 %v1062_v45  ;;  %v955_v57 = vsel %vm5118_vm9, 0, %v5117_v4  ;;  %vm1250_vm10 = vc.u32 %v6934_v48, %v6928_v42 }
 0x146   :  { %v1067_v55 = vand.u32 2147483647, %v1066_v34  ;;  %v940_v36 = vadd.s32 %v6853_v62, %v6859_v5  ;;  %v956_v58 = vsub.s32 32, %v955_v57  ;;  %v960_v59 = vsub.s32 4294967266, %v955_v57 }
 0x147   :  { %v1252_v49 = vsel %vm1250_vm10, %v1251_v53, %v6929_v44  ;;  %v6952_v2 = vadd.s32 3, %v6940_v25  ;;  %v1105_v6 = vsub.s32 32, %v1104_v54  ;;  %v957_v18 = vshll.u32 %v6903_v61, %v955_v57 }
 0x148   :  { %v1070_v63 = vmul.f32 %v1069_v56, %v1067_v55  ;;  %v1253_v30 = vadd.s32 %v1252_v49, %v1248_v52  ;;  %v958_v20 = vshrl.u32 %v940_v36, %v956_v58  ;;  %v961_v7 = vadd.s32 127, %v960_v59 }
 0x149   :  { %v973_v9 = vsel %vm6921_vm6, 0, %v971_v51  ;;  %v1108_v62 = vshrl.u32 %v6629_v37, %v1105_v6  ;;  %v1103_v14 = vshrl.u32 %v1102_v35, 5  ;;  %v1111_v15 = vshrl.u32 %v6630_v39, %v1105_v6 }
 0x14a   :  { %v1071_v1 = vxor.u32 2147483648, %v1070_v63  ;;  %v1254_v11 = vadd.s32 536870912, %v1253_v30  ;;  %v959_v5 = vor.u32 %v958_v20, %v957_v18  ;;  %v962_v13 = vshll.u32 %v961_v7, 23 }
 0x14b   :  { %v1107_v61 = vshll.u32 %v6628_v33, %v1104_v54  ;;  %v1114_v21 = vshrl.u32 %v6631_v41, %v1105_v6  ;;  %v1110_v31 = vshll.u32 %v6629_v37, %v1104_v54  ;;  %v1113_v29 = vshll.u32 %v6630_v39, %v1104_v54 }
 0x14c   :  { %v1072_v16 = vsel %vm989_vm14, %v1071_v1, %v1070_v63  ;;  %v6961_v17 = vshrl.u32 %v1254_v11, 30  ;;  %v963_v27 = vor.u32 4788187, %v962_v13  ;;  %v966_v32 = vcvt.s32.f32 %v959_v5 }
 0x14d   :  { %v1075_v22 = vsel %vm6899_vm4, %v6765_v0, %v1072_v16  ;;  %v1109_v38 = vor.u32 %v1108_v62, %v1107_v61  ;;  %v1116_v40 = vshll.u32 %v6631_v41, %v1104_v54  ;;  %v1112_v44 = vor.u32 %v1111_v15, %v1110_v31 }
 0x14e   :  { %v1256_v24 = vshll.u32 %v6961_v17, 30  ;;  %6607 = vsinq.f32 %v1075_v22  ;;  %v964_v28 = vand.u32 2147483647, %v963_v27  ;;  %v1117_v45 = vshrl.u32 %v6632_v43, %v1105_v6 }
 0x14f   :  { %6609 = vcosq.f32 %v1075_v22  ;;  %v1115_v60 = vor.u32 %v1114_v21, %v1113_v29  ;;  %v1120_v47 = vshrl.u32 %v6633_v50, %v1105_v6  ;;  %v1393_v4 = vadd.s32 3, %v973_v9 }
 0x150   :  { %v6973_v46 = vsub.s32 %v1253_v30, %v1256_v24  ;;  %v967_v37 = vmul.f32 %v966_v32, %v964_v28  ;;  %v1118_v39 = vor.u32 %v1117_v45, %v1116_v40  ;;  %v1119_v34 = vshll.u32 %v6632_v43, %v1104_v54 }
 0x151   :  { %v1106_v41 = vshrl.u32 %v6628_v33, %v1105_v6  ;;  %vm1122_vm11 = vcmp.lt.s32.totalorder %v1103_v14, 1  ;;  %v1138_v35 = vshll.u32 %v1098_v26, 8  ;;  %vm1123_vm12 = vcmp.lt.s32.totalorder %v1103_v14, 2 }
 0x152   :  { %v1259_v51 = vsub.s32 0, %v6973_v46  ;;  %v968_v52 = vxor.u32 2147483648, %v967_v37  ;;  %v1121_v53 = vor.u32 %v1120_v47, %v1119_v34  ;;  %vm1125_vm13 = vcmp.lt.s32.totalorder %v1103_v14, 4 }
 0x153   :  { %vm1124_vm14 = vcmp.lt.s32.totalorder %v1103_v14, 3  ;;  %v1127_v56 = vsel %vm1125_vm13, %v1115_v60, 2102212464  ;;  %v1130_v50 = vsel %vm1122_vm11, %v1109_v38, %v1112_v44  ;;  %v1126_v43 = vsel %vm1122_vm11, %v1106_v41, %v1109_v38 }
 0x154   :  { %v5128_v55 = vmin.u32 %v1259_v51, %v6973_v46  ;;  %v969_v57 = vsel %vm886_vm7, %v968_v52, %v967_v37  ;;  %v1128_v54 = vsel %vm1124_vm14, %v1112_v44, %v1127_v56  ;;  %v1131_v33 = vsel %vm1125_vm13, %v1118_v39, 920167782  ;;  %v28_v52 = vld [vmem:[%s8370_s2 + $0x18] sm:$0xff]  ;;  %v27_v56 = vld [vmem:[%s8370_s2 + $0x8] sm:$0xff] }
 0x155   :  { %v972_v26 = vsel %vm6921_vm6, %v6769_v3, %v969_v57  ;;  %v1132_v58 = vsel %vm1124_vm14, %v1115_v60, %v1131_v33  ;;  %v1134_v59 = vsel %vm1122_vm11, %v1112_v44, %v1115_v60  ;;  %v1135_v63 = vsel %vm1125_vm13, %v1121_v53, 1326507024 }
 0x156   :  { %v1261_v36 = vclz %v5128_v55  ;;  %6611 = vcosq.f32 %v972_v26  ;;  %v1133_v49 = vsel %vm1123_vm12, %v1130_v50, %v1132_v58  ;;  %v6991_v30 = vand.u32 3, %v973_v9 }
 0x157   :  { %6613 = vsinq.f32 %v972_v26  ;;  %v1136_v18 = vsel %vm1124_vm14, %v1118_v39, %v1135_v63  ;;  %v1080_v20 = vand.u32 3, %v6940_v25  ;;  %v1129_v8 = vsel %vm1123_vm12, %v1126_v43, %v1128_v54 }
 0x158   :  { %v5129_v6 = vadd.s32 4294967294, %v1261_v36  ;;  %v6608_v7 = vpop.eup %6607  ;;  %v1137_v1 = vsel %vm1123_vm12, %v1134_v59, %v1136_v18  ;;  %v6997_v11 = vmul.u32.u64.low %v1138_v35, %v1133_v49  ;;  %v6998_v62 = vmul.u32.u64.high %v1138_v35, %v1133_v49, %v6997_v11 }
 0x159   :  { %v6610_v5 = vpop.eup %6609  ;;  %v1498_v13 = vand.u32 3, %v6952_v2  ;;  %v7002_v9 = vmul.u32.u64.low %v1138_v35, %v1137_v1  ;;  %v7003_v15 = vmul.u32.u64.high %v1138_v35, %v1137_v1, %v7002_v9  ;;  %vm1079_vm1 = vweird.f32 %v6765_v0 }
 0x15a   :  { %vm5130_vm15 = vcmp.lt.s32.totalorder %v5129_v6, 0  ;;  %v1394_v16 = vand.u32 3, %v1393_v4  ;;  %v1249_v25 = vadd.s32 %v6928_v42, %v6934_v48  ;;  %v1083_v14 = vxor.u32 2147483648, %v6608_v7 }
 0x15b   :  { %v1264_v61 = vsel %vm5130_vm15, 0, %v5129_v6  ;;  %v1145_v27 = vmul.u32 %v1138_v35, %v1129_v8  ;;  %vm1082_vm2 = vcmp.eq.s32.totalorder %v1080_v20, 0  ;;  %v1148_v31 = vadd.s32 1, %v6998_v62 }
 0x15c   :  { %v1265_v21 = vsub.s32 32, %v1264_v61  ;;  %v1269_v22 = vsub.s32 4294967266, %v1264_v61  ;;  %vm979_vm3 = vcmp.eq.s32.totalorder %v6991_v30, 0  ;;  %v1084_v2 = vsel %vm1082_vm2, %v6610_v5, %v1083_v14 }
 0x15d   :  { %v1086_v29 = vxor.u32 2147483648, %v6610_v5  ;;  %vm1147_vm4 = vc.u32 %v7003_v15, %v6997_v11  ;;  %vm976_vm5 = vweird.f32 %v6769_v3  ;;  %vm1085_vm6 = vcmp.eq.s32.totalorder %v1080_v20, 2 }
 0x15e   :  { %v1267_v32 = vshrl.u32 %v1249_v25, %v1265_v21  ;;  %v1270_v24 = vadd.s32 127, %v1269_v22  ;;  %v1266_v42 = vshll.u32 %v6973_v46, %v1264_v61  ;;  %v1149_v48 = vsel %vm1147_vm4, %v1148_v31, %v6998_v62  ;;  %v6433_v61 = vld [vmem:[%s8372_s4 + $0x2a0] ss:$8 sps:$4 sm:$0xff]  }
 0x15f   :  { %vm1081_vm7 = vcmp.lt.s32.totalorder %v1080_v20, 2  ;;  %v1087_v38 = vsel %vm1085_vm6, %v1086_v29, %v6608_v7  ;;  %v1150_v28 = vadd.s32 %v1149_v48, %v1145_v27  ;;  %vm982_vm8 = vcmp.eq.s32.totalorder %v6991_v30, 2 }
 0x160   :  { %v1271_v40 = vshll.u32 %v1270_v24, 23  ;;  %v1088_v44 = vsel %vm1081_vm7, %v1084_v2, %v1087_v38  ;;  %v6612_v45 = vpop.eup %6611  ;;  %v1268_v60 = vor.u32 %v1267_v32, %v1266_v42  ;;  %vm1396_vm9 = vcmp.eq.s32.totalorder %v1394_v16, 0 }
 0x161   :  { %vm1399_vm10 = vcmp.eq.s32.totalorder %v1394_v16, 2  ;;  %vm1500_vm11 = vcmp.eq.s32.totalorder %v1498_v13, 0  ;;  %v6614_v47 = vpop.eup %6613  ;;  %v1151_v4 = vadd.s32 536870912, %v1150_v28  ;;  %v983_v39 = vxor.u32 2147483648, %v6612_v45 }
 0x162   :  { %v1272_v37 = vor.u32 4788187, %v1271_v40  ;;  %vm1503_vm12 = vcmp.eq.s32.totalorder %v1498_v13, 2  ;;  %v980_v46 = vxor.u32 2147483648, %v6614_v47  ;;  %v1089_v34 = vsel %vm1079_vm1, nan, %v1088_v44 }
 0x163   :  { %v1502_v51 = vsel %vm1500_vm11, %v6610_v5, %v1083_v14  ;;  %v1505_v41 = vsel %vm1503_vm12, %v1086_v29, %v6608_v7  ;;  %v7018_v35 = vshrl.u32 %v1151_v4, 30  ;;  %v984_v53 = vsel %vm982_vm8, %v983_v39, %v6614_v47 }
 0x164   :  { %v1401_v55 = vsel %vm1399_vm10, %v983_v39, %v6614_v47  ;;  %vm1499_vm13 = vcmp.lt.s32.totalorder %v1498_v13, 2  ;;  %vm978_vm14 = vcmp.lt.s32.totalorder %v6991_v30, 2  ;;  %v981_v50 = vsel %vm979_vm3, %v6612_v45, %v980_v46 }
 0x165   :  { %v1398_v57 = vsel %vm1396_vm9, %v6612_v45, %v980_v46  ;;  %v1506_v43 = vsel %vm1499_vm13, %v1502_v51, %v1505_v41  ;;  %v1273_v54 = vand.u32 2147483647, %v1272_v37  ;;  %v1153_v33 = vshll.u32 %v7018_v35, 30 }
 0x166   :  { %v985_v26 = vsel %vm978_vm14, %v981_v50, %v984_v53  ;;  %vm1395_vm15 = vcmp.lt.s32.totalorder %v1394_v16, 2  ;;  %v1297_v58 = vmul.f32 %v1089_v34, %v28_v52  ;;  %v1507_v49 = vsel %vm1079_vm1, nan, %v1506_v43 }
 0x167   :  { %v986_v36 = vsel %vm976_vm5, nan, %v985_v26  ;;  %v1402_v59 = vsel %vm1395_vm15, %v1398_v57, %v1401_v55  ;;  %v1275_v63 = vcvt.s32.f32 %v1268_v60  ;;  %v1154_v6 = vsub.s32 %v1150_v28, %v1153_v33 }
 0x168   :  { %v1296_v30 = vmul.f32 %v986_v36, %v27_v56  ;;  %v1403_v18 = vsel %vm976_vm5, nan, %v1402_v59  ;;  %v1717_v20 = vmul.f32 %v1507_v49, %v28_v52  ;;  %vm1195_vm1 = vcmp.lt.s32.totalorder %v6777_v10, 0  ;;  %v30_v36 = vld [vmem:[%s8370_s2 + $0x38] sm:$0xff] }
 0x169   :  { %v1276_v7 = vmul.f32 %v1275_v63, %v1273_v54  ;;  %v1156_v8 = vsub.s32 0, %v1154_v6  ;;  %v1716_v1 = vmul.f32 %v1403_v18, %v27_v56  ;;  %vm7046_vm3 = vcmp.le.f32.partialorder %v1193_v19, 0.7853982 }
 0x16a   :  { %v1720_v62 = vpack.c.bf16 %v1297_v58, %v1296_v30  ;;  %v1146_v14 = vadd.s32 %v6997_v11, %v7003_v15  ;;  %v1279_v32 = vsub.s32 4, %v6961_v17  ;;  %v1176_v28 = vsub.s32 4, %v7018_v35  ;;  %v29_v30 = vld [vmem:[%s8370_s2 + $0x28] sm:$0xff] }
 0x16b   :  { %v5124_v5 = vmin.u32 %v1156_v8, %v1154_v6  ;;  %v7039_v13 = vpack.c.bf16 %v1717_v20, %v1716_v1  ;;  %v1277_v9 = vxor.u32 2147483648, %v1276_v7  ;;  %vm1092_vm4 = vcmp.lt.s32.totalorder %v6779_v12, 0 }
 0x16c   :  { %5645 = vmatprep.subr.bf16.mxu1 %v1720_v62  ;;  %v1280_v11 = vsel %vm1195_vm1, %v1279_v32, %v6961_v17  ;;  %vm1091_vm5 = vcmp.le.f32.partialorder %v1090_v23, 0.7853982  ;;  %v1177_v37 = vsel %vm1092_vm4, %v1176_v28, %v7018_v35  ;;  %vm1182_vm12 = vweird.f32 %v6779_v12  ;;  %v7139_v32 = vld [vmem:[%s8373_s3 + $0x24] ss:$16 sps:$4 sm:$0xff]   ;;  %v7192_v28 = vld [vmem:[%s8373_s3 + $0x68] ss:$16 sps:$4 sm:$0xff]  }
 0x16d   :  { %v1158_v16 = vclz %v5124_v5  ;;  %5646 = vmatpush3.bf16.msra.mxu1 %v1720_v62  ;;  %v1278_v25 = vsel %vm1195_vm1, %v1277_v9, %v1276_v7  ;;  %v1282_v38 = vsel %vm7046_vm3, 0, %v1280_v11  ;;  %v1179_v34 = vsel %vm1091_vm5, 0, %v1177_v37  ;;  %v7159_v11 = vld [vmem:[%s8373_s3 + $0x44] ss:$16 sps:$4 sm:$0xff]   ;;  %v7222_v37 = vld [vmem:[%s8373_s3 + $0x88] ss:$16 sps:$4 sm:$0xff]  }
 0x16e   :  { %v1281_v27 = vsel %vm7046_vm3, %v6777_v10, %v1278_v25  ;;  %v1705_v45 = vadd.s32 3, %v1282_v38  ;;  %v1286_v39 = vand.u32 3, %v1282_v38  ;;  %v1601_v52 = vadd.s32 3, %v1179_v34  ;;  %v7182_v38 = vld [vmem:[%s8373_s3 + $0x60] ss:$16 sps:$4 sm:$0xff]  }
 0x16f   :  { %v5125_v0 = vadd.s32 4294967294, %v1158_v16  ;;  %6615 = vcosq.f32 %v1281_v27  ;;  %v1183_v35 = vand.u32 3, %v1179_v34  ;;  %vm1285_vm14 = vweird.f32 %v6777_v10  ;;  %v7254_v34 = vld [vmem:[%s8373_s3 + $0xc0] ss:$16 sps:$4 sm:$0xff]  }
 0x170   :  { %6617 = vsinq.f32 %v1281_v27  ;;  %v1706_v46 = vand.u32 3, %v1705_v45  ;;  %vm1288_vm6 = vcmp.eq.s32.totalorder %v1286_v39, 0  ;;  %vm1291_vm7 = vcmp.eq.s32.totalorder %v1286_v39, 2  ;;  %v7118_v27 = vld [vmem:[%s8373_s3 + $0x4] ss:$16 sps:$4 sm:$0xff]  }
 0x171   :  { %vm5126_vm2 = vcmp.lt.s32.totalorder %v5125_v0, 0  ;;  %v1602_v50 = vand.u32 3, %v1601_v52  ;;  %vm1287_vm10 = vcmp.lt.s32.totalorder %v1286_v39, 2  ;;  %vm1188_vm13 = vcmp.eq.s32.totalorder %v1183_v35, 2  ;;  %v7202_v45 = vld [vmem:[%s8373_s3 + $0x84] ss:$16 sps:$4 sm:$0xff]  }
 0x172   :  { %v1161_v3 = vsel %vm5126_vm2, 0, %v5125_v0  ;;  %vm1708_vm8 = vcmp.eq.s32.totalorder %v1706_v46, 0  ;;  %vm1711_vm9 = vcmp.eq.s32.totalorder %v1706_v46, 2  ;;  %vm1707_vm11 = vcmp.lt.s32.totalorder %v1706_v46, 2  ;;  %v7240_v39 = vld [vmem:[%s8373_s3 + $0xa0] ss:$16 sps:$4 sm:$0xff]  }
 0x173   :  { %v1162_v21 = vsub.s32 32, %v1161_v3  ;;  %v1166_v22 = vsub.s32 4294967266, %v1161_v3  ;;  %v1163_v31 = vshll.u32 %v1154_v6, %v1161_v3  ;;  %vm1607_vm15 = vcmp.eq.s32.totalorder %v1602_v50, 2  ;;  %v6432_v3 = vld [vmem:[%s8372_s4 + $0x290] ss:$8 sps:$4 sm:$0xff]  }
 0x174   :  { %vm1185_vm1 = vcmp.eq.s32.totalorder %v1183_v35, 0  ;;  %vm1604_vm2 = vcmp.eq.s32.totalorder %v1602_v50, 0  ;;  %vm1184_vm3 = vcmp.lt.s32.totalorder %v1183_v35, 2  ;;  %v7245_v46 = vld [vmem:[%s8373_s3 + $0xa8] ss:$16 sps:$4 sm:$0xff]   ;;  %v8377_v35 = vmov 0  }
 0x175   :  { %v1164_v2 = vshrl.u32 %v1146_v14, %v1162_v21  ;;  %v1167_v29 = vadd.s32 127, %v1166_v22  ;;  %v6435_v14 = vld [vmem:[%s8372_s4 + $0x2c0] ss:$8 sps:$4 sm:$0xff]   ;;  %v7269_v52 = vld [vmem:[%s8373_s3 + $0xcc] ss:$16 sps:$4 sm:$0xff]   ;;  %2204 = vmatprep.mubr.bf16.mxu0 %v8377_v35 }
 0x176   :  { %v6627_v21 = vld [vmem:[%s8372_s4 + $0x280] ss:$8 sps:$4 sm:$0xff]  }
 0x177   :  { %v1165_v24 = vor.u32 %v1164_v2, %v1163_v31  ;;  %v1168_v19 = vshll.u32 %v1167_v29, 23  ;;  %v7113_v22 = vld [vmem:[%s8373_s3] ss:$16 sps:$4 sm:$0xff]   ;;  %v7123_v31 = vld [vmem:[%s8373_s3 + $0x8] ss:$16 sps:$4 sm:$0xff]  }
 0x178   :  { %v6442_v2 = vld [vmem:[%s8373_s3 + $0xc] ss:$16 sps:$4 sm:$0xff]   ;;  %v7134_v29 = vld [vmem:[%s8373_s3 + $0x20] ss:$16 sps:$4 sm:$0xff]  }
 0x179   :  { %v1169_v42 = vor.u32 4788187, %v1168_v19  ;;  %v1172_v48 = vcvt.s32.f32 %v1165_v24  ;;  %v6616_v60 = vpop.eup %6615  ;;  %2172 = vmatprep.subr.bf16.mxu0 %v6442_v2  ;;  %v7144_v24 = vld [vmem:[%s8373_s3 + $0x28] ss:$16 sps:$4 sm:$0xff]   ;;  %v7149_v19 = vld [vmem:[%s8373_s3 + $0x2c] ss:$16 sps:$4 sm:$0xff]  }
 0x17a   :  { %v6618_v17 = vpop.eup %6617  ;;  %v1292_v41 = vxor.u32 2147483648, %v6616_v60  ;;  %2173 = vmatpush1.bf16.msra.mxu0 %v7123_v31 }
 0x17b   :  { %v1170_v15 = vand.u32 2147483647, %v1169_v42  ;;  %v1289_v51 = vxor.u32 2147483648, %v6618_v17  ;;  %v7154_v42 = vld [vmem:[%s8373_s3 + $0x40] ss:$16 sps:$4 sm:$0xff]   ;;  %2174 = vmatprep.subr.bf16.mxu0 %v7149_v19 }
 0x17c   :  { %v1293_v23 = vsel %vm1291_vm7, %v1292_v41, %v6618_v17  ;;  %v1713_v56 = vsel %vm1711_vm9, %v1292_v41, %v6618_v17  ;;  %v7230_v17 = vld [vmem:[%s8373_s3 + $0xa4] ss:$16 sps:$4 sm:$0xff]   ;;  %v7264_v41 = vld [vmem:[%s8373_s3 + $0xc8] ss:$16 sps:$4 sm:$0xff]  }
 0x17d   :  { %v1173_v40 = vmul.f32 %v1172_v48, %v1170_v15  ;;  %v1290_v53 = vsel %vm1288_vm6, %v6616_v60, %v1289_v51  ;;  %v1710_v55 = vsel %vm1708_vm8, %v6616_v60, %v1289_v51  ;;  %v7165_v15 = vld [vmem:[%s8373_s3 + $0x48] ss:$16 sps:$4 sm:$0xff]   ;;  %v7170_v48 = vld [vmem:[%s8373_s3 + $0x4c] ss:$16 sps:$4 sm:$0xff]   ;;  %v7259_v51 = vld [vmem:[%s8373_s3 + $0xc4] ss:$16 sps:$4 sm:$0xff]  }
 0x17e   :  { %v1294_v57 = vsel %vm1287_vm10, %v1290_v53, %v1293_v23  ;;  %v1714_v43 = vsel %vm1707_vm11, %v1710_v55, %v1713_v56  ;;  %2175 = vmatpush1.bf16.msra.mxu0 %v7144_v24  ;;  %v7208_v60 = vld [vmem:[%s8373_s3 + $0x8c] ss:$16 sps:$4 sm:$0xff]   ;;  %v7278_v53 = vld [vmem:[%s8373_s3 + $0xe4] ss:$16 sps:$4 sm:$0xff]   ;;  %v7288_v55 = vld [vmem:[%s8373_s3 + $0xe0] ss:$16 sps:$4 sm:$0xff]  }
 0x17f   :  { %v1174_v44 = vxor.u32 2147483648, %v1173_v40  ;;  %v1295_v59 = vsel %vm1285_vm14, nan, %v1294_v57  ;;  %v1715_v49 = vsel %vm1285_vm14, nan, %v1714_v43  ;;  %2176 = vmatprep.subr.bf16.mxu0 %v7170_v48  ;;  %v7283_v23 = vld [vmem:[%s8373_s3 + $0xec] ss:$16 sps:$4 sm:$0xff]   ;;  %vm6637_vm6 = vmmov 0  }
 0x180   :  { %v1299_v7 = vmul.f32 %v1295_v59, %v30_v36  ;;  %v1719_v1 = vmul.f32 %v1715_v49, %v30_v36  ;;  %v7293_v56 = vld [vmem:[%s8373_s3 + $0xe8] ss:$16 sps:$4 sm:$0xff]  }
 0x181   :  { %v1175_v47 = vsel %vm1092_vm4, %v1174_v44, %v1173_v40  ;;  %vm1603_vm4 = vcmp.lt.s32.totalorder %v1602_v50, 2  ;;  %v7187_v40 = vld [vmem:[%s8373_s3 + $0x64] ss:$16 sps:$4 sm:$0xff]   ;;  %v7197_v44 = vld [vmem:[%s8373_s3 + $0x6c] ss:$16 sps:$4 sm:$0xff]  }
 0x182   :  { %v1178_v4 = vsel %vm1091_vm5, %v6779_v12, %v1175_v47  ;;  %v6434_v12 = vld [vmem:[%s8372_s4 + $0x2b0] ss:$8 sps:$4 sm:$0xff]   ;;  %2177 = vmatpush1.bf16.msra.mxu0 %v7165_v15  ;;  %vm2486_vm5 = vcmask 392192  }
 0x183   :  { %6619 = vcosq.f32 %v1178_v4  ;;  %2178 = vmatprep.subr.bf16.mxu0 %v7197_v44  ;;  %v7215_v47 = vld [vmem:[%s8373_s3 + $0x80] ss:$16 sps:$4 sm:$0xff]  }
 0x184   :  { %6621 = vsinq.f32 %v1178_v4  ;;  %v7235_v4 = vld [vmem:[%s8373_s3 + $0xac] ss:$16 sps:$4 sm:$0xff]  }
 0x186   :  { %2179 = vmatpush1.bf16.msra.mxu0 %v7192_v28 }
 0x187   :  { %2180 = vmatprep.subr.bf16.mxu0 %v7208_v60 }
 0x18a   :  { %2181 = vmatpush1.bf16.msra.mxu0 %v7222_v37 }
 0x18b   :  { %2182 = vmatprep.subr.bf16.mxu0 %v7235_v4 }
 0x18d   :  { %v6620_v54 = vpop.eup %6619 }
 0x18e   :  { %v6622_v33 = vpop.eup %6621  ;;  %v1189_v26 = vxor.u32 2147483648, %v6620_v54  ;;  %2183 = vmatpush1.bf16.msra.mxu0 %v7245_v46 }
 0x18f   :  { %v1186_v58 = vxor.u32 2147483648, %v6622_v33  ;;  %2184 = vmatprep.subr.bf16.mxu0 %v7269_v52 }
 0x190   :  { %v1190_v63 = vsel %vm1188_vm13, %v1189_v26, %v6622_v33  ;;  %v1609_v6 = vsel %vm1607_vm15, %v1189_v26, %v6622_v33 }
 0x191   :  { %v1187_v18 = vsel %vm1185_vm1, %v6620_v54, %v1186_v58  ;;  %v1606_v10 = vsel %vm1604_vm2, %v6620_v54, %v1186_v58 }
 0x192   :  { %v1191_v20 = vsel %vm1184_vm3, %v1187_v18, %v1190_v63  ;;  %v1610_v8 = vsel %vm1603_vm4, %v1606_v10, %v1609_v6  ;;  %2185 = vmatpush1.bf16.msra.mxu0 %v7264_v41 }
 0x193   :  { %v1192_v62 = vsel %vm1182_vm12, nan, %v1191_v20  ;;  %v1611_v5 = vsel %vm1182_vm12, nan, %v1610_v8  ;;  %2186 = vmatprep.subr.bf16.mxu0 %v7283_v23 }
 0x194   :  { %v1298_v9 = vmul.f32 %v1192_v62, %v29_v30  ;;  %v1718_v16 = vmul.f32 %v1611_v5, %v29_v30 }
 0x196   :  { %v1721_v0 = vpack.c.bf16 %v1299_v7, %v1298_v9  ;;  %v1852_v25 = vpack.c.bf16 %v1719_v1, %v1718_v16  ;;  %2187 = vmatpush1.bf16.msra.mxu0 %v7293_v56 }
 0x197   :  { %2238 = vmatprep.subr.bf16.mxu0 %v7118_v27 }
 0x198   :  { %5647 = vmatprep.subr.bf16.mxu1 %v1721_v0 }
 0x199   :  { %5648 = vmatpush3.bf16.msra.mxu1 %v1721_v0 }
 0x19a   :  { %5661 = vmatprep.subr.bf16.mxu1 %v7039_v13 }
 0x19c   :  { %5650 = vmatmul.mubr.msk.bf16.vlgmr.msra.gmra.mrb[0].mxu1 %vm257_vm0, %v6432_v3 }
 0x19d   :  { %5662 = vmatpush3.bf16.msra.mxu1 %v7039_v13  ;;  %5653 = vmatprep.mubr.msk.bf16.mxu1 %vm257_vm0, %v6433_v61  ;;  %v6436_v13 = vld [vmem:[%s8372_s4 + $0x2d0] ss:$8 sps:$4 sm:$0xff]  }
 0x19e   :  { %5663 = vmatprep.subr.bf16.mxu1 %v1852_v25 }
 0x1a1   :  { %5664 = vmatpush3.bf16.msra.mxu1 %v1852_v25 }
 0x1a2   :  { %2109 = vmatprep.subr.bf16.mxu1 %v7118_v27 }
 0x1a4   :  { %5654 = vmatmul.mubr.msk.bf16.gmra.mrb[4].mxu1 %vm257_vm0, %v6434_v12 }
 0x1a5   :  { %5657 = vmatprep.mubr.msk.bf16.mxu1 %vm257_vm0, %v6435_v14 }
 0x1ac   :  { %5658 = vmatmul.mubr.msk.bf16.gmra.mrb[8].mxu1 %vm257_vm0, %v6436_v13 }
 0x1ad   :  { %5665 = vmatprep.mubr.msk.bf16.mxu1 %vm257_vm0, %v6627_v21 }
 0x1b4   :  { %5666 = vmatmul.mubr.msk.bf16.vlgmr.msra.gmra.mrb[12].mxu1 %vm257_vm0, %v6432_v3 }
 0x1b5   :  { %5669 = vmatprep.mubr.msk.bf16.mxu1 %vm257_vm0, %v6433_v61  ;;  %2110 = vmatpush1.bf16.msra.mxu1 %v7113_v22 }
 0x1b6   :  { %2111 = vmatprep.subr.bf16.mxu1 %v7139_v32 }
 0x1b9   :  { %2112 = vmatpush1.bf16.msra.mxu1 %v7134_v29 }
 0x1ba   :  { %2113 = vmatprep.subr.bf16.mxu1 %v7159_v11 }
 0x1bc   :  { %5670 = vmatmul.mubr.msk.bf16.gmra.mrb[16].mxu1 %vm257_vm0, %v6434_v12 }
 0x1bd   :  { %5673 = vmatprep.mubr.msk.bf16.mxu1 %vm257_vm0, %v6435_v14  ;;  %2114 = vmatpush1.bf16.msra.mxu1 %v7154_v42 }
 0x1be   :  { %2115 = vmatprep.subr.bf16.mxu1 %v7187_v40 }
 0x1c1   :  { %2116 = vmatpush1.bf16.msra.mxu1 %v7182_v38 }
 0x1c2   :  { %2117 = vmatprep.subr.bf16.mxu1 %v7202_v45 }
 0x1c4   :  { %5674 = vmatmul.mubr.msk.bf16.gmra.mrb[20].mxu1 %vm257_vm0, %v6436_v13 }
 0x1c5   :  { %2118 = vmatpush1.bf16.msra.mxu1 %v7215_v47  ;;  %2141 = vmatprep.mubr.bf16.mxu1 %v8377_v35 }
 0x1c6   :  { %2119 = vmatprep.subr.bf16.mxu1 %v7230_v17 }
 0x1c9   :  { %2120 = vmatpush1.bf16.msra.mxu1 %v7240_v39 }
 0x1ca   :  { %2121 = vmatprep.subr.bf16.mxu1 %v7259_v51 }
 0x1cd   :  { %2122 = vmatpush1.bf16.msra.mxu1 %v7254_v34 }
 0x1ce   :  { %2123 = vmatprep.subr.bf16.mxu1 %v7278_v53 }
 0x1d1   :  { %2124 = vmatpush1.bf16.msra.mxu1 %v7288_v55 }
 0x1d2   :  { %2301 = vmatprep.subr.bf16.mxu1 %v6442_v2 }
 0x26f   :  { %v5651_v50 = vpop.f32.mrb[0].mxu1 }
 0x270   :  { %v1804_v57 = vpop.f32.mrb[1].mxu1 }
 0x271   :  { %v5652_v43 = vpop.f32.mrb[2].mxu1 }
 0x272   :  { %v1807_v54 = vpop.f32.mrb[3].mxu1 }
 0x277   :  { %v5655_v33 = vpop.f32.mrb[4].mxu1 }
 0x278   :  { %v1820_v26 = vpop.f32.mrb[5].mxu1 }
 0x279   :  { %v5656_v36 = vpop.f32.mrb[6].mxu1 }
 0x27a   :  { %v1823_v58 = vpop.f32.mrb[7].mxu1 }
 0x27f   :  { %v5659_v59 = vpop.f32.mrb[8].mxu1 }
 0x280   :  { %v1836_v49 = vpop.f32.mrb[9].mxu1 }
 0x281   :  { %v5660_v63 = vpop.f32.mrb[10].mxu1 }
 0x282   :  { %v1839_v6 = vpop.f32.mrb[11].mxu1 }
 0x287   :  { %v5667_v30 = vpop.f32.mrb[12].mxu1 }
 0x288   :  { %v1942_v18 = vadd.f32 %v5667_v30, %v1836_v49  ;;  %v1887_v10 = vpop.f32.mrb[13].mxu1 }
 0x289   :  { %v1940_v20 = vadd.f32 %v5655_v33, %v1887_v10  ;;  %v5668_v7 = vpop.f32.mrb[14].mxu1  ;;  %v45_v10 = vld [vmem:[%s8370_s2 + $0xb0] sm:$0xff] }
 0x28a   :  { %v1943_v8 = vadd.f32 %v5668_v7, %v1839_v6  ;;  %v1890_v1 = vpop.f32.mrb[15].mxu1 }
 0x28b   :  { %v1941_v62 = vadd.f32 %v5656_v36, %v1890_v1  ;;  %v33_v1 = vld [vmem:[%s8370_s2 + $0x50] sm:$0xff] }
 0x28c   :  { %v7302_v5 = vpack.c.bf16 %v1943_v8, %v1942_v18 }
 0x28d   :  { %v7304_v9 = vpack.c.bf16 %v1941_v62, %v1940_v20 }
 0x28f   :  { %v5671_v16 = vpop.f32.mrb[16].mxu1 }
 0x290   :  { %v1934_v0 = vsub.f32 %v1804_v57, %v5671_v16  ;;  %v1903_v25 = vpop.f32.mrb[17].mxu1 }
 0x291   :  { %v1944_v3 = vadd.f32 %v5659_v59, %v1903_v25  ;;  %v5672_v61 = vpop.f32.mrb[18].mxu1 }
 0x292   :  { %v1935_v12 = vsub.f32 %v1807_v54, %v5672_v61  ;;  %v1906_v14 = vpop.f32.mrb[19].mxu1 }
 0x293   :  { %v1945_v13 = vadd.f32 %v5660_v63, %v1906_v14 }
 0x294   :  { %v1946_v21 = vpack.c.bf16 %v1935_v12, %v1934_v0 }
 0x295   :  { %v2237_v27 = vpack.c.bf16 %v1945_v13, %v1944_v3 }
 0x296   :  { %2142 = vmatmul.mubr.bf16.vlgmr.msra.gmra.mrb[24].mxu1 %v1946_v21  ;;  %2205 = vmatmul.mubr.bf16.vlgmr.msra.gmra.mrb[4].mxu0 %v1946_v21 }
 0x297   :  { %2239 = vmatpush1.bf16.msra.mxu0 %v7113_v22  ;;  %2302 = vmatpush1.bf16.msra.mxu1 %v7123_v31  ;;  %v5675_v2 = vpop.f32.mrb[20].mxu1 }
 0x298   :  { %v1938_v33 = vsub.f32 %v1820_v26, %v5675_v2  ;;  %v1919_v36 = vpop.f32.mrb[21].mxu1  ;;  %2240 = vmatprep.subr.bf16.mxu0 %v7139_v32  ;;  %2303 = vmatprep.subr.bf16.mxu1 %v7149_v19  ;;  %v7359_v32 = vld [vmem:[%s8372_s4] ss:$8 sps:$4 sm:$0xff]   ;;  %v7372_v19 = vld [vmem:[%s8372_s4 + $0x10] ss:$8 sps:$4 sm:$0xff]  }
 0x299   :  { %v1936_v57 = vsub.f32 %v5651_v50, %v1919_v36  ;;  %v5676_v59 = vpop.f32.mrb[22].mxu1  ;;  %2151 = vmatprep.mubr.bf16.mxu1 %v8377_v35  ;;  %2214 = vmatprep.mubr.bf16.mxu0 %v8377_v35  ;;  %v32_v26 = vld [vmem:[%s8370_s2 + $0x48] sm:$0xff]  ;;  %v46_v2 = vld [vmem:[%s8370_s2 + $0xb8] sm:$0xff] }
 0x29a   :  { %v1939_v54 = vsub.f32 %v1823_v58, %v5676_v59  ;;  %v1922_v49 = vpop.f32.mrb[23].mxu1  ;;  %v44_v58 = vld [vmem:[%s8370_s2 + $0xa8] sm:$0xff] }
 0x29b   :  { %v1937_v63 = vsub.f32 %v5652_v43, %v1922_v49  ;;  %2241 = vmatpush1.bf16.msra.mxu0 %v7134_v29  ;;  %2304 = vmatpush1.bf16.msra.mxu1 %v7144_v24  ;;  %v7354_v29 = vld [vmem:[%s8372_s4 + $0x4] ss:$8 sps:$4 sm:$0xff]   ;;  %v7364_v24 = vld [vmem:[%s8372_s4 + $0x14] ss:$8 sps:$4 sm:$0xff]  }
 0x29c   :  { %v1948_v22 = vpack.c.bf16 %v1939_v54, %v1938_v33  ;;  %2242 = vmatprep.subr.bf16.mxu0 %v7159_v11  ;;  %2305 = vmatprep.subr.bf16.mxu1 %v7170_v48  ;;  %v7377_v11 = vld [vmem:[%s8372_s4 + $0x24] ss:$8 sps:$4 sm:$0xff]  }
 0x29d   :  { %v1947_v31 = vpack.c.bf16 %v1937_v63, %v1936_v57 }
 0x29f   :  { %2243 = vmatpush1.bf16.msra.mxu0 %v7154_v42  ;;  %2306 = vmatpush1.bf16.msra.mxu1 %v7165_v15 }
 0x2a0   :  { %2152 = vmatmul.mubr.bf16.gmra.mrb[28].mxu1 %v1947_v31  ;;  %2215 = vmatmul.mubr.bf16.gmra.mrb[8].mxu0 %v1947_v31  ;;  %v35_v31 = vld [vmem:[%s8370_s2 + $0x60] sm:$0xff] }
 0x2a1   :  { %2244 = vmatprep.subr.bf16.mxu0 %v7187_v40  ;;  %2307 = vmatprep.subr.bf16.mxu1 %v7197_v44  ;;  %v7384_v40 = vld [vmem:[%s8372_s4 + $0x20] ss:$8 sps:$4 sm:$0xff]   ;;  %v7396_v44 = vld [vmem:[%s8372_s4 + $0x30] ss:$8 sps:$4 sm:$0xff]  }
 0x2a2   :  { %2161 = vmatprep.mubr.bf16.mxu1 %v8377_v35  ;;  %2224 = vmatprep.mubr.bf16.mxu0 %v8377_v35 }
 0x2a3   :  { %2245 = vmatpush1.bf16.msra.mxu0 %v7182_v38  ;;  %2308 = vmatpush1.bf16.msra.mxu1 %v7192_v28  ;;  %v7389_v28 = vld [vmem:[%s8372_s4 + $0x34] ss:$8 sps:$4 sm:$0xff]  }
 0x2a4   :  { %2246 = vmatprep.subr.bf16.mxu0 %v7202_v45  ;;  %2309 = vmatprep.subr.bf16.mxu1 %v7208_v60  ;;  %v7401_v45 = vld [vmem:[%s8372_s4 + $0x44] ss:$8 sps:$4 sm:$0xff]  }
 0x2a7   :  { %2247 = vmatpush1.bf16.msra.mxu0 %v7215_v47  ;;  %2310 = vmatpush1.bf16.msra.mxu1 %v7222_v37  ;;  %v7412_v37 = vld [vmem:[%s8372_s4 + $0x40] ss:$8 sps:$4 sm:$0xff]  }
 0x2a8   :  { %2162 = vmatmul.mubr.bf16.gmra.mrb[32].mxu1 %v1948_v22  ;;  %2225 = vmatmul.mubr.bf16.gmra.mrb[12].mxu0 %v1948_v22 }
 0x2a9   :  { %2248 = vmatprep.subr.bf16.mxu0 %v7230_v17  ;;  %2311 = vmatprep.subr.bf16.mxu1 %v7235_v4  ;;  %v7419_v4 = vld [vmem:[%s8372_s4 + $0x54] ss:$8 sps:$4 sm:$0xff]  }
 0x2aa   :  { %2270 = vmatprep.mubr.bf16.mxu0 %v8377_v35  ;;  %2333 = vmatprep.mubr.bf16.mxu1 %v8377_v35 }
 0x2ab   :  { %2249 = vmatpush1.bf16.msra.mxu0 %v7240_v39  ;;  %2312 = vmatpush1.bf16.msra.mxu1 %v7245_v46  ;;  %v7428_v46 = vld [vmem:[%s8372_s4 + $0x50] ss:$8 sps:$4 sm:$0xff]  }
 0x2ac   :  { %2250 = vmatprep.subr.bf16.mxu0 %v7259_v51  ;;  %2313 = vmatprep.subr.bf16.mxu1 %v7269_v52  ;;  %v7444_v52 = vld [vmem:[%s8372_s4 + $0x60] ss:$8 sps:$4 sm:$0xff]  }
 0x2af   :  { %2251 = vmatpush1.bf16.msra.mxu0 %v7254_v34  ;;  %2314 = vmatpush1.bf16.msra.mxu1 %v7264_v41  ;;  %v7433_v34 = vld [vmem:[%s8372_s4 + $0x64] ss:$8 sps:$4 sm:$0xff]  }
 0x2b0   :  { %2252 = vmatprep.subr.bf16.mxu0 %v7278_v53  ;;  %2315 = vmatprep.subr.bf16.mxu1 %v7283_v23 }
 0x2b3   :  { %2253 = vmatpush1.bf16.msra.mxu0 %v7288_v55  ;;  %2316 = vmatpush1.bf16.msra.mxu1 %v7293_v56  ;;  %v31_v55 = vld [vmem:[%s8370_s2 + $0x40] sm:$0xff] }
 0x2b4   :  { %2831 = vmatprep.subr.bf16.mxu0 %v7354_v29  ;;  %v43_v56 = vld [vmem:[%s8370_s2 + $0xa0] sm:$0xff] }
 0x2b6   :  { %2271 = vmatmul.mubr.bf16.vlgmr.msra.gmra.mrb[4].mxu0 %v7304_v9  ;;  %2334 = vmatmul.mubr.bf16.vlgmr.msra.gmra.mrb[36].mxu1 %v7304_v9 }
 0x2b7   :  { %2280 = vmatprep.mubr.bf16.mxu0 %v8377_v35  ;;  %2343 = vmatprep.mubr.bf16.mxu1 %v8377_v35 }
 0x2b8   :  { %2832 = vmatpush1.bf16.msra.mxu0 %v7359_v32 }
 0x2b9   :  { %2833 = vmatprep.subr.bf16.mxu0 %v7364_v24 }
 0x2bc   :  { %2834 = vmatpush1.bf16.msra.mxu0 %v7372_v19 }
 0x2bd   :  { %2835 = vmatprep.subr.bf16.mxu0 %v7377_v11 }
 0x2be   :  { %2281 = vmatmul.mubr.bf16.gmra.mrb[8].mxu0 %v7302_v5  ;;  %2344 = vmatmul.mubr.bf16.gmra.mrb[40].mxu1 %v7302_v5 }
 0x2bf   :  { %2290 = vmatprep.mubr.bf16.mxu0 %v8377_v35  ;;  %2353 = vmatprep.mubr.bf16.mxu1 %v8377_v35 }
 0x2c0   :  { %2836 = vmatpush1.bf16.msra.mxu0 %v7384_v40 }
 0x2c1   :  { %2837 = vmatprep.subr.bf16.mxu0 %v7389_v28 }
 0x2c4   :  { %2838 = vmatpush1.bf16.msra.mxu0 %v7396_v44 }
 0x2c5   :  { %2839 = vmatprep.subr.bf16.mxu0 %v7401_v45 }
 0x2c6   :  { %2291 = vmatmul.mubr.bf16.gmra.mrb[12].mxu0 %v2237_v27  ;;  %2354 = vmatmul.mubr.bf16.gmra.mrb[44].mxu1 %v2237_v27  ;;  %v34_v27 = vld [vmem:[%s8370_s2 + $0x58] sm:$0xff] }
 0x2c7   :  { %2531 = vmatprep.mubr.bf16.mxu1 %v8377_v35 }
 0x2c8   :  { %2840 = vmatpush1.bf16.msra.mxu0 %v7412_v37 }
 0x2c9   :  { %2841 = vmatprep.subr.bf16.mxu0 %v7419_v4 }
 0x2cc   :  { %2842 = vmatpush1.bf16.msra.mxu0 %v7428_v46 }
 0x2cd   :  { %2843 = vmatprep.subr.bf16.mxu0 %v7433_v34 }
 0x2d0   :  { %2844 = vmatpush1.bf16.msra.mxu0 %v7444_v52 }
 0x369   :  { %v2143_v42 = vpop.f32.mrb[24].mxu1 }
 0x36a   :  { %v2145_v15 = vpop.f32.mrb[25].mxu1 }
 0x36b   :  { %v2147_v48 = vpop.f32.mrb[26].mxu1 }
 0x36c   :  { %v2149_v38 = vpop.f32.mrb[27].mxu1 }
 0x373   :  { %v7404_v60 = vpop.f32.mrb[28].mxu1 }
 0x374   :  { %v7407_v47 = vpop.f32.mrb[29].mxu1 }
 0x375   :  { %v7414_v17 = vpop.f32.mrb[30].mxu1 }
 0x376   :  { %v7421_v39 = vpop.f32.mrb[31].mxu1 }
 0x37b   :  { %v7436_v51 = vpop.f32.mrb[32].mxu1 }
 0x37c   :  { %v7439_v41 = vpop.f32.mrb[33].mxu1 }
 0x37d   :  { %v7446_v53 = vpop.f32.mrb[34].mxu1 }
 0x37e   :  { %v7448_v23 = vpop.f32.mrb[35].mxu1 }
 0x389   :  { %v2272_v50 = vpop.f32.mrb[4].mxu0  ;;  %v2335_v43 = vpop.f32.mrb[36].mxu1 }
 0x38a   :  { %v2364_v6 = vsub.f32 %v2143_v42, %v2335_v43  ;;  %v2274_v30 = vpop.f32.mrb[5].mxu0  ;;  %v2337_v18 = vpop.f32.mrb[37].mxu1  ;;  %v2400_v20 = vmul.f32 %v2272_v50, %v43_v56  ;;  %v2436_v7 = vmul.f32 %v2272_v50, %v31_v55  ;;  %v47_v42 = vld [vmem:[%s8370_s2 + $0xc0] sm:$0xff] }
 0x38b   :  { %v2365_v8 = vsub.f32 %v2145_v15, %v2337_v18  ;;  %v2276_v62 = vpop.f32.mrb[6].mxu0  ;;  %v2339_v5 = vpop.f32.mrb[38].mxu1  ;;  %v7469_v0 = vmul.f32 %v2274_v30, %v44_v58  ;;  %v2437_v25 = vmul.f32 %v2274_v30, %v32_v26  ;;  %v37_v30 = vld [vmem:[%s8370_s2 + $0x70] sm:$0xff] }
 0x38c   :  { %v2388_v9 = vmul.f32 %v2364_v6, %v31_v55  ;;  %v2424_v16 = vmul.f32 %v2364_v6, %v43_v56  ;;  %v2278_v3 = vpop.f32.mrb[7].mxu0  ;;  %v2341_v61 = vpop.f32.mrb[39].mxu1  ;;  %v2402_v13 = vmul.f32 %v2276_v62, %v45_v10  ;;  %v2366_v21 = vsub.f32 %v2147_v48, %v2339_v5  ;;  %v36_v6 = vld [vmem:[%s8370_s2 + $0x68] sm:$0xff]  ;;  %v49_v18 = vld [vmem:[%s8370_s2 + $0xd0] sm:$0xff]  ;;  %v50_v5 = vld [vmem:[%s8370_s2 + $0xd8] sm:$0xff] }
 0x38d   :  { %v7471_v12 = vmul.f32 %v2365_v8, %v32_v26  ;;  %v2425_v14 = vmul.f32 %v2365_v8, %v44_v58  ;;  %v2438_v57 = vmul.f32 %v2276_v62, %v33_v1  ;;  %v2367_v59 = vsub.f32 %v2149_v38, %v2341_v61  ;;  %v48_v38 = vld [vmem:[%s8370_s2 + $0xc8] sm:$0xff] }
 0x38e   :  { %v2412_v33 = vsub.f32 %v2388_v9, %v2400_v20  ;;  %v7479_v36 = vadd.f32 %v2436_v7, %v2424_v16  ;;  %v2390_v63 = vmul.f32 %v2366_v21, %v33_v1  ;;  %v2426_v22 = vmul.f32 %v2366_v21, %v45_v10 }
 0x38f   :  { %v2413_v54 = vsub.f32 %v7471_v12, %v7469_v0  ;;  %v7483_v49 = vadd.f32 %v2437_v25, %v2425_v14  ;;  %v2403_v15 = vmul.f32 %v2278_v3, %v46_v2  ;;  %v2439_v48 = vmul.f32 %v2278_v3, %v34_v27  ;;  %v38_v12 = vld [vmem:[%s8370_s2 + $0x78] sm:$0xff] }
 0x390   :  { %v2391_v55 = vmul.f32 %v2367_v59, %v34_v27  ;;  %v2427_v56 = vmul.f32 %v2367_v59, %v46_v2  ;;  %v2414_v50 = vsub.f32 %v2390_v63, %v2402_v13  ;;  %v7494_v43 = vadd.f32 %v2438_v57, %v2426_v22 }
 0x391   :  { %v2282_v26 = vpop.f32.mrb[8].mxu0  ;;  %v2345_v58 = vpop.f32.mrb[40].mxu1 }
 0x392   :  { %v2415_v10 = vsub.f32 %v2391_v55, %v2403_v15  ;;  %v7505_v20 = vadd.f32 %v2439_v48, %v2427_v56  ;;  %v2404_v7 = vmul.f32 %v2282_v26, %v47_v42  ;;  %v2440_v8 = vmul.f32 %v2282_v26, %v35_v31  ;;  %v2284_v1 = vpop.f32.mrb[9].mxu0  ;;  %v2347_v62 = vpop.f32.mrb[41].mxu1 }
 0x393   :  { %v2460_v9 = vpack.c.bf16 %v2414_v50, %v2412_v33  ;;  %v2572_v16 = vpack.c.bf16 %v7494_v43, %v7479_v36  ;;  %v2368_v0 = vsub.f32 %v7404_v60, %v2345_v58  ;;  %v7513_v25 = vmul.f32 %v2284_v1, %v48_v38  ;;  %v2286_v3 = vpop.f32.mrb[10].mxu0  ;;  %v2349_v61 = vpop.f32.mrb[42].mxu1  ;;  %v6487_v36 = vld [vmem:[%s8372_s4 + $0x300] ss:$8 sps:$4 sm:$0xff]   ;;  %v6488_v43 = vld [vmem:[%s8372_s4 + $0x310] ss:$8 sps:$4 sm:$0xff]  }
 0x394   :  { %v2441_v14 = vmul.f32 %v2284_v1, %v36_v6  ;;  %v2369_v13 = vsub.f32 %v7407_v47, %v2347_v62  ;;  %v2406_v21 = vmul.f32 %v2286_v3, %v49_v18  ;;  %v2442_v27 = vmul.f32 %v2286_v3, %v37_v30  ;;  %v2288_v2 = vpop.f32.mrb[11].mxu0  ;;  %v2351_v33 = vpop.f32.mrb[43].mxu1  ;;  %v40_v62 = vld [vmem:[%s8370_s2 + $0x88] sm:$0xff] }
 0x395   :  { %v2392_v57 = vmul.f32 %v2368_v0, %v35_v31  ;;  %v2428_v59 = vmul.f32 %v2368_v0, %v47_v42  ;;  %v2370_v63 = vsub.f32 %v7414_v17, %v2349_v61  ;;  %v7520_v60 = vmul.f32 %v2288_v2, %v50_v5  ;;  %v39_v31 = vld [vmem:[%s8370_s2 + $0x80] sm:$0xff]  ;;  %v41_v0 = vld [vmem:[%s8370_s2 + $0x90] sm:$0xff] }
 0x396   :  { %v7522_v22 = vmul.f32 %v2369_v13, %v36_v6  ;;  %v2429_v15 = vmul.f32 %v2369_v13, %v48_v38  ;;  %v2443_v48 = vmul.f32 %v2288_v2, %v38_v12  ;;  %v2371_v55 = vsub.f32 %v7421_v39, %v2351_v33  ;;  %v51_v17 = vld [vmem:[%s8370_s2 + $0xe0] sm:$0xff]  ;;  %v52_v6 = vld [vmem:[%s8370_s2 + $0xe8] sm:$0xff]  ;;  %v54_v13 = vld [vmem:[%s8370_s2 + $0xf8] sm:$0xff] }
 0x397   :  { %v2416_v56 = vsub.f32 %v2392_v57, %v2404_v7  ;;  %v7525_v50 = vadd.f32 %v2440_v8, %v2428_v59  ;;  %v2394_v47 = vmul.f32 %v2370_v63, %v37_v30  ;;  %v2430_v26 = vmul.f32 %v2370_v63, %v49_v18  ;;  %v42_v57 = vld [vmem:[%s8370_s2 + $0x98] sm:$0xff] }
 0x398   :  { %v2417_v42 = vsub.f32 %v7522_v22, %v7513_v25  ;;  %v7535_v38 = vadd.f32 %v2441_v14, %v2429_v15  ;;  %v2395_v58 = vmul.f32 %v2371_v55, %v38_v12  ;;  %v2431_v39 = vmul.f32 %v2371_v55, %v50_v5  ;;  %v53_v5 = vld [vmem:[%s8370_s2 + $0xf0] sm:$0xff] }
 0x399   :  { %v2418_v30 = vsub.f32 %v2394_v47, %v2406_v21  ;;  %v7540_v18 = vadd.f32 %v2442_v27, %v2430_v26  ;;  %v2461_v7 = vpack.c.bf16 %v2415_v10, %v2413_v54  ;;  %v2292_v8 = vpop.f32.mrb[12].mxu0  ;;  %v2355_v1 = vpop.f32.mrb[44].mxu1  ;;  %v2573_v25 = vpack.c.bf16 %v7505_v20, %v7483_v49 }
 0x39a   :  { %v2419_v3 = vsub.f32 %v2395_v58, %v7520_v60  ;;  %v2455_v54 = vadd.f32 %v2443_v48, %v2431_v39  ;;  %v2408_v10 = vmul.f32 %v2292_v8, %v51_v17  ;;  %v2444_v61 = vmul.f32 %v2292_v8, %v39_v31  ;;  %v2294_v12 = vpop.f32.mrb[13].mxu0  ;;  %v2357_v14 = vpop.f32.mrb[45].mxu1 }
 0x39b   :  { %v2462_v21 = vpack.c.bf16 %v2418_v30, %v2416_v56  ;;  %v2574_v27 = vpack.c.bf16 %v7540_v18, %v7525_v50  ;;  %2499 = vmatprep.subr.bf16.mxu1 %v2461_v7  ;;  %v2372_v2 = vsub.f32 %v7436_v51, %v2355_v1  ;;  %v2409_v33 = vmul.f32 %v2294_v12, %v52_v6  ;;  %v2296_v49 = vpop.f32.mrb[14].mxu0  ;;  %v2359_v20 = vpop.f32.mrb[46].mxu1 }
 0x39c   :  { %2500 = vmatpush1.bf16.msra.mxu1 %v2460_v9  ;;  %v2445_v59 = vmul.f32 %v2294_v12, %v40_v62  ;;  %v2373_v63 = vsub.f32 %v7439_v41, %v2357_v14  ;;  %v2410_v60 = vmul.f32 %v2296_v49, %v53_v5  ;;  %v2446_v22 = vmul.f32 %v2296_v49, %v41_v0  ;;  %v2298_v15 = vpop.f32.mrb[15].mxu0  ;;  %v2361_v48 = vpop.f32.mrb[47].mxu1 }
 0x39d   :  { %v2396_v55 = vmul.f32 %v2372_v2, %v39_v31  ;;  %v2432_v56 = vmul.f32 %v2372_v2, %v51_v17  ;;  %v2374_v50 = vsub.f32 %v7446_v53, %v2359_v20  ;;  %v2411_v51 = vmul.f32 %v2298_v15, %v54_v13 }
 0x39e   :  { %v2397_v47 = vmul.f32 %v2373_v63, %v40_v62  ;;  %v2433_v26 = vmul.f32 %v2373_v63, %v52_v6  ;;  %v2447_v58 = vmul.f32 %v2298_v15, %v42_v57  ;;  %v2375_v39 = vsub.f32 %v7448_v23, %v2361_v48 }
 0x39f   :  { %v2420_v30 = vsub.f32 %v2396_v55, %v2408_v10  ;;  %v2456_v18 = vadd.f32 %v2444_v61, %v2432_v56  ;;  %v2398_v9 = vmul.f32 %v2374_v50, %v41_v0  ;;  %v2434_v7 = vmul.f32 %v2374_v50, %v53_v5  ;;  %v6485_v0 = vld [vmem:[%s8372_s4 + $0x2e0] ss:$8 sps:$4 sm:$0xff]   ;;  %v6534_v5 = vld [vmem:[%s8372_s4 + $0xf0] ss:$8 sps:$4 sm:$0xff]  }
 0x3a0   :  { %v2421_v8 = vsub.f32 %v2397_v47, %v2409_v33  ;;  %v2457_v41 = vadd.f32 %v2445_v59, %v2433_v26  ;;  %v2399_v1 = vmul.f32 %v2375_v39, %v42_v57  ;;  %v2435_v12 = vmul.f32 %v2375_v39, %v54_v13 }
 0x3a1   :  { %v2422_v14 = vsub.f32 %v2398_v9, %v2410_v60  ;;  %v2458_v49 = vadd.f32 %v2446_v22, %v2434_v7  ;;  %v2463_v31 = vpack.c.bf16 %v2419_v3, %v2417_v42  ;;  %v2575_v17 = vpack.c.bf16 %v2455_v54, %v7535_v38  ;;  %v6486_v42 = vld [vmem:[%s8372_s4 + $0x2f0] ss:$8 sps:$4 sm:$0xff]   ;;  %v6531_v38 = vld [vmem:[%s8372_s4 + $0xe0] ss:$8 sps:$4 sm:$0xff]  }
 0x3a2   :  { %v2423_v53 = vsub.f32 %v2399_v1, %v2411_v51  ;;  %v2459_v2 = vadd.f32 %v2447_v58, %v2435_v12 }
 0x3a3   :  { %v2464_v62 = vpack.c.bf16 %v2422_v14, %v2420_v30  ;;  %v2576_v6 = vpack.c.bf16 %v2458_v49, %v2456_v18  ;;  %2501 = vmatprep.subr.bf16.mxu1 %v2463_v31 }
 0x3a4   :  { %2502 = vmatpush1.bf16.msra.mxu1 %v2462_v21  ;;  %v2465_v23 = vpack.c.bf16 %v2423_v53, %v2421_v8  ;;  %v2577_v10 = vpack.c.bf16 %v2459_v2, %v2457_v41 }
 0x3a6   :  { %2503 = vmatprep.subr.bf16.mxu1 %v2465_v23 }
 0x3a8   :  { %2504 = vmatpush1.bf16.msra.mxu1 %v2464_v62 }
 0x3a9   :  { %2578 = vmatprep.subr.bf16.mxu1 %v2573_v25  ;;  %v6536_v25 = vld [vmem:[%s8372_s4 + $0xf4] ss:$8 sps:$4 sm:$0xff]  }
 0x3ab   :  { %5201 = vmatmul.mubr.msk.bf16.vlgmr.msra.gmra.mrb[48].mxu1 %vm2486_vm5, %v6485_v0 }
 0x3ac   :  { %2579 = vmatpush1.bf16.msra.mxu1 %v2572_v16  ;;  %2541 = vmatprep.mubr.bf16.mxu1 %v8377_v35  ;;  %v6533_v16 = vld [vmem:[%s8372_s4 + $0xe4] ss:$8 sps:$4 sm:$0xff]  }
 0x3ad   :  { %2580 = vmatprep.subr.bf16.mxu1 %v2575_v17 }
 0x3b0   :  { %2581 = vmatpush1.bf16.msra.mxu1 %v2574_v27 }
 0x3b1   :  { %2582 = vmatprep.subr.bf16.mxu1 %v2577_v10  ;;  %v55_v10 = vld [vmem:[%s8370_s2 + $0x100] sm:$0xff] }
 0x3b3   :  { %5202 = vmatmul.mubr.msk.bf16.gmra.mrb[52].mxu1 %vm2486_vm5, %v6486_v42 }
 0x3b4   :  { %2583 = vmatpush1.bf16.msra.mxu1 %v2576_v6  ;;  %2551 = vmatprep.mubr.bf16.mxu1 %v8377_v35 }
 0x3b5   :  { %2888 = vmatprep.subr.bf16.mxu1 %v7354_v29  ;;  %v6510_v29 = vld [vmem:[%s8372_s4 + $0x70] ss:$8 sps:$4 sm:$0xff]  }
 0x3bb   :  { %5203 = vmatmul.mubr.msk.bf16.gmra.mrb[56].mxu1 %vm2486_vm5, %v6487_v36 }
 0x3bc   :  { %2561 = vmatprep.mubr.bf16.mxu1 %v8377_v35 }
 0x3c3   :  { %5204 = vmatmul.mubr.msk.bf16.gmra.mrb[60].mxu1 %vm2486_vm5, %v6488_v43 }
 0x3c4   :  { %2610 = vmatprep.mubr.bf16.mxu1 %v8377_v35 }
 0x3cb   :  { %5205 = vmatmul.mubr.msk.bf16.vlgmr.msra.gmra.mrb[56].mxu1 %vm2486_vm5, %v6485_v0 }
 0x3cc   :  { %2620 = vmatprep.mubr.bf16.mxu1 %v8377_v35  ;;  %2889 = vmatpush1.bf16.msra.mxu1 %v7359_v32  ;;  %v6512_v32 = vld [vmem:[%s8372_s4 + $0x74] ss:$8 sps:$4 sm:$0xff]  }
 0x3cd   :  { %2890 = vmatprep.subr.bf16.mxu1 %v7364_v24  ;;  %v6515_v24 = vld [vmem:[%s8372_s4 + $0x84] ss:$8 sps:$4 sm:$0xff]   ;;  %2845 = vmatprep.subr.bf16.mxu0 %v6512_v32 }
 0x3ce   :  { %2846 = vmatpush1.bf16.msra.mxu0 %v6510_v29 }
 0x3cf   :  { %2847 = vmatprep.subr.bf16.mxu0 %v6515_v24 }
 0x3d0   :  { %2891 = vmatpush1.bf16.msra.mxu1 %v7372_v19  ;;  %v6513_v19 = vld [vmem:[%s8372_s4 + $0x80] ss:$8 sps:$4 sm:$0xff]  }
 0x3d1   :  { %2892 = vmatprep.subr.bf16.mxu1 %v7377_v11  ;;  %v6516_v11 = vld [vmem:[%s8372_s4 + $0x90] ss:$8 sps:$4 sm:$0xff]  }
 0x3d2   :  { %2848 = vmatpush1.bf16.msra.mxu0 %v6513_v19 }
 0x3d3   :  { %5206 = vmatmul.mubr.msk.bf16.gmra.mrb[60].mxu1 %vm2486_vm5, %v6486_v42 }
 0x3d4   :  { %2630 = vmatprep.mubr.bf16.mxu1 %v8377_v35  ;;  %2893 = vmatpush1.bf16.msra.mxu1 %v7384_v40  ;;  %v6518_v40 = vld [vmem:[%s8372_s4 + $0x94] ss:$8 sps:$4 sm:$0xff]  }
 0x3d5   :  { %2894 = vmatprep.subr.bf16.mxu1 %v7389_v28  ;;  %v6521_v28 = vld [vmem:[%s8372_s4 + $0xa4] ss:$8 sps:$4 sm:$0xff]   ;;  %2849 = vmatprep.subr.bf16.mxu0 %v6518_v40 }
 0x3d6   :  { %2850 = vmatpush1.bf16.msra.mxu0 %v6516_v11 }
 0x3d7   :  { %2851 = vmatprep.subr.bf16.mxu0 %v6521_v28 }
 0x3d8   :  { %2895 = vmatpush1.bf16.msra.mxu1 %v7396_v44  ;;  %v6519_v44 = vld [vmem:[%s8372_s4 + $0xa0] ss:$8 sps:$4 sm:$0xff]  }
 0x3d9   :  { %2896 = vmatprep.subr.bf16.mxu1 %v7401_v45  ;;  %v6524_v45 = vld [vmem:[%s8372_s4 + $0xb4] ss:$8 sps:$4 sm:$0xff]  }
 0x3da   :  { %2852 = vmatpush1.bf16.msra.mxu0 %v6519_v44 }
 0x3db   :  { %5207 = vmatmul.mubr.msk.bf16.gmra.mrb[64].mxu1 %vm2486_vm5, %v6487_v36  ;;  %2853 = vmatprep.subr.bf16.mxu0 %v6524_v45 }
 0x3dc   :  { %2640 = vmatprep.mubr.bf16.mxu1 %v8377_v35  ;;  %2897 = vmatpush1.bf16.msra.mxu1 %v7412_v37  ;;  %v6522_v37 = vld [vmem:[%s8372_s4 + $0xb0] ss:$8 sps:$4 sm:$0xff]  }
 0x3dd   :  { %2898 = vmatprep.subr.bf16.mxu1 %v7419_v4  ;;  %v6527_v4 = vld [vmem:[%s8372_s4 + $0xc4] ss:$8 sps:$4 sm:$0xff]  }
 0x3de   :  { %2854 = vmatpush1.bf16.msra.mxu0 %v6522_v37 }
 0x3df   :  { %2855 = vmatprep.subr.bf16.mxu0 %v6527_v4 }
 0x3e0   :  { %2899 = vmatpush1.bf16.msra.mxu1 %v7428_v46  ;;  %v6525_v46 = vld [vmem:[%s8372_s4 + $0xc0] ss:$8 sps:$4 sm:$0xff]  }
 0x3e1   :  { %2900 = vmatprep.subr.bf16.mxu1 %v7433_v34  ;;  %v6530_v34 = vld [vmem:[%s8372_s4 + $0xd4] ss:$8 sps:$4 sm:$0xff]  }
 0x3e2   :  { %2856 = vmatpush1.bf16.msra.mxu0 %v6525_v46 }
 0x3e3   :  { %5208 = vmatmul.mubr.msk.bf16.gmra.mrb[68].mxu1 %vm2486_vm5, %v6488_v43  ;;  %2857 = vmatprep.subr.bf16.mxu0 %v6530_v34 }
 0x3e4   :  { %2901 = vmatpush1.bf16.msra.mxu1 %v7444_v52  ;;  %v6528_v52 = vld [vmem:[%s8372_s4 + $0xd0] ss:$8 sps:$4 sm:$0xff]  }
 0x3e5   :  { %2902 = vmatprep.subr.bf16.mxu1 %v6512_v32 }
 0x3e6   :  { %2858 = vmatpush1.bf16.msra.mxu0 %v6528_v52 }
 0x3e7   :  { %2859 = vmatprep.subr.bf16.mxu0 %v6533_v16 }
 0x3e8   :  { %2903 = vmatpush1.bf16.msra.mxu1 %v6510_v29 }
 0x3e9   :  { %2904 = vmatprep.subr.bf16.mxu1 %v6515_v24 }
 0x3ea   :  { %2860 = vmatpush1.bf16.msra.mxu0 %v6531_v38 }
 0x3eb   :  { %2861 = vmatprep.subr.bf16.mxu0 %v6536_v25 }
 0x3ec   :  { %2905 = vmatpush1.bf16.msra.mxu1 %v6513_v19 }
 0x3ed   :  { %2906 = vmatprep.subr.bf16.mxu1 %v6518_v40 }
 0x3ee   :  { %2862 = vmatpush1.bf16.msra.mxu0 %v6534_v5 }
 0x3f0   :  { %2907 = vmatpush1.bf16.msra.mxu1 %v6516_v11 }
 0x3f1   :  { %2908 = vmatprep.subr.bf16.mxu1 %v6521_v28 }
 0x3f4   :  { %2909 = vmatpush1.bf16.msra.mxu1 %v6519_v44 }
 0x3f5   :  { %2910 = vmatprep.subr.bf16.mxu1 %v6524_v45 }
 0x3f8   :  { %2911 = vmatpush1.bf16.msra.mxu1 %v6522_v37 }
 0x3f9   :  { %2912 = vmatprep.subr.bf16.mxu1 %v6527_v4 }
 0x3fc   :  { %2913 = vmatpush1.bf16.msra.mxu1 %v6525_v46 }
 0x3fd   :  { %2914 = vmatprep.subr.bf16.mxu1 %v6530_v34 }
 0x400   :  { %2915 = vmatpush1.bf16.msra.mxu1 %v6528_v52 }
 0x401   :  { %2916 = vmatprep.subr.bf16.mxu1 %v6533_v16 }
 0x404   :  { %2917 = vmatpush1.bf16.msra.mxu1 %v6531_v38 }
 0x405   :  { %2918 = vmatprep.subr.bf16.mxu1 %v6536_v25 }
 0x408   :  { %2919 = vmatpush1.bf16.msra.mxu1 %v6534_v5 }
 0x47e   :  { %v2533_v3 = vpop.f32.mrb[48].mxu1 }
 0x47f   :  { %v2535_v54 = vpop.f32.mrb[49].mxu1 }
 0x480   :  { %v2537_v61 = vpop.f32.mrb[50].mxu1 }
 0x481   :  { %v2539_v13 = vpop.f32.mrb[51].mxu1 }
 0x486   :  { %v2543_v21 = vpop.f32.mrb[52].mxu1 }
 0x487   :  { %v2545_v27 = vpop.f32.mrb[53].mxu1 }
 0x488   :  { %v2547_v33 = vpop.f32.mrb[54].mxu1 }
 0x489   :  { %v2549_v20 = vpop.f32.mrb[55].mxu1 }
 0x49e   :  { %v2612_v57 = vpop.f32.mrb[56].mxu1 }
 0x49f   :  { %v2614_v59 = vpop.f32.mrb[57].mxu1 }
 0x4a0   :  { %v2616_v63 = vpop.f32.mrb[58].mxu1 }
 0x4a1   :  { %v2884_v60 = vpack.c.bf16 %v2616_v63, %v2612_v57  ;;  %v2618_v22 = vpop.f32.mrb[59].mxu1 }
 0x4a2   :  { %v2885_v15 = vpack.c.bf16 %v2618_v22, %v2614_v59 }
 0x4a4   :  { %2920 = vmatprep.mubr.bf16.mxu1 %v2885_v15 }
 0x4a5   :  { %2921 = vmatmul.mubr.bf16.vlgmr.msra.gmra.mrb[72].mxu1 %v2884_v60 }
 0x4a6   :  { %v2622_v48 = vpop.f32.mrb[60].mxu1 }
 0x4a7   :  { %v2624_v55 = vpop.f32.mrb[61].mxu1 }
 0x4a8   :  { %v2626_v56 = vpop.f32.mrb[62].mxu1 }
 0x4a9   :  { %v2886_v50 = vpack.c.bf16 %v2626_v56, %v2622_v48  ;;  %v2628_v51 = vpop.f32.mrb[63].mxu1  ;;  %v57_v48 = vld [vmem:[%s8370_s2 + $0x120] sm:$0xff] }
 0x4aa   :  { %v2887_v47 = vpack.c.bf16 %v2628_v51, %v2624_v55  ;;  %v58_v55 = vld [vmem:[%s8370_s2 + $0x130] sm:$0xff] }
 0x4ab   :  { %v6095_v51 = vpack.c.bf16 %v58_v55, %v57_v48 }
 0x4ac   :  { %2930 = vmatprep.mubr.bf16.mxu1 %v2887_v47  ;;  %v59_v47 = vld [vmem:[%s8370_s2 + $0x140] sm:$0xff] }
 0x4ad   :  { %2931 = vmatmul.mubr.bf16.gmra.mrb[76].mxu1 %v2886_v50 }
 0x4ae   :  { %v2632_v26 = vpop.f32.mrb[64].mxu1 }
 0x4af   :  { %v2651_v58 = vsub.f32 %v2533_v3, %v2632_v26  ;;  %v2634_v39 = vpop.f32.mrb[65].mxu1  ;;  %v60_v26 = vld [vmem:[%s8370_s2 + $0x150] sm:$0xff] }
 0x4b0   :  { %v2652_v30 = vsub.f32 %v2535_v54, %v2634_v39  ;;  %v2636_v18 = vpop.f32.mrb[66].mxu1  ;;  %v6099_v39 = vpack.c.bf16 %v60_v26, %v59_v47 }
 0x4b1   :  { %v2653_v9 = vsub.f32 %v2537_v61, %v2636_v18  ;;  %v2638_v7 = vpop.f32.mrb[67].mxu1  ;;  %v62_v18 = vld [vmem:[%s8370_s2 + $0x170] sm:$0xff] }
 0x4b2   :  { %v2654_v8 = vsub.f32 %v2539_v13, %v2638_v7  ;;  %v63_v7 = vld [vmem:[%s8370_s2 + $0x180] sm:$0xff] }
 0x4b3   :  { %v2667_v41 = vpack.c.bf16 %v2653_v9, %v2651_v58  ;;  %v56_v58 = vld [vmem:[%s8370_s2 + $0x110] sm:$0xff] }
 0x4b4   :  { %v2668_v1 = vpack.c.bf16 %v2654_v8, %v2652_v30  ;;  %v61_v30 = vld [vmem:[%s8370_s2 + $0x160] sm:$0xff]  ;;  %v64_v8 = vld [vmem:[%s8370_s2 + $0x190] sm:$0xff] }
 0x4b5   :  { %v6103_v9 = vpack.c.bf16 %v62_v18, %v61_v30 }
 0x4b6   :  { %v2642_v12 = vpop.f32.mrb[68].mxu1  ;;  %2863 = vmatprep.mubr.bf16.mxu0 %v2668_v1  ;;  %v65_v1 = vld [vmem:[%s8370_s2 + $0x1a0] sm:$0xff] }
 0x4b7   :  { %v2655_v14 = vsub.f32 %v2543_v21, %v2642_v12  ;;  %v2644_v49 = vpop.f32.mrb[69].mxu1  ;;  %2864 = vmatmul.mubr.bf16.vlgmr.msra.gmra.mrb[16].mxu0 %v2667_v41  ;;  %v6107_v41 = vpack.c.bf16 %v64_v8, %v63_v7  ;;  %v66_v12 = vld [vmem:[%s8370_s2 + $0x1b0] sm:$0xff]  ;;  %v83_v8 = vld [vmem:[%s8370_s2 + $0x1c8] sm:$0xff] }
 0x4b8   :  { %v2656_v31 = vsub.f32 %v2545_v27, %v2644_v49  ;;  %v2646_v17 = vpop.f32.mrb[70].mxu1  ;;  %v67_v49 = vld [vmem:[%s8370_s2 + $0x1c0] sm:$0xff] }
 0x4b9   :  { %v2657_v53 = vsub.f32 %v2547_v33, %v2646_v17  ;;  %v2648_v2 = vpop.f32.mrb[71].mxu1 }
 0x4ba   :  { %v2658_v62 = vsub.f32 %v2549_v20, %v2648_v2  ;;  %v70_v2 = vld [vmem:[%s8370_s2 + $0x1f0] sm:$0xff] }
 0x4bb   :  { %v2669_v6 = vpack.c.bf16 %v2657_v53, %v2655_v14  ;;  %v6111_v14 = vpack.c.bf16 %v66_v12, %v65_v1  ;;  %v69_v53 = vld [vmem:[%s8370_s2 + $0x1e0] sm:$0xff]  ;;  %v3654_v1 = vand.u32 4294901760, %v83_v8 }
 0x4bc   :  { %v2670_v23 = vpack.c.bf16 %v2658_v62, %v2656_v31  ;;  %v68_v31 = vld [vmem:[%s8370_s2 + $0x1d0] sm:$0xff]  ;;  %v6119_v62 = vpack.c.bf16 %v70_v2, %v69_v53 }
 0x4bd   :  { %v6115_v17 = vpack.c.bf16 %v68_v31, %v67_v49  ;;  %v85_v49 = vld [vmem:[%s8370_s2 + $0x1e8] sm:$0xff]  ;;  %v86_v31 = vld [vmem:[%s8370_s2 + $0x1f8] sm:$0xff] }
 0x4be   :  { %2873 = vmatprep.mubr.bf16.mxu0 %v2670_v23  ;;  %v72_v23 = vld [vmem:[%s8370_s2 + $0x210] sm:$0xff]  ;;  %v3663_v53 = vand.u32 4294901760, %v86_v31 }
 0x4bf   :  { %2874 = vmatmul.mubr.bf16.gmra.mrb[20].mxu0 %v2669_v6  ;;  %v71_v6 = vld [vmem:[%s8370_s2 + $0x200] sm:$0xff] }
 0x4c0   :  { %5685 = vmatprep.mubr.msk.f32.mxu0 %vm257_vm0, %v55_v10  ;;  %v6123_v10 = vpack.c.bf16 %v72_v23, %v71_v6  ;;  %v87_v23 = vld [vmem:[%s8370_s2 + $0x208] sm:$0xff] }
 0x578   :  { %v2922_v0 = vpop.f32.mrb[72].mxu1 }
 0x579   :  { %v2924_v42 = vpop.f32.mrb[73].mxu1 }
 0x57a   :  { %v2926_v36 = vpop.f32.mrb[74].mxu1 }
 0x57b   :  { %v2928_v43 = vpop.f32.mrb[75].mxu1 }
 0x580   :  { %v2932_v29 = vpop.f32.mrb[76].mxu1 }
 0x581   :  { %v2934_v32 = vpop.f32.mrb[77].mxu1 }
 0x582   :  { %v2936_v24 = vpop.f32.mrb[78].mxu1 }
 0x583   :  { %v2938_v19 = vpop.f32.mrb[79].mxu1 }
 0x58a   :  { %v2865_v11 = vpop.f32.mrb[16].mxu0 }
 0x58b   :  { %v2941_v40 = vsub.f32 %v2865_v11, %v2924_v42  ;;  %v2867_v28 = vpop.f32.mrb[17].mxu0  ;;  %v7738_v11 = vld [vmem:[%s8370_s2 + $0x138] sm:$0xff] }
 0x58c   :  { %v2945_v44 = vadd.f32 %v2922_v0, %v2867_v28  ;;  %v2869_v45 = vpop.f32.mrb[18].mxu0 }
 0x58d   :  { %v2949_v37 = vmul.f32 %v2941_v40, %v2941_v40  ;;  %v2942_v4 = vsub.f32 %v2869_v45, %v2928_v43  ;;  %v2871_v46 = vpop.f32.mrb[19].mxu0  ;;  %v7743_v40 = vld [vmem:[%s8370_s2 + $0x148] sm:$0xff]  ;;  %v7750_v45 = vld [vmem:[%s8370_s2 + $0x158] sm:$0xff] }
 0x58e   :  { %v2953_v34 = vmul.f32 %v2945_v44, %v2945_v44  ;;  %v2946_v52 = vadd.f32 %v2926_v36, %v2871_v46  ;;  %v3627_v44 = vand.u32 4294901760, %v7738_v11  ;;  %v7761_v46 = vld [vmem:[%s8370_s2 + $0x178] sm:$0xff] }
 0x58f   :  { %v2950_v16 = vmul.f32 %v2942_v4, %v2942_v4  ;;  %v7756_v4 = vld [vmem:[%s8370_s2 + $0x168] sm:$0xff] }
 0x590   :  { %v2957_v38 = vadd.f32 %v2953_v34, %v2949_v37  ;;  %v2954_v5 = vmul.f32 %v2946_v52, %v2946_v52  ;;  %v3630_v37 = vand.u32 4294901760, %v7743_v40  ;;  %v3633_v34 = vand.u32 4294901760, %v7750_v45 }
 0x591   :  { %v7874_v6 = vsub.f32 %v7738_v11, %v3627_v44 }
 0x592   :  { %v2958_v25 = vadd.f32 %v2954_v5, %v2950_v16  ;;  %v2875_v3 = vpop.f32.mrb[20].mxu0  ;;  %v3636_v16 = vand.u32 4294901760, %v7756_v4  ;;  %v7776_v5 = vpack.c.bf16 %v3633_v34, %v3630_v37 }
 0x593   :  { %v2943_v54 = vsub.f32 %v2875_v3, %v2934_v32  ;;  %v2877_v61 = vpop.f32.mrb[21].mxu0  ;;  %v7786_v3 = vld [vmem:[%s8370_s2 + $0x198] sm:$0xff] }
 0x594   :  { %v2947_v13 = vadd.f32 %v2932_v29, %v2877_v61  ;;  %v2879_v21 = vpop.f32.mrb[22].mxu0  ;;  %v6087_v27 = vpack.c.bf16 %v2958_v25, %v2957_v38  ;;  %v3639_v38 = vand.u32 4294901760, %v7761_v46  ;;  %v7781_v25 = vld [vmem:[%s8370_s2 + $0x188] sm:$0xff] }
 0x595   :  { %v2951_v33 = vmul.f32 %v2943_v54, %v2943_v54  ;;  %v2944_v20 = vsub.f32 %v2879_v21, %v2938_v19  ;;  %v2881_v57 = vpop.f32.mrb[23].mxu0  ;;  %v7733_v19 = vld [vmem:[%s8370_s2 + $0x128] sm:$0xff]  ;;  %v3642_v61 = vand.u32 4294901760, %v7781_v25 }
 0x596   :  { %v2955_v59 = vmul.f32 %v2947_v13, %v2947_v13  ;;  %v2948_v63 = vadd.f32 %v2936_v24, %v2881_v57  ;;  %6088 = vmatprep.subr.bf16.mxu0 %v6087_v27  ;;  %v3624_v28 = vand.u32 4294901760, %v7733_v19  ;;  %v7795_v54 = vpack.c.bf16 %v3639_v38, %v3636_v16  ;;  %v7802_v21 = vld [vmem:[%s8370_s2 + $0x1a8] sm:$0xff] }
 0x597   :  { %v2952_v60 = vmul.f32 %v2944_v20, %v2944_v20  ;;  %6090 = vmatpush3.bf16.msra.mxu0 %v6087_v27  ;;  %v3645_v13 = vand.u32 4294901760, %v7786_v3  ;;  %v7807_v27 = vld [vmem:[%s8370_s2 + $0x1b8] sm:$0xff]  ;;  %v3648_v20 = vand.u32 4294901760, %v7802_v21 }
 0x598   :  { %v2959_v22 = vadd.f32 %v2955_v59, %v2951_v33  ;;  %v2956_v15 = vmul.f32 %v2948_v63, %v2948_v63  ;;  %v7768_v52 = vpack.c.bf16 %v3627_v44, %v3624_v28  ;;  %v3651_v57 = vand.u32 4294901760, %v7807_v27 }
 0x599   :  { %v7815_v33 = vpack.c.bf16 %v3645_v13, %v3642_v61  ;;  %v7899_v44 = vsub.f32 %v83_v8, %v3654_v1 }
 0x59a   :  { %v2960_v56 = vadd.f32 %v2956_v15, %v2952_v60  ;;  %6152 = vmatprep.subr.bf16.mxu1 %v7768_v52  ;;  %v7825_v59 = vpack.c.bf16 %v3651_v57, %v3648_v20 }
 0x59b   :  { %6154 = vmatpush3.bf16.msra.mxu1 %v7768_v52 }
 0x59c   :  { %v6091_v50 = vpack.c.bf16 %v2960_v56, %v2959_v22  ;;  %6156 = vmatprep.subr.bf16.mxu1 %v7776_v5 }
 0x59e   :  { %6092 = vmatprep.subr.bf16.mxu0 %v6091_v50 }
 0x59f   :  { %6094 = vmatpush3.bf16.msra.mxu0 %v6091_v50  ;;  %6158 = vmatpush3.bf16.msra.mxu1 %v7776_v5 }
 0x5a0   :  { %6096 = vmatprep.subr.bf16.mxu0 %v6095_v51  ;;  %6160 = vmatprep.subr.bf16.mxu1 %v7795_v54 }
 0x5a2   :  { %5686 = vmatmul.mubr.msk.f32.vlgmr.msra.gmra.mrb[24].mxu0 %vm257_vm0, %v56_v58  ;;  %vm3117_vm0 = vcmask 130048  }
 0x5a3   :  { %6098 = vmatpush3.bf16.msra.mxu0 %v6095_v51  ;;  %v3119_v36 = vsel %vm3117_vm0, 1.0, %v8377_v35  ;;  %6162 = vmatpush3.bf16.msra.mxu1 %v7795_v54 }
 0x5a4   :  { %6100 = vmatprep.subr.bf16.mxu0 %v6099_v39  ;;  %v7723_v43 = vsub.f32 %v3119_v36, %v3119_v36  ;;  %6164 = vmatprep.subr.bf16.mxu1 %v7815_v33 }
 0x5a6   :  { %v7726_v29 = vand.u32 4294901760, %v7723_v43 }
 0x5a7   :  { %6102 = vmatpush3.bf16.msra.mxu0 %v6099_v39  ;;  %6166 = vmatpush3.bf16.msra.mxu1 %v7815_v33 }
 0x5a8   :  { %6104 = vmatprep.subr.bf16.mxu0 %v6103_v9  ;;  %v3191_v32 = vsub.f32 %v7723_v43, %v7726_v29  ;;  %6168 = vmatprep.subr.bf16.mxu1 %v7825_v59 }
 0x5aa   :  { %v3192_v24 = vand.u32 4294901760, %v3191_v32 }
 0x5ab   :  { %6106 = vmatpush3.bf16.msra.mxu0 %v6103_v9  ;;  %6170 = vmatpush3.bf16.msra.mxu1 %v7825_v59  ;;  %v6635_v9 = vmov 1.0  }
 0x5ac   :  { %6108 = vmatprep.subr.bf16.mxu0 %v6107_v41 }
 0x5af   :  { %6110 = vmatpush3.bf16.msra.mxu0 %v6107_v41  ;;  %v84_v41 = vld [vmem:[%s8370_s2 + $0x1d8] sm:$0xff] }
 0x5b0   :  { %6112 = vmatprep.subr.bf16.mxu0 %v6111_v14  ;;  %v3657_v12 = vand.u32 4294901760, %v84_v41 }
 0x5b3   :  { %6114 = vmatpush3.bf16.msra.mxu0 %v6111_v14  ;;  %v7854_v14 = vpack.c.bf16 %v3657_v12, %v3654_v1 }
 0x5b4   :  { %6116 = vmatprep.subr.bf16.mxu0 %v6115_v17 }
 0x5b5   :  { %6172 = vmatprep.subr.bf16.mxu1 %v7854_v14 }
 0x5b6   :  { %6174 = vmatpush3.bf16.msra.mxu1 %v7854_v14 }
 0x5b7   :  { %6118 = vmatpush3.bf16.msra.mxu0 %v6115_v17  ;;  %v3660_v17 = vand.u32 4294901760, %v85_v49 }
 0x5b8   :  { %6120 = vmatprep.subr.bf16.mxu0 %v6119_v62 }
 0x5b9   :  { %v7864_v2 = vpack.c.bf16 %v3663_v53, %v3660_v17 }
 0x5bb   :  { %6122 = vmatpush3.bf16.msra.mxu0 %v6119_v62  ;;  %v7869_v62 = vsub.f32 %v7733_v19, %v3624_v28  ;;  %6176 = vmatprep.subr.bf16.mxu1 %v7864_v2 }
 0x5bc   :  { %6124 = vmatprep.subr.bf16.mxu0 %v6123_v10  ;;  %6178 = vmatpush3.bf16.msra.mxu1 %v7864_v2 }
 0x5bd   :  { %v3727_v36 = vand.u32 4294901760, %v7869_v62 }
 0x5bf   :  { %6126 = vmatpush3.bf16.msra.mxu0 %v6123_v10  ;;  %v88_v10 = vld [vmem:[%s8370_s2 + $0x218] sm:$0xff]  ;;  %v3728_v32 = vsub.f32 %v7869_v62, %v3727_v36 }
 0x5c1   :  { %v3729_v19 = vand.u32 4294901760, %v3728_v32 }
 0x675   :  { %v5687_v0 = vpop.f32.mrb[24].mxu0 }
 0x676   :  { %v3033_v42 = vpop.f32.mrb[25].mxu0 }
 0x677   :  { %5720 = vmatprep.mubr.f32.mxu0 %v3033_v42  ;;  %v3669_v42 = vand.u32 4294901760, %v88_v10 }
 0x678   :  { %5721 = vmatmul.mubr.f32.vlgmr.msra.gmra.mrb[26].mxu0 %v5687_v0  ;;  %v3666_v0 = vand.u32 4294901760, %v87_v23 }
 0x679   :  { %5727 = vmatprep.mubr.f32.mxu0 %v3192_v24  ;;  %v7927_v8 = vsub.f32 %v88_v10, %v3669_v42 }
 0x74b   :  { %v7830_v63 = vpop.f32.mrb[26].mxu0 }
 0x74c   :  { %v3125_v60 = vand.u32 4294901760, %v7830_v63  ;;  %v7833_v22 = vpop.f32.mrb[27].mxu0 }
 0x74d   :  { %v3122_v15 = vand.u32 4294901760, %v7833_v22 }
 0x74e   :  { %v3217_v48 = vsub.f32 %v7830_v63, %v3125_v60 }
 0x74f   :  { %v6127_v55 = vpack.c.bf16 %v3125_v60, %v3122_v15  ;;  %v3210_v56 = vsub.f32 %v7833_v22, %v3122_v15  ;;  %v7901_v60 = vsub.f32 %v84_v41, %v3657_v12  ;;  %v8384_v15 = vand.u32 4294901760, %v7899_v44 }
 0x750   :  { %v3218_v50 = vand.u32 4294901760, %v3217_v48 }
 0x751   :  { %v3211_v51 = vand.u32 4294901760, %v3210_v56  ;;  %6128 = vmatprep.subr.bf16.mxu0 %v6127_v55  ;;  %v6135_v47 = vpack.c.bf16 %v3217_v48, %v3210_v56  ;;  %v7947_v32 = vpack.c.bf16 %v7901_v60, %v7899_v44 }
 0x752   :  { %6130 = vmatpush3.bf16.msra.mxu0 %v6127_v55  ;;  %v3219_v26 = vsub.f32 %v3217_v48, %v3218_v50  ;;  %v8383_v48 = vand.u32 4294901760, %v7901_v60 }
 0x753   :  { %v3212_v58 = vsub.f32 %v3210_v56, %v3211_v51  ;;  %v6143_v39 = vpack.c.bf16 %v3218_v50, %v3211_v51  ;;  %v7911_v50 = vsub.f32 %v85_v49, %v3660_v17  ;;  %v7913_v51 = vsub.f32 %v86_v31, %v3663_v53 }
 0x754   :  { %v3220_v30 = vand.u32 4294901760, %v3219_v26  ;;  %v3805_v56 = vsub.f32 %v7901_v60, %v8383_v48  ;;  %v8379_v49 = vand.u32 4294901760, %v7927_v8 }
 0x755   :  { %5728 = vmatmul.mubr.f32.vlgmr.msra.gmra.mrb[28].mxu0 %v3192_v24  ;;  %v3213_v18 = vand.u32 4294901760, %v3212_v58  ;;  %v8382_v58 = vand.u32 4294901760, %v7911_v50 }
 0x756   :  { %5734 = vmatprep.mubr.msk.f32.mxu0 %vm3117_vm0, %v6635_v9  ;;  %v3806_v26 = vand.u32 4294901760, %v3805_v56  ;;  %v3833_v53 = vsub.f32 %v7927_v8, %v8379_v49 }
 0x757   :  { %v6131_v7 = vpack.c.bf16 %v3220_v30, %v3213_v18  ;;  %v3812_v18 = vsub.f32 %v7911_v50, %v8382_v58 }
 0x759   :  { %6132 = vmatprep.subr.bf16.mxu0 %v6131_v7  ;;  %v3813_v41 = vand.u32 4294901760, %v3812_v18  ;;  %v7977_v18 = vsub.f32 %v7761_v46, %v3639_v38  ;;  %v7994_v46 = vsub.f32 %v7781_v25, %v3642_v61 }
 0x75a   :  { %6134 = vmatpush3.bf16.msra.mxu0 %v6131_v7  ;;  %v7925_v7 = vsub.f32 %v87_v23, %v3666_v0 }
 0x75b   :  { %6136 = vmatprep.subr.bf16.mxu0 %v6135_v47 }
 0x75c   :  { %v8380_v12 = vand.u32 4294901760, %v7925_v7 }
 0x75d   :  { %5735 = vmatmul.mubr.msk.f32.vlgmr.msra.gmra.mrb[28].mxu0 %vm3117_vm0, %v6635_v9 }
 0x75e   :  { %6138 = vmatpush3.bf16.msra.mxu0 %v6135_v47  ;;  %5741 = vmatprep.mubr.f32.mxu0 %v7723_v43  ;;  %v3826_v17 = vsub.f32 %v7925_v7, %v8380_v12 }
 0x75f   :  { %6140 = vmatprep.subr.bf16.mxu0 %v6127_v55 }
 0x760   :  { %v3827_v23 = vand.u32 4294901760, %v3826_v17 }
 0x765   :  { %5742 = vmatmul.mubr.f32.vlgmr.msra.gmra.mrb[28].mxu0 %v7723_v43  ;;  %v3734_v43 = vand.u32 4294901760, %v7874_v6 }
 0x766   :  { %6142 = vmatpush3.bf16.msra.mxu0 %v6127_v55  ;;  %5748 = vmatprep.mubr.f32.mxu0 %v7726_v29 }
 0x767   :  { %6144 = vmatprep.subr.bf16.mxu0 %v6143_v39  ;;  %v3735_v24 = vsub.f32 %v7874_v6, %v3734_v43 }
 0x769   :  { %v3736_v11 = vand.u32 4294901760, %v3735_v24  ;;  %v7951_v24 = vpack.c.bf16 %v7913_v51, %v7911_v50 }
 0x76b   :  { %v7896_v28 = vpack.c.bf16 %v3736_v11, %v3729_v19  ;;  %v7955_v19 = vpack.c.bf16 %v7927_v8, %v7925_v7  ;;  %v7960_v11 = vsub.f32 %v7743_v40, %v3630_v37 }
 0x76d   :  { %5749 = vmatmul.mubr.f32.vlgmr.msra.gmra.mrb[28].mxu0 %v7726_v29  ;;  %v7886_v29 = vpack.c.bf16 %v3669_v42, %v3666_v0  ;;  %v3834_v0 = vand.u32 4294901760, %v3833_v53  ;;  %v7943_v42 = vpack.c.bf16 %v7874_v6, %v7869_v62  ;;  %v3741_v56 = vand.u32 4294901760, %v7960_v11 }
 0x76e   :  { %6146 = vmatpush3.bf16.msra.mxu0 %v6143_v39  ;;  %5755 = vmatprep.mubr.msk.f32.mxu0 %vm3117_vm0, %v6635_v9  ;;  %v8381_v39 = vand.u32 4294901760, %v7913_v51 }
 0x76f   :  { %6148 = vmatprep.subr.bf16.mxu0 %v6127_v55  ;;  %6180 = vmatprep.subr.bf16.mxu1 %v7886_v29  ;;  %v7939_v10 = vpack.c.bf16 %v3834_v0, %v3827_v23 }
 0x770   :  { %6182 = vmatpush3.bf16.msra.mxu1 %v7886_v29 }
 0x771   :  { %6184 = vmatprep.subr.bf16.mxu1 %v7896_v28 }
 0x775   :  { %5756 = vmatmul.mubr.msk.f32.vlgmr.msra.gmra.mrb[28].mxu0 %vm3117_vm0, %v6635_v9 }
 0x776   :  { %6150 = vmatpush3.bf16.msra.mxu0 %v6127_v55  ;;  %5762 = vmatprep.mubr.msk.f32.mxu0 %vm3117_vm0, %v6635_v9  ;;  %v3798_v55 = vsub.f32 %v7899_v44, %v8384_v15 }
 0x778   :  { %v3799_v47 = vand.u32 4294901760, %v3798_v55  ;;  %v7965_v55 = vsub.f32 %v7750_v45, %v3633_v34  ;;  %v3742_v45 = vsub.f32 %v7960_v11, %v3741_v56 }
 0x77a   :  { %v7917_v30 = vpack.c.bf16 %v3806_v26, %v3799_v47  ;;  %v3748_v47 = vand.u32 4294901760, %v7965_v55  ;;  %v7972_v26 = vsub.f32 %v7756_v4, %v3636_v16  ;;  %v3762_v16 = vand.u32 4294901760, %v7977_v18 }
 0x77b   :  { %v3743_v23 = vand.u32 4294901760, %v3742_v45  ;;  %v8028_v45 = vsub.f32 %v7807_v27, %v3651_v57 }
 0x77c   :  { %v3749_v34 = vsub.f32 %v7965_v55, %v3748_v47  ;;  %v3755_v4 = vand.u32 4294901760, %v7972_v26  ;;  %v3763_v61 = vsub.f32 %v7977_v18, %v3762_v16 }
 0x77d   :  { %5763 = vmatmul.mubr.msk.f32.vlgmr.msra.gmra.mrb[28].mxu0 %vm3117_vm0, %v6635_v9  ;;  %v3819_v9 = vsub.f32 %v7913_v51, %v8381_v39 }
 0x77e   :  { %v3750_v0 = vand.u32 4294901760, %v3749_v34  ;;  %v3756_v25 = vsub.f32 %v7972_v26, %v3755_v4  ;;  %v3764_v58 = vand.u32 4294901760, %v3763_v61  ;;  %v6287_v62 = vpack.c.bf16 %v3762_v16, %v3755_v4  ;;  %v6556_v4 = vld [vmem:[%s8372_s4 + $0x154] ss:$8 sps:$4 sm:$0xff]   ;;  %v6554_v16 = vld [vmem:[%s8372_s4 + $0x150] ss:$8 sps:$4 sm:$0xff]  }
 0x77f   :  { %v3820_v1 = vand.u32 4294901760, %v3819_v9 }
 0x780   :  { %v6187_v49 = vpack.c.bf16 %v3750_v0, %v3743_v23  ;;  %v3757_v39 = vand.u32 4294901760, %v3756_v25 }
 0x781   :  { %v7931_v31 = vpack.c.bf16 %v3820_v1, %v3813_v41  ;;  %v8002_v1 = vsub.f32 %v7786_v3, %v3645_v13  ;;  %v3769_v3 = vand.u32 4294901760, %v7994_v46 }
 0x782   :  { %v6191_v57 = vpack.c.bf16 %v3764_v58, %v3757_v39  ;;  %v6223_v58 = vpack.c.bf16 %v7977_v18, %v7972_v26  ;;  %v6550_v26 = vld [vmem:[%s8372_s4 + $0x134] ss:$8 sps:$4 sm:$0xff]   ;;  %v6548_v18 = vld [vmem:[%s8372_s4 + $0x130] ss:$8 sps:$4 sm:$0xff]  }
 0x783   :  { %v3770_v48 = vsub.f32 %v7994_v46, %v3769_v3  ;;  %v6227_v39 = vpack.c.bf16 %v8002_v1, %v7994_v46  ;;  %v6559_v46 = vld [vmem:[%s8372_s4 + $0x164] ss:$8 sps:$4 sm:$0xff]  }
 0x785   :  { %v3771_v23 = vand.u32 4294901760, %v3770_v48  ;;  %v6219_v48 = vpack.c.bf16 %v7965_v55, %v7960_v11  ;;  %v8396_v11 = vand.u32 4294901760, %v7927_v8  ;;  %v8397_v8 = vmov 0  }
 0x850   :  { %v5764_v40 = vpop.f32.mrb[28].mxu0 }
 0x851   :  { %v7979_v37 = vand.u32 4294901760, %v5764_v40  ;;  %v3613_v9 = vpop.f32.mrb[29].mxu0 }
 0x852   :  { %v7987_v41 = vand.u32 4294901760, %v3613_v9 }
 0x853   :  { %v7997_v38 = vsub.f32 %v5764_v40, %v7979_v37  ;;  %v3776_v40 = vand.u32 4294901760, %v8002_v1 }
 0x854   :  { %v8005_v17 = vsub.f32 %v3613_v9, %v7987_v41  ;;  %v8023_v9 = vsub.f32 %v7802_v21, %v3648_v20  ;;  %v3790_v20 = vand.u32 4294901760, %v8028_v45 }
 0x855   :  { %v3716_v53 = vand.u32 4294901760, %v7997_v38  ;;  %v3777_v21 = vsub.f32 %v8002_v1, %v3776_v40  ;;  %v6291_v6 = vpack.c.bf16 %v3776_v40, %v3769_v3  ;;  %v6560_v1 = vld [vmem:[%s8372_s4 + $0x170] ss:$8 sps:$4 sm:$0xff]  }
 0x856   :  { %v3706_v35 = vand.u32 4294901760, %v8005_v17  ;;  %v3783_v27 = vand.u32 4294901760, %v8023_v9  ;;  %v3791_v61 = vsub.f32 %v8028_v45, %v3790_v20 }
 0x857   :  { %v3717_v13 = vsub.f32 %v7997_v38, %v3716_v53  ;;  %v3778_v0 = vand.u32 4294901760, %v3777_v21  ;;  %v4551_v21 = vld [vmem:[%s8375_s1] sm:$0xff] }
 0x858   :  { %v3707_v34 = vsub.f32 %v8005_v17, %v3706_v35  ;;  %v3784_v25 = vsub.f32 %v8023_v9, %v3783_v27 }
 0x859   :  { %v3718_v15 = vand.u32 4294901760, %v3717_v13  ;;  %v3792_v13 = vand.u32 4294901760, %v3791_v61  ;;  %v6570_v61 = vld [vmem:[%s8372_s4 + $0x194] ss:$8 sps:$4 sm:$0xff]  }
 0x85a   :  { %v3708_v12 = vand.u32 4294901760, %v3707_v34 }
 0x85c   :  { %5797 = vmatprep.mubr.f32.mxu1 %v3708_v12  ;;  %v6195_v12 = vpack.c.bf16 %v3778_v0, %v3771_v23  ;;  %v6564_v23 = vld [vmem:[%s8372_s4 + $0x350] ss:$8 sps:$4 sm:$0xff]   ;;  %v6565_v0 = vld [vmem:[%s8372_s4 + $0x180] ss:$8 sps:$4 sm:$0xff]  }
 0x85d   :  { %5798 = vmatmul.mubr.f32.vlgmr.msra.gmra.mrb[80].mxu1 %v3718_v15  ;;  %v3785_v15 = vand.u32 4294901760, %v3784_v25  ;;  %v6567_v25 = vld [vmem:[%s8372_s4 + $0x184] ss:$8 sps:$4 sm:$0xff]  }
 0x85e   :  { %6186 = vmatpush3.bf16.msra.mxu1 %v7896_v28  ;;  %5832 = vmatprep.mubr.f32.mxu1 %v7987_v41 }
 0x85f   :  { %6188 = vmatprep.subr.bf16.mxu1 %v6187_v49  ;;  %v6199_v28 = vpack.c.bf16 %v3792_v13, %v3785_v15  ;;  %v6573_v15 = vld [vmem:[%s8372_s4 + $0x1a4] ss:$8 sps:$4 sm:$0xff]   ;;  %v6571_v13 = vld [vmem:[%s8372_s4 + $0x1a0] ss:$8 sps:$4 sm:$0xff]  }
 0x862   :  { %6190 = vmatpush3.bf16.msra.mxu1 %v6187_v49  ;;  %v6283_v49 = vpack.c.bf16 %v3748_v47, %v3741_v56  ;;  %v6547_v56 = vld [vmem:[%s8372_s4 + $0x124] ss:$8 sps:$4 sm:$0xff]   ;;  %v6545_v47 = vld [vmem:[%s8372_s4 + $0x120] ss:$8 sps:$4 sm:$0xff]  }
 0x863   :  { %6192 = vmatprep.subr.bf16.mxu1 %v6191_v57 }
 0x866   :  { %6194 = vmatpush3.bf16.msra.mxu1 %v6191_v57  ;;  %v6563_v57 = vld [vmem:[%s8372_s4 + $0x340] ss:$8 sps:$4 sm:$0xff]  }
 0x867   :  { %6196 = vmatprep.subr.bf16.mxu1 %v6195_v12 }
 0x86a   :  { %6198 = vmatpush3.bf16.msra.mxu1 %v6195_v12  ;;  %v6568_v12 = vld [vmem:[%s8372_s4 + $0x190] ss:$8 sps:$4 sm:$0xff]  }
 0x86b   :  { %6200 = vmatprep.subr.bf16.mxu1 %v6199_v28 }
 0x86e   :  { %6202 = vmatpush3.bf16.msra.mxu1 %v6199_v28  ;;  %v6576_v28 = vld [vmem:[%s8372_s4 + $0x1b4] ss:$8 sps:$4 sm:$0xff]  }
 0x86f   :  { %6204 = vmatprep.subr.bf16.mxu1 %v7917_v30 }
 0x872   :  { %6206 = vmatpush3.bf16.msra.mxu1 %v7917_v30  ;;  %v6231_v30 = vpack.c.bf16 %v8028_v45, %v8023_v9 }
 0x873   :  { %6208 = vmatprep.subr.bf16.mxu1 %v7931_v31 }
 0x876   :  { %6210 = vmatpush3.bf16.msra.mxu1 %v7931_v31  ;;  %v8392_v31 = vand.u32 4294901760, %v7901_v60 }
 0x877   :  { %6212 = vmatprep.subr.bf16.mxu1 %v7939_v10 }
 0x87a   :  { %6214 = vmatpush3.bf16.msra.mxu1 %v7939_v10 }
 0x87b   :  { %6216 = vmatprep.subr.bf16.mxu1 %v7943_v42 }
 0x87d   :  { %5833 = vmatmul.mubr.f32.vlgmr.msra.gmra.mrb[80].mxu1 %v7979_v37 }
 0x87e   :  { %6218 = vmatpush3.bf16.msra.mxu1 %v7943_v42  ;;  %5867 = vmatprep.mubr.f32.mxu1 %v8005_v17  ;;  %v8393_v42 = vand.u32 4294901760, %v7911_v50  ;;  %v6541_v50 = vld [vmem:[%s8372_s4 + $0x104] ss:$8 sps:$4 sm:$0xff]   ;;  %v6562_v17 = vld [vmem:[%s8372_s4 + $0x174] ss:$8 sps:$4 sm:$0xff]  }
 0x87f   :  { %6220 = vmatprep.subr.bf16.mxu1 %v6219_v48 }
 0x882   :  { %6222 = vmatpush3.bf16.msra.mxu1 %v6219_v48  ;;  %v6574_v48 = vld [vmem:[%s8372_s4 + $0x1b0] ss:$8 sps:$4 sm:$0xff]  }
 0x883   :  { %6224 = vmatprep.subr.bf16.mxu1 %v6223_v58 }
 0x886   :  { %6226 = vmatpush3.bf16.msra.mxu1 %v6223_v58  ;;  %v6579_v58 = vld [vmem:[%s8372_s4 + $0x1c4] ss:$8 sps:$4 sm:$0xff]  }
 0x887   :  { %6228 = vmatprep.subr.bf16.mxu1 %v6227_v39 }
 0x88a   :  { %6230 = vmatpush3.bf16.msra.mxu1 %v6227_v39  ;;  %v6577_v39 = vld [vmem:[%s8372_s4 + $0x1c0] ss:$8 sps:$4 sm:$0xff]  }
 0x88b   :  { %6232 = vmatprep.subr.bf16.mxu1 %v6231_v30 }
 0x88e   :  { %6234 = vmatpush3.bf16.msra.mxu1 %v6231_v30  ;;  %v6582_v30 = vld [vmem:[%s8372_s4 + $0x1d4] ss:$8 sps:$4 sm:$0xff]  }
 0x88f   :  { %6236 = vmatprep.subr.bf16.mxu1 %v7947_v32 }
 0x892   :  { %6238 = vmatpush3.bf16.msra.mxu1 %v7947_v32  ;;  %v8394_v32 = vand.u32 4294901760, %v7913_v51  ;;  %v6544_v51 = vld [vmem:[%s8372_s4 + $0x114] ss:$8 sps:$4 sm:$0xff]  }
 0x893   :  { %6240 = vmatprep.subr.bf16.mxu1 %v7951_v24 }
 0x896   :  { %6242 = vmatpush3.bf16.msra.mxu1 %v7951_v24  ;;  %v6303_v24 = vpack.c.bf16 %v8394_v32, %v8393_v42 }
 0x897   :  { %6244 = vmatprep.subr.bf16.mxu1 %v7955_v19 }
 0x89a   :  { %6246 = vmatpush3.bf16.msra.mxu1 %v7955_v19  ;;  %v8395_v19 = vand.u32 4294901760, %v7925_v7  ;;  %v6542_v7 = vld [vmem:[%s8372_s4 + $0x110] ss:$8 sps:$4 sm:$0xff]  }
 0x89b   :  { %6248 = vmatprep.subr.bf16.mxu1 %v7768_v52 }
 0x89c   :  { %v6307_v55 = vpack.c.bf16 %v8396_v11, %v8395_v19 }
 0x89d   :  { %5868 = vmatmul.mubr.f32.vlgmr.msra.gmra.mrb[80].mxu1 %v7997_v38  ;;  %v6557_v38 = vld [vmem:[%s8372_s4 + $0x160] ss:$8 sps:$4 sm:$0xff]  }
 0x89e   :  { %6250 = vmatpush3.bf16.msra.mxu1 %v7768_v52  ;;  %5902 = vmatprep.mubr.f32.mxu1 %v3706_v35  ;;  %v6279_v35 = vpack.c.bf16 %v3734_v43, %v3727_v36  ;;  %v6295_v36 = vpack.c.bf16 %v3790_v20, %v3783_v27  ;;  %v8391_v43 = vand.u32 4294901760, %v7899_v44  ;;  %v4552_v27 = vld [vmem:[%s8375_s1 + $0x8] sm:$0xff] }
 0x89f   :  { %6252 = vmatprep.subr.bf16.mxu1 %v7776_v5  ;;  %v4553_v20 = vpack.c.bf16 %v4552_v27, %v4551_v21 }
 0x8a0   :  { %v6299_v10 = vpack.c.bf16 %v8392_v31, %v8391_v43 }
 0x8a2   :  { %6254 = vmatpush3.bf16.msra.mxu1 %v7776_v5 }
 0x8a3   :  { %6256 = vmatprep.subr.bf16.mxu1 %v7795_v54 }
 0x8a6   :  { %6258 = vmatpush3.bf16.msra.mxu1 %v7795_v54 }
 0x8a7   :  { %6260 = vmatprep.subr.bf16.mxu1 %v7815_v33 }
 0x8aa   :  { %6262 = vmatpush3.bf16.msra.mxu1 %v7815_v33 }
 0x8ab   :  { %6264 = vmatprep.subr.bf16.mxu1 %v7825_v59 }
 0x8ae   :  { %6266 = vmatpush3.bf16.msra.mxu1 %v7825_v59 }
 0x8af   :  { %6268 = vmatprep.subr.bf16.mxu1 %v7854_v14 }
 0x8b2   :  { %6270 = vmatpush3.bf16.msra.mxu1 %v7854_v14 }
 0x8b3   :  { %6272 = vmatprep.subr.bf16.mxu1 %v7864_v2 }
 0x8b6   :  { %6274 = vmatpush3.bf16.msra.mxu1 %v7864_v2 }
 0x8b7   :  { %6276 = vmatprep.subr.bf16.mxu1 %v7886_v29 }
 0x8ba   :  { %6278 = vmatpush3.bf16.msra.mxu1 %v7886_v29 }
 0x8bb   :  { %6280 = vmatprep.subr.bf16.mxu1 %v6279_v35 }
 0x8bd   :  { %5903 = vmatmul.mubr.f32.vlgmr.msra.gmra.mrb[80].mxu1 %v3716_v53 }
 0x8be   :  { %6282 = vmatpush3.bf16.msra.mxu1 %v6279_v35  ;;  %5937 = vmatprep.mubr.f32.mxu1 %v7987_v41  ;;  %v6580_v35 = vld [vmem:[%s8372_s4 + $0x1d0] ss:$8 sps:$4 sm:$0xff]  }
 0x8bf   :  { %6284 = vmatprep.subr.bf16.mxu1 %v6283_v49 }
 0x8c2   :  { %6286 = vmatpush3.bf16.msra.mxu1 %v6283_v49  ;;  %v6583_v49 = vld [vmem:[%s8372_s4 + $0x1e0] ss:$8 sps:$4 sm:$0xff]  }
 0x8c3   :  { %6288 = vmatprep.subr.bf16.mxu1 %v6287_v62 }
 0x8c6   :  { %6290 = vmatpush3.bf16.msra.mxu1 %v6287_v62  ;;  %v6585_v62 = vld [vmem:[%s8372_s4 + $0x1e4] ss:$8 sps:$4 sm:$0xff]  }
 0x8c7   :  { %6292 = vmatprep.subr.bf16.mxu1 %v6291_v6 }
 0x8ca   :  { %6294 = vmatpush3.bf16.msra.mxu1 %v6291_v6  ;;  %v6586_v6 = vld [vmem:[%s8372_s4 + $0x1f0] ss:$8 sps:$4 sm:$0xff]  }
 0x8cb   :  { %6296 = vmatprep.subr.bf16.mxu1 %v6295_v36 }
 0x8ce   :  { %6298 = vmatpush3.bf16.msra.mxu1 %v6295_v36  ;;  %v6588_v36 = vld [vmem:[%s8372_s4 + $0x1f4] ss:$8 sps:$4 sm:$0xff]  }
 0x8cf   :  { %6300 = vmatprep.subr.bf16.mxu1 %v6299_v10 }
 0x8d2   :  { %6302 = vmatpush3.bf16.msra.mxu1 %v6299_v10 }
 0x8d3   :  { %6304 = vmatprep.subr.bf16.mxu1 %v6303_v24 }
 0x8d6   :  { %6306 = vmatpush3.bf16.msra.mxu1 %v6303_v24 }
 0x8d7   :  { %6308 = vmatprep.subr.bf16.mxu1 %v6307_v55 }
 0x8da   :  { %6310 = vmatpush3.bf16.msra.mxu1 %v6307_v55 }
 0x8db   :  { %6312 = vmatprep.subr.bf16.mxu1 %v7768_v52 }
 0x8dd   :  { %5938 = vmatmul.mubr.f32.vlgmr.msra.gmra.mrb[80].mxu1 %v7979_v37 }
 0x8de   :  { %6314 = vmatpush3.bf16.msra.mxu1 %v7768_v52  ;;  %5972 = vmatprep.mubr.f32.mxu1 %v7987_v41  ;;  %v6537_v52 = vld [vmem:[%s8372_s4 + $0x320] ss:$8 sps:$4 sm:$0xff]  }
 0x8df   :  { %6316 = vmatprep.subr.bf16.mxu1 %v7776_v5  ;;  %5977 = vmatprep.mubr.msk.bf16.mxu0 %vm3117_vm0, %v6537_v52  ;;  %v6551_v41 = vld [vmem:[%s8372_s4 + $0x140] ss:$8 sps:$4 sm:$0xff]  }
 0x8e2   :  { %6318 = vmatpush3.bf16.msra.mxu1 %v7776_v5 }
 0x8e3   :  { %6320 = vmatprep.subr.bf16.mxu1 %v7795_v54 }
 0x8e6   :  { %6322 = vmatpush3.bf16.msra.mxu1 %v7795_v54 }
 0x8e7   :  { %6324 = vmatprep.subr.bf16.mxu1 %v7815_v33 }
 0x8ea   :  { %6326 = vmatpush3.bf16.msra.mxu1 %v7815_v33 }
 0x8eb   :  { %6328 = vmatprep.subr.bf16.mxu1 %v7825_v59 }
 0x8ee   :  { %6330 = vmatpush3.bf16.msra.mxu1 %v7825_v59 }
 0x8ef   :  { %6332 = vmatprep.subr.bf16.mxu1 %v7854_v14 }
 0x8f2   :  { %6334 = vmatpush3.bf16.msra.mxu1 %v7854_v14 }
 0x8f3   :  { %6336 = vmatprep.subr.bf16.mxu1 %v7864_v2 }
 0x8f6   :  { %6338 = vmatpush3.bf16.msra.mxu1 %v7864_v2 }
 0x8f7   :  { %6340 = vmatprep.subr.bf16.mxu1 %v7886_v29 }
 0x8fa   :  { %6342 = vmatpush3.bf16.msra.mxu1 %v7886_v29 }
 0x8fd   :  { %5973 = vmatmul.mubr.f32.vlgmr.msra.gmra.mrb[80].mxu1 %v7979_v37  ;;  %v6553_v37 = vld [vmem:[%s8372_s4 + $0x144] ss:$8 sps:$4 sm:$0xff]  }
 0x9d0   :  { %v5974_v5 = vpop.f32.mrb[80].mxu1 }
 0x9d1   :  { %v6343_v54 = vadd.f32 1e-12, %v5974_v5  ;;  %v4297_v33 = vpop.f32.mrb[81].mxu1 }
 0x9d2   :  { %v6344_v59 = vadd.f32 1e-12, %v4297_v33 }
 0x9d3   :  { %6623 = vrcp.f32 %v6343_v54 }
 0x9d4   :  { %6625 = vrcp.f32 %v6344_v59 }
 0x9dd   :  { %v6624_v14 = vpop.eup %6623 }
 0x9de   :  { %v6626_v2 = vpop.eup %6625  ;;  %v4310_v44 = vmul.f32 %v6624_v14, %v7830_v63  ;;  %v6538_v63 = vld [vmem:[%s8372_s4 + $0x330] ss:$8 sps:$4 sm:$0xff]  }
 0x9df   :  { %v4308_v29 = vmul.f32 %v6626_v2, %v7833_v22  ;;  %v6539_v22 = vld [vmem:[%s8372_s4 + $0x100] ss:$8 sps:$4 sm:$0xff]  }
 0x9e0   :  { %4312 = vst [vmem:[%s8374_s6 + $0x8] sm:$0xff] %v4310_v44 }
 0x9e1   :  { %4311 = vst [vmem:[%s8374_s6] sm:$0xff] %v4308_v29  ;;  %v4313_v60 = vpack.c.bf16 %v4310_v44, %v4308_v29 }
 0x9e3   :  { %5975 = vmatprep.subr.bf16.mxu0 %v4313_v60 }
 0x9e4   :  { %5976 = vmatpush3.bf16.msra.mxu0 %v4313_v60  ;;  %v6589_v60 = vld [vmem:[%s8372_s4 + $0x360] ss:$8 sps:$4 sm:$0xff]  }
 0x9e5   :  { %4460 = vmatprep.subr.bf16.mxu0 %v6541_v50 }
 0x9e7   :  { %5978 = vmatmul.mubr.msk.bf16.vlgmr.msra.gmra.mrb[32].mxu0 %vm3117_vm0, %v6538_v63  ;;  %v6592_v63 = vld [vmem:[%s8372_s4 + $0x204] ss:$8 sps:$4 sm:$0xff]  }
 0x9e8   :  { %4461 = vmatpush1.bf16.msra.mxu0 %v6539_v22  ;;  %4492 = vmatprep.mubr.bf16.mxu0 %v8397_v8 }
 0x9e9   :  { %4462 = vmatprep.subr.bf16.mxu0 %v6544_v51 }
 0x9ec   :  { %4463 = vmatpush1.bf16.msra.mxu0 %v6542_v7 }
 0x9ed   :  { %4464 = vmatprep.subr.bf16.mxu0 %v6547_v56 }
 0x9f0   :  { %4465 = vmatpush1.bf16.msra.mxu0 %v6545_v47 }
 0x9f1   :  { %4466 = vmatprep.subr.bf16.mxu0 %v6550_v26 }
 0x9f4   :  { %4467 = vmatpush1.bf16.msra.mxu0 %v6548_v18 }
 0x9f5   :  { %4468 = vmatprep.subr.bf16.mxu0 %v6553_v37 }
 0x9f8   :  { %4469 = vmatpush1.bf16.msra.mxu0 %v6551_v41 }
 0x9f9   :  { %4470 = vmatprep.subr.bf16.mxu0 %v6556_v4 }
 0x9fc   :  { %4471 = vmatpush1.bf16.msra.mxu0 %v6554_v16 }
 0x9fd   :  { %4472 = vmatprep.subr.bf16.mxu0 %v6559_v46 }
 0xa00   :  { %4473 = vmatpush1.bf16.msra.mxu0 %v6557_v38 }
 0xa01   :  { %4474 = vmatprep.subr.bf16.mxu0 %v6562_v17 }
 0xa04   :  { %4475 = vmatpush1.bf16.msra.mxu0 %v6560_v1 }
 0xa05   :  { %4504 = vmatprep.subr.bf16.mxu0 %v6541_v50  ;;  %v6636_v50 = vmov 0.0  }
 0xa06   :  { %6019 = vmatprep.subr.bf16.mxu1 %v6636_v50  ;;  %6035 = vmatprep.mubr.msk.bf16.mxu1 %vm6637_vm6, %v6636_v50 }
 0xa07   :  { %6020 = vmatpush3.bf16.msra.mxu1 %v6592_v63 }
 0xa08   :  { %6021 = vmatprep.subr.bf16.mxu1 %v6636_v50 }
 0xaba   :  { %v5979_v53 = vpop.f32.mrb[32].mxu0 }
 0xabb   :  { %v4364_v3 = vpop.f32.mrb[33].mxu0 }
 0xabc   :  { %v5980_v40 = vpop.f32.mrb[34].mxu0 }
 0xabd   :  { %v4503_v9 = vpack.c.bf16 %v5980_v40, %v5979_v53  ;;  %v4367_v45 = vpop.f32.mrb[35].mxu0 }
 0xabe   :  { %v4379_v34 = vpack.c.bf16 %v4367_v45, %v4364_v3 }
 0xac0   :  { %4493 = vmatmul.mubr.bf16.vlgmr.msra.gmra.mrb[36].mxu0 %v4379_v34 }
 0xac1   :  { %4505 = vmatpush1.bf16.msra.mxu0 %v6539_v22  ;;  %4536 = vmatprep.mubr.bf16.mxu0 %v8397_v8  ;;  %v6594_v22 = vld [vmem:[%s8372_s4 + $0x214] ss:$8 sps:$4 sm:$0xff]  }
 0xac2   :  { %4506 = vmatprep.subr.bf16.mxu0 %v6544_v51  ;;  %6022 = vmatpush3.bf16.msra.mxu1 %v6594_v22  ;;  %v6596_v51 = vld [vmem:[%s8372_s4 + $0x224] ss:$8 sps:$4 sm:$0xff]  }
 0xac3   :  { %6023 = vmatprep.subr.bf16.mxu1 %v6636_v50 }
 0xac5   :  { %4507 = vmatpush1.bf16.msra.mxu0 %v6542_v7  ;;  %v6598_v7 = vld [vmem:[%s8372_s4 + $0x234] ss:$8 sps:$4 sm:$0xff]  }
 0xac6   :  { %4508 = vmatprep.subr.bf16.mxu0 %v6547_v56  ;;  %6024 = vmatpush3.bf16.msra.mxu1 %v6596_v51 }
 0xac7   :  { %6025 = vmatprep.subr.bf16.mxu1 %v6636_v50 }
 0xac9   :  { %4509 = vmatpush1.bf16.msra.mxu0 %v6545_v47 }
 0xaca   :  { %4510 = vmatprep.subr.bf16.mxu0 %v6550_v26  ;;  %6026 = vmatpush3.bf16.msra.mxu1 %v6598_v7 }
 0xacb   :  { %6027 = vmatprep.subr.bf16.mxu1 %v6636_v50 }
 0xacd   :  { %4511 = vmatpush1.bf16.msra.mxu0 %v6548_v18 }
 0xace   :  { %4512 = vmatprep.subr.bf16.mxu0 %v6553_v37 }
 0xad1   :  { %4513 = vmatpush1.bf16.msra.mxu0 %v6551_v41 }
 0xad2   :  { %4514 = vmatprep.subr.bf16.mxu0 %v6556_v4 }
 0xad5   :  { %4515 = vmatpush1.bf16.msra.mxu0 %v6554_v16 }
 0xad6   :  { %4516 = vmatprep.subr.bf16.mxu0 %v6559_v46 }
 0xad9   :  { %4517 = vmatpush1.bf16.msra.mxu0 %v6557_v38 }
 0xada   :  { %4518 = vmatprep.subr.bf16.mxu0 %v6562_v17 }
 0xadd   :  { %4519 = vmatpush1.bf16.msra.mxu0 %v6560_v1 }
 0xade   :  { %5981 = vmatprep.subr.bf16.mxu0 %v4553_v20 }
 0xae0   :  { %4537 = vmatmul.mubr.bf16.vlgmr.msra.gmra.mrb[40].mxu0 %v4503_v9 }
 0xae1   :  { %5982 = vmatpush3.bf16.msra.mxu0 %v4553_v20  ;;  %5983 = vmatprep.mubr.msk.bf16.mxu0 %vm3117_vm0, %v6563_v57 }
 0xae2   :  { %4700 = vmatprep.subr.bf16.mxu0 %v6567_v25 }
 0xae8   :  { %5984 = vmatmul.mubr.msk.bf16.vlgmr.msra.gmra.mrb[44].mxu0 %vm3117_vm0, %v6564_v23 }
 0xae9   :  { %4732 = vmatprep.mubr.bf16.mxu0 %v8397_v8  ;;  %4701 = vmatpush1.bf16.msra.mxu0 %v6565_v0 }
 0xaea   :  { %4702 = vmatprep.subr.bf16.mxu0 %v6570_v61 }
 0xaed   :  { %4703 = vmatpush1.bf16.msra.mxu0 %v6568_v12 }
 0xaee   :  { %4704 = vmatprep.subr.bf16.mxu0 %v6573_v15 }
 0xaf1   :  { %4705 = vmatpush1.bf16.msra.mxu0 %v6571_v13 }
 0xaf2   :  { %4706 = vmatprep.subr.bf16.mxu0 %v6576_v28 }
 0xaf5   :  { %4707 = vmatpush1.bf16.msra.mxu0 %v6574_v48 }
 0xaf6   :  { %4708 = vmatprep.subr.bf16.mxu0 %v6579_v58 }
 0xaf9   :  { %4709 = vmatpush1.bf16.msra.mxu0 %v6577_v39 }
 0xafa   :  { %4710 = vmatprep.subr.bf16.mxu0 %v6582_v30 }
 0xafd   :  { %4711 = vmatpush1.bf16.msra.mxu0 %v6580_v35 }
 0xafe   :  { %4712 = vmatprep.subr.bf16.mxu0 %v6585_v62 }
 0xb01   :  { %4713 = vmatpush1.bf16.msra.mxu0 %v6583_v49 }
 0xb02   :  { %4714 = vmatprep.subr.bf16.mxu0 %v6588_v36 }
 0xb05   :  { %4715 = vmatpush1.bf16.msra.mxu0 %v6586_v6 }
 0xb06   :  { %4744 = vmatprep.subr.bf16.mxu0 %v6567_v25 }
 0xb93   :  { %v4494_v43 = vpop.f32.mrb[36].mxu0 }
 0xb94   :  { %v4496_v31 = vpop.f32.mrb[37].mxu0 }
 0xb95   :  { %v4498_v10 = vpop.f32.mrb[38].mxu0 }
 0xb96   :  { %v4500_v42 = vpop.f32.mrb[39].mxu0 }
 0xbb3   :  { %v4538_v32 = vpop.f32.mrb[40].mxu0 }
 0xbb4   :  { %v8275_v24 = vadd.f32 %v4538_v32, %v4496_v31  ;;  %v4540_v19 = vpop.f32.mrb[41].mxu0 }
 0xbb5   :  { %v4547_v11 = vsub.f32 %v4494_v43, %v4540_v19  ;;  %v4542_v55 = vpop.f32.mrb[42].mxu0 }
 0xbb6   :  { %v8277_v52 = vadd.f32 %v4542_v55, %v4500_v42  ;;  %v4544_v5 = vpop.f32.mrb[43].mxu0 }
 0xbb7   :  { %v8279_v54 = vsub.f32 %v4498_v10, %v4544_v5 }
 0xbbb   :  { %v5985_v33 = vpop.f32.mrb[44].mxu0 }
 0xbbc   :  { %v4604_v59 = vpop.f32.mrb[45].mxu0 }
 0xbbd   :  { %v5986_v14 = vpop.f32.mrb[46].mxu0 }
 0xbbe   :  { %v4743_v2 = vpack.c.bf16 %v5986_v14, %v5985_v33  ;;  %v4607_v44 = vpop.f32.mrb[47].mxu0 }
 0xbbf   :  { %v4619_v29 = vpack.c.bf16 %v4607_v44, %v4604_v59 }
 0xbc1   :  { %4733 = vmatmul.mubr.bf16.vlgmr.msra.gmra.mrb[48].mxu0 %v4619_v29 }
 0xbc2   :  { %4745 = vmatpush1.bf16.msra.mxu0 %v6565_v0  ;;  %4776 = vmatprep.mubr.bf16.mxu0 %v8397_v8  ;;  %v6600_v8 = vld [vmem:[%s8372_s4 + $0x244] ss:$8 sps:$4 sm:$0xff]  }
 0xbc3   :  { %4746 = vmatprep.subr.bf16.mxu0 %v6570_v61  ;;  %6028 = vmatpush3.bf16.msra.mxu1 %v6600_v8 }
 0xbc4   :  { %6029 = vmatprep.subr.bf16.mxu1 %v6636_v50 }
 0xbc6   :  { %4747 = vmatpush1.bf16.msra.mxu0 %v6568_v12  ;;  %v6590_v12 = vld [vmem:[%s8372_s4 + $0x370] ss:$8 sps:$4 sm:$0xff]  }
 0xbc7   :  { %4748 = vmatprep.subr.bf16.mxu0 %v6573_v15  ;;  %v6591_v15 = vld [vmem:[%s8372_s4 + $0x200] ss:$8 sps:$4 sm:$0xff]  }
 0xbca   :  { %4749 = vmatpush1.bf16.msra.mxu0 %v6571_v13  ;;  %v6593_v13 = vld [vmem:[%s8372_s4 + $0x210] ss:$8 sps:$4 sm:$0xff]  }
 0xbcb   :  { %4750 = vmatprep.subr.bf16.mxu0 %v6576_v28  ;;  %v6595_v28 = vld [vmem:[%s8372_s4 + $0x220] ss:$8 sps:$4 sm:$0xff]  }
 0xbce   :  { %4751 = vmatpush1.bf16.msra.mxu0 %v6574_v48  ;;  %v6597_v48 = vld [vmem:[%s8372_s4 + $0x230] ss:$8 sps:$4 sm:$0xff]  }
 0xbcf   :  { %4752 = vmatprep.subr.bf16.mxu0 %v6579_v58  ;;  %v6599_v58 = vld [vmem:[%s8372_s4 + $0x240] ss:$8 sps:$4 sm:$0xff]  }
 0xbd2   :  { %4753 = vmatpush1.bf16.msra.mxu0 %v6577_v39  ;;  %v6601_v39 = vld [vmem:[%s8372_s4 + $0x250] ss:$8 sps:$4 sm:$0xff]  }
 0xbd3   :  { %4754 = vmatprep.subr.bf16.mxu0 %v6582_v30  ;;  %v6602_v30 = vld [vmem:[%s8372_s4 + $0x254] ss:$8 sps:$4 sm:$0xff]  }
 0xbd4   :  { %6030 = vmatpush3.bf16.msra.mxu1 %v6602_v30 }
 0xbd5   :  { %6031 = vmatprep.subr.bf16.mxu1 %v6636_v50 }
 0xbd6   :  { %4755 = vmatpush1.bf16.msra.mxu0 %v6580_v35  ;;  %v6603_v35 = vld [vmem:[%s8372_s4 + $0x260] ss:$8 sps:$4 sm:$0xff]  }
 0xbd7   :  { %4756 = vmatprep.subr.bf16.mxu0 %v6585_v62  ;;  %v6605_v62 = vld [vmem:[%s8372_s4 + $0x270] ss:$8 sps:$4 sm:$0xff]  }
 0xbda   :  { %4757 = vmatpush1.bf16.msra.mxu0 %v6583_v49  ;;  %v6604_v49 = vld [vmem:[%s8372_s4 + $0x264] ss:$8 sps:$4 sm:$0xff]  }
 0xbdb   :  { %4758 = vmatprep.subr.bf16.mxu0 %v6588_v36  ;;  %6032 = vmatpush3.bf16.msra.mxu1 %v6604_v49 }
 0xbdc   :  { %6033 = vmatprep.subr.bf16.mxu1 %v6636_v50 }
 0xbde   :  { %4759 = vmatpush1.bf16.msra.mxu0 %v6586_v6  ;;  %v6606_v6 = vld [vmem:[%s8372_s4 + $0x274] ss:$8 sps:$4 sm:$0xff]  }
 0xbdf   :  { %6034 = vmatpush3.bf16.msra.mxu1 %v6606_v6 }
 0xbe1   :  { %4777 = vmatmul.mubr.bf16.vlgmr.msra.gmra.mrb[52].mxu0 %v4743_v2 }
 0xbe2   :  { %5989 = vmatprep.mubr.msk.bf16.mxu0 %vm3117_vm0, %v6589_v60 }
 0xc94   :  { %v4734_v56 = vpop.f32.mrb[48].mxu0 }
 0xc95   :  { %v4736_v47 = vpop.f32.mrb[49].mxu0 }
 0xc96   :  { %v4738_v26 = vpop.f32.mrb[50].mxu0 }
 0xc97   :  { %v4740_v18 = vpop.f32.mrb[51].mxu0 }
 0xcb4   :  { %v4778_v37 = vpop.f32.mrb[52].mxu0 }
 0xcb5   :  { %v4789_v41 = vadd.f32 %v4778_v37, %v4736_v47  ;;  %v4780_v4 = vpop.f32.mrb[53].mxu0 }
 0xcb6   :  { %v4787_v16 = vsub.f32 %v4734_v56, %v4780_v4  ;;  %v4782_v46 = vpop.f32.mrb[54].mxu0 }
 0xcb7   :  { %v4793_v38 = vmul.f32 %v4789_v41, %v8275_v24  ;;  %v4799_v1 = vmul.f32 %v4789_v41, %v4547_v11  ;;  %v4790_v17 = vadd.f32 %v4782_v46, %v4740_v18  ;;  %v4784_v53 = vpop.f32.mrb[55].mxu0 }
 0xcb8   :  { %v4791_v3 = vmul.f32 %v4787_v16, %v4547_v11  ;;  %v4797_v40 = vmul.f32 %v4787_v16, %v8275_v24  ;;  %v4788_v9 = vsub.f32 %v4738_v26, %v4784_v53 }
 0xcb9   :  { %v4794_v45 = vmul.f32 %v4790_v17, %v8277_v52  ;;  %v4800_v34 = vmul.f32 %v4790_v17, %v8279_v54 }
 0xcba   :  { %v4795_v21 = vsub.f32 %v4791_v3, %v4793_v38  ;;  %v4801_v27 = vadd.f32 %v4799_v1, %v4797_v40  ;;  %v4792_v20 = vmul.f32 %v4788_v9, %v8279_v54  ;;  %v4798_v57 = vmul.f32 %v4788_v9, %v8277_v52 }
 0xcbc   :  { %v4796_v23 = vsub.f32 %v4792_v20, %v4794_v45  ;;  %v4802_v0 = vadd.f32 %v4800_v34, %v4798_v57 }
 0xcbe   :  { %v4803_v25 = vpack.c.bf16 %v4796_v23, %v4795_v21  ;;  %v4869_v61 = vpack.c.bf16 %v4802_v0, %v4801_v27 }
 0xcc0   :  { %5987 = vmatprep.subr.bf16.mxu0 %v4803_v25 }
 0xcc1   :  { %5988 = vmatpush3.bf16.msra.mxu0 %v4803_v25 }
 0xcc2   :  { %5993 = vmatprep.subr.bf16.mxu0 %v4869_v61 }
 0xcc4   :  { %5990 = vmatmul.mubr.msk.bf16.vlgmr.msra.gmra.mrb[56].mxu0 %vm3117_vm0, %v6590_v12 }
 0xcc5   :  { %5994 = vmatpush3.bf16.msra.mxu0 %v4869_v61  ;;  %5995 = vmatprep.mubr.msk.bf16.mxu0 %vm3117_vm0, %v6589_v60 }
 0xcc6   :  { %5999 = vmatprep.subr.bf16.mxu0 %v6636_v50 }
 0xccc   :  { %5996 = vmatmul.mubr.msk.bf16.vlgmr.msra.gmra.mrb[60].mxu0 %vm3117_vm0, %v6590_v12 }
 0xccd   :  { %6000 = vmatpush3.bf16.msra.mxu0 %v6591_v15  ;;  %6015 = vmatprep.mubr.msk.bf16.mxu0 %vm6637_vm6, %v6636_v50 }
 0xcce   :  { %6001 = vmatprep.subr.bf16.mxu0 %v6636_v50 }
 0xcd1   :  { %6002 = vmatpush3.bf16.msra.mxu0 %v6593_v13 }
 0xcd2   :  { %6003 = vmatprep.subr.bf16.mxu0 %v6636_v50 }
 0xcd5   :  { %6004 = vmatpush3.bf16.msra.mxu0 %v6595_v28 }
 0xcd6   :  { %6005 = vmatprep.subr.bf16.mxu0 %v6636_v50 }
 0xcd9   :  { %6006 = vmatpush3.bf16.msra.mxu0 %v6597_v48 }
 0xcda   :  { %6007 = vmatprep.subr.bf16.mxu0 %v6636_v50 }
 0xcdd   :  { %6008 = vmatpush3.bf16.msra.mxu0 %v6599_v58 }
 0xcde   :  { %6009 = vmatprep.subr.bf16.mxu0 %v6636_v50 }
 0xce1   :  { %6010 = vmatpush3.bf16.msra.mxu0 %v6601_v39 }
 0xce2   :  { %6011 = vmatprep.subr.bf16.mxu0 %v6636_v50 }
 0xce5   :  { %6012 = vmatpush3.bf16.msra.mxu0 %v6603_v35 }
 0xce6   :  { %6013 = vmatprep.subr.bf16.mxu0 %v6636_v50 }
 0xce9   :  { %6014 = vmatpush3.bf16.msra.mxu0 %v6605_v62 }
 0xd97   :  { %v5991_v36 = vpop.f32.mrb[56].mxu0 }
 0xd98   :  { %v4854_v43 = vpop.f32.mrb[57].mxu0 }
 0xd99   :  { %v5992_v31 = vpop.f32.mrb[58].mxu0 }
 0xd9a   :  { %v4857_v10 = vpop.f32.mrb[59].mxu0 }
 0xd9f   :  { %v5997_v42 = vpop.f32.mrb[60].mxu0 }
 0xda0   :  { %v4919_v32 = vsub.f32 %v4854_v43, %v5997_v42  ;;  %v4904_v24 = vpop.f32.mrb[61].mxu0 }
 0xda1   :  { %v4921_v19 = vadd.f32 %v5991_v36, %v4904_v24  ;;  %v5998_v11 = vpop.f32.mrb[62].mxu0 }
 0xda2   :  { %v4920_v55 = vsub.f32 %v4857_v10, %v5998_v11  ;;  %v4907_v52 = vpop.f32.mrb[63].mxu0 }
 0xda3   :  { %v4922_v5 = vadd.f32 %v5992_v31, %v4907_v52 }
 0xda4   :  { %v4923_v54 = vpack.c.bf16 %v4920_v55, %v4919_v32 }
 0xda5   :  { %v5013_v33 = vpack.c.bf16 %v4922_v5, %v4921_v19 }
 0xda6   :  { %6016 = vmatmul.mubr.bf16.vlgmr.msra.gmra.mrb[64].mxu0 %v4923_v54 }
 0xda7   :  { %6036 = vmatmul.mubr.bf16.vlgmr.msra.gmra.mrb[84].mxu1 %v5013_v33 }
 0xe79   :  { %v5006_v59 = vpop.f32.mrb[64].mxu0 }
 0xe7a   :  { %v6017_v14 = vpop.f32.mrb[65].mxu0  ;;  %v5096_v2 = vpop.f32.mrb[84].mxu1 }
 0xe7b   :  { %v5103_v44 = vsub.f32 %v5006_v59, %v5096_v2  ;;  %v5009_v29 = vpop.f32.mrb[66].mxu0  ;;  %v6037_v60 = vpop.f32.mrb[85].mxu1 }
 0xe7c   :  { %v6018_v50 = vpop.f32.mrb[67].mxu0  ;;  %v5099_v63 = vpop.f32.mrb[86].mxu1 }
 0xe7d   :  { %5105 = vst [vmem:[%s8376_s5] sm:$0xff] %v5103_v44  ;;  %v5104_v22 = vsub.f32 %v5009_v29, %v5099_v63  ;;  %v6038_v51 = vpop.f32.mrb[87].mxu1 }
 0xe7f   :  { %5106 = vst [vmem:[%s8376_s5 + $0x8] sm:$0xff] %v5104_v22 }

</bundles_post_ra>
